<compile_context>
chip_gen: v7x
topology: tpu7x:2x2x1
jax: 0.10.0
libtpu: 0.0.40
codegen_flags: <defaults>
</compile_context>

<pallas_src>
import jax
import jax.numpy as jnp
from jax.experimental import pallas as pl
from jax.experimental.pallas import tpu as pltpu


# ----------------------------------------------------------------------------- fused kernel

def _corresnet_kernel(pose_in_ref, resid_ref,
                      ew1, eb1, ew2, eb2, ew3, eb3, ew4, eb4,
                      hw1, hb1, hw2, hb2, hw3, hb3,
                      scores_ref, pose_out_ref):
    # One grid step == P frame pairs, already stacked on sublanes by the wrapper:
    #   rows [p*2*Ns, p*2*Ns+Ns)   -> frame 0 of pair p
    #   rows [p*2*Ns+Ns, (p+1)*2*Ns) -> frame 1 of pair p
    P = scores_ref.shape[1]
    Ns = scores_ref.shape[2]

    def dense(h, w_ref, b_ref, relu=True):
        # bf16 operands, f32 MXU accumulation; bias already has BN folded in (f32).
        y = jnp.dot(h.astype(jnp.bfloat16), w_ref[...],
                    preferred_element_type=jnp.float32) + b_ref[...]
        return jnp.maximum(y, 0.0) if relu else y

    # --- grasp pose encoder MLP (KeypointEncoder), all frames of the block stacked on sublanes ---
    x = pose_in_ref[0]                                                 # (M, 12)
    h = dense(x, ew1, eb1)
    h = dense(h, ew2, eb2)
    h = dense(h, ew3, eb3)
    pose = dense(h, ew4, eb4, relu=False)                              # (M, 4D)
    pose_out_ref[0] = pose

    # --- residual add (global max-pool + seed/local/color concat precomputed in wrapper) ---
    x = pose + resid_ref[0]                                            # (M, 4D)

    # --- head: conv1(+bn1)+relu -> conv2(+bn2)+relu -> conv3 (BN folded into weights) ---
    h = dense(x, hw1, hb1)
    h = dense(h, hw2, hb2)
    d = dense(h, hw3, hb3, relu=False)                                 # (M, D)

    # --- pairwise cosine similarity: normalize first (EUP reciprocal), then one matmul/pair ---
    inv = pl.reciprocal(jnp.sqrt(jnp.sum(d * d, axis=-1, keepdims=True)) + 1e-6,
                        approx=True)                                   # (M, 1)
    dn = (d * inv).astype(jnp.bfloat16)                                # (M, D)
    for p in range(P):                                                 # static unroll, P in {1, 2}
        base = p * 2 * Ns
        d1 = dn[base:base + Ns]                                        # (Ns, D) frame 0
        d2 = dn[base + Ns:base + 2 * Ns]                               # (Ns, D) frame 1
        scores_ref[0, p] = jax.lax.dot_general(
            d1, d2, (((1,), (1,)), ((), ())),                          # trans_b matmul
            preferred_element_type=jnp.float32)                        # (Ns, Ns)


# ----------------------------------------------------------------------------- wrapper

def corresnet_fused(grasp_pose_in, resid, flat_params, pairs_per_step=None):
    B, Ns, Cpose = grasp_pose_in.shape
    C4 = resid.shape[-1]            # 4*D
    assert B % 2 == 0, "batch must hold frame pairs"
    Bh = B // 2

    # 2 pairs/step amortizes per-step overhead on v6e/v7x, but keep >= 2 grid steps so both
    # v7x TensorCores get work under dimension_semantics=("parallel",).
    if pairs_per_step is None:
        pairs_per_step = 2 if (Bh >= 4 and Bh % 2 == 0) else 1
    P = pairs_per_step
    assert Bh % P == 0
    G = Bh // P
    M = P * 2 * Ns

    # Pre-stack pairs into (G, M, C) slabs so the kernel needs no in-kernel concats/splits.
    pose_s = grasp_pose_in.reshape(G, M, Cpose)
    resid_s = resid.reshape(G, M, C4)

    data_specs = [
        pl.BlockSpec((1, M, Cpose), lambda g: (g, 0, 0)),
        pl.BlockSpec((1, M, C4), lambda g: (g, 0, 0)),
    ]
    param_specs = [pl.BlockSpec(a.shape, lambda g: (0, 0)) for a in flat_params]

    scores, pose_feat = pl.pallas_call(
        _corresnet_kernel,
        out_shape=(jax.ShapeDtypeStruct((G, P, Ns, Ns), jnp.float32),
                   jax.ShapeDtypeStruct((G, M, C4), jnp.float32)),
        grid=(G,),
        in_specs=data_specs + param_specs,
        out_specs=(pl.BlockSpec((1, P, Ns, Ns), lambda g: (g, 0, 0, 0)),
                   pl.BlockSpec((1, M, C4), lambda g: (g, 0, 0))),
        compiler_params=pltpu.CompilerParams(
            dimension_semantics=("parallel",)),
    )(pose_s, resid_s, *flat_params)

    return scores.reshape(Bh, Ns, Ns), pose_feat.reshape(B, Ns, C4)


# ----------------------------------------------------------------------------- module glue

def prepare_params(params):
    """Fold eval-mode BN into conv weights/biases and cast weights to bf16."""
    pe, hd = params["pose_encoder"], params["head"]

    def fold(w, b, s, t):
        return (w * s).astype(jnp.bfloat16), (b * s + t).astype(jnp.float32)

    flat = []
    for i in range(1, 5):
        w, b = pe[f"w{i}"], pe[f"b{i}"]
        if i < 4:
            w, b = fold(w, b, pe[f"s{i}"], pe[f"t{i}"])
        else:
            w, b = w.astype(jnp.bfloat16), b.astype(jnp.float32)
        flat += [w, b]
    for i in range(1, 4):
        w, b = hd[f"w{i}"], hd[f"b{i}"]
        if i < 3:
            w, b = fold(w, b, hd[f"s{i}"], hd[f"t{i}"])
        else:
            w, b = w.astype(jnp.bfloat16), b.astype(jnp.float32)
        flat += [w, b]
    return tuple(flat)


def _build_residual(end_points):
    """sa4 global max-pool broadcast + [seed, local, color] lane concat, computed once in XLA."""
    sa4 = end_points["sa4_features"]                           # (B, Lsa4, D)
    seed = end_points["fp2_features"]                          # (B, Ns, D)
    local_feat = end_points["local_grasp_features"]            # (B, Ns, D)  (CloudCrop output)
    color_feat = end_points["local_color_features"]            # (B, Ns, D)
    B, Ns = seed.shape[:2]
    D = sa4.shape[-1]
    g = jnp.broadcast_to(jnp.max(sa4, axis=1, keepdims=True), (B, Ns, D))
    return jnp.concatenate([g, seed, local_feat, color_feat], axis=-1)   # (B, Ns, 4D)


def corresnet_forward(end_points, params):
    """Pallas implementation of CorresNet.forward (cosine=True, batch_grasp_preds given)."""
    preds = end_points["batch_grasp_preds"]                    # (B, Ns, 17)
    # grasp_translation (3) ++ grasp_rotation (9) -> (B, Ns, 12), channel-last
    grasp_pose_in = jnp.concatenate([preds[:, :, 13:16], preds[:, :, 4:13]], axis=-1)
    resid = _build_residual(end_points)

    flat = prepare_params(params)
    scores, pose_feat = corresnet_fused(grasp_pose_in, resid, flat)

    out = dict(end_points)
    out["grasp_pose_feature"] = pose_feat
    out["grasp_correspondance"] = scores
    return out


# ----------------------------------------------------------------------------- params

def _bn_fold(gamma, beta, mean, var, eps=1e-5):
    scale = gamma / jnp.sqrt(var + eps)
    shift = beta - mean * scale
    return scale.reshape(1, -1).astype(jnp.float32), shift.reshape(1, -1).astype(jnp.float32)


def _conv_params(key, cin, cout):
    kw, kb = jax.random.split(key)
    w = (0.05 * jax.random.normal(kw, (cin, cout))).astype(jnp.float32)
    b = (0.01 * jax.random.normal(kb, (1, cout))).astype(jnp.float32)
    return w, b


def _bn_params(key, c):
    kg, kb, km, kv = jax.random.split(key, 4)
    gamma = 0.5 + jax.random.uniform(kg, (c,))
    beta = 0.1 * jax.random.normal(kb, (c,))
    mean = 0.1 * jax.random.normal(km, (c,))
    var = 0.5 + jax.random.uniform(kv, (c,))
    return _bn_fold(gamma, beta, mean, var)


def init_params(key, feature_dim):
    D = feature_dim
    keys = jax.random.split(key, 16)
    # KeypointEncoder(4D, [128, 256, 512]) -> MLP channels [12, 128, 256, 512, 4D]
    enc_ch = [12, 128, 256, 512, 4 * D]
    pe = {}
    for i in range(4):
        w, b = _conv_params(keys[i], enc_ch[i], enc_ch[i + 1])
        pe[f"w{i+1}"], pe[f"b{i+1}"] = w, b
        if i < 3:
            s, t = _bn_params(keys[4 + i], enc_ch[i + 1])
            pe[f"s{i+1}"], pe[f"t{i+1}"] = s, t
    # head: conv1 (4D->3D)+bn1, conv2 (3D->2D)+bn2, conv3 (2D->D)
    head_ch = [4 * D, 3 * D, 2 * D, D]
    hd = {}
    for i in range(3):
        w, b = _conv_params(keys[8 + i], head_ch[i], head_ch[i + 1])
        hd[f"w{i+1}"], hd[f"b{i+1}"] = w, b
        if i < 2:
            s, t = _bn_params(keys[12 + i], head_ch[i + 1])
            hd[f"s{i+1}"], hd[f"t{i+1}"] = s, t
    return {"pose_encoder": pe, "head": hd}


# ----------------------------------------------------------------------------- references

def _ref_mirrored(grasp_pose_in, resid, flat):
    """Pure-JAX reference mirroring the kernel numerics (folded BN, bf16 matmuls, f32 acc,
    pre-normalized bf16 cosine dot; exact division instead of approx reciprocal)."""
    (ew1, eb1, ew2, eb2, ew3, eb3, ew4, eb4,
     hw1, hb1, hw2, hb2, hw3, hb3) = flat

    def dense(h, w, b, relu=True):
        y = jnp.dot(h.astype(jnp.bfloat16), w, preferred_element_type=jnp.float32) + b
        return jnp.maximum(y, 0.0) if relu else y

    h = dense(grasp_pose_in, ew1, eb1)
    h = dense(h, ew2, eb2)
    h = dense(h, ew3, eb3)
    pose = dense(h, ew4, eb4, relu=False)                      # (B, Ns, 4D)

    x = pose + resid
    h = dense(x, hw1, hb1)
    h = dense(h, hw2, hb2)
    d = dense(h, hw3, hb3, relu=False)                         # (B, Ns, D)

    B, Ns, Dd = d.shape
    inv = 1.0 / (jnp.sqrt(jnp.sum(d * d, axis=-1, keepdims=True)) + 1e-6)
    dn = (d * inv).astype(jnp.bfloat16)
    gf = dn.reshape(B // 2, 2, Ns, Dd)
    d1, d2 = gf[:, 0], gf[:, 1]
    scores = jnp.einsum("bnd,bmd->bnm", d1, d2,
                        preferred_element_type=jnp.float32)
    return scores, pose


def _ref_module_f32(end_points, params):
    """Exact f32 module math (unfolded BN, highest-precision matmuls) — semantic sanity only."""
    hp = jax.lax.Precision.HIGHEST
    preds = end_points["batch_grasp_preds"]
    B, Ns, _ = preds.shape
    x = jnp.concatenate([preds[:, :, 13:16], preds[:, :, 4:13]], axis=-1)
    pe = params["pose_encoder"]
    h = x
    for i in range(1, 5):
        h = jnp.einsum("bnc,cd->bnd", h, pe[f"w{i}"], precision=hp) + pe[f"b{i}"]
        if i < 4:
            h = jnp.maximum(h * pe[f"s{i}"] + pe[f"t{i}"], 0.0)
    pose_feat = h
    g = jnp.max(end_points["sa4_features"], axis=1, keepdims=True)
    g = jnp.broadcast_to(g, (B, Ns, g.shape[-1]))
    feat = jnp.concatenate([g, end_points["fp2_features"],
                            end_points["local_grasp_features"],
                            end_points["local_color_features"]], axis=-1)
    h = pose_feat + feat
    hd = params["head"]
    for i in range(1, 4):
        h = jnp.einsum("bnc,cd->bnd", h, hd[f"w{i}"], precision=hp) + hd[f"b{i}"]
        if i < 3:
            h = jnp.maximum(h * hd[f"s{i}"] + hd[f"t{i}"], 0.0)
    D = h.shape[-1]
    gf = h.reshape(B // 2, 2, Ns, D)
    d1, d2 = gf[:, 0], gf[:, 1]
    dot = jnp.einsum("bnd,bmd->bnm", d1, d2, precision=hp)
    n1 = jnp.linalg.norm(d1, axis=-1) + 1e-6
    n2 = jnp.linalg.norm(d2, axis=-1) + 1e-6
    return dot / (n1[:, :, None] * n2[:, None, :])


# ----------------------------------------------------------------------------- main

def _build_end_points(key, B, Ns, D, Lsa4, Npts):
    k = jax.random.split(key, 8)
    return {
        "batch_grasp_preds": jax.random.normal(k[0], (B, Ns, 17), jnp.float32),
        "fp2_features": jax.random.normal(k[1], (B, Ns, D), jnp.float32),        # channel-last
        "sa4_features": jax.random.normal(k[2], (B, Lsa4, D), jnp.float32),
        "local_grasp_features": jax.random.normal(k[3], (B, Ns, D), jnp.float32),
        "local_color_features": jax.random.normal(k[4], (B, Ns, D), jnp.float32),
        # unused in this path (only consumed by CloudCrop, see TODO above):
        "input_xyz": jax.random.normal(k[5], (B, Npts, 3), jnp.float32),
        "cloud_colors": jax.random.normal(k[6], (B, Npts, 3), jnp.float32),
        "fp2_xyz": jax.random.normal(k[7], (B, Ns, 3), jnp.float32),
    }


def _check(end_points, params):
    B = end_points["batch_grasp_preds"].shape[0]
    Ns = end_points["fp2_features"].shape[1]
    D = end_points["sa4_features"].shape[-1]

    out = corresnet_forward(end_points, params)
    scores = out["grasp_correspondance"]
    pose_feat = out["grasp_pose_feature"]
    jax.block_until_ready(scores)
    jax.block_until_ready(pose_feat)

    assert scores.shape == (B // 2, Ns, Ns)
    assert pose_feat.shape == (B, Ns, 4 * D)
    assert bool(jnp.all(jnp.isfinite(scores)))

    # Tight check: kernel vs. pure-JAX reference with matching numerics (folded BN, bf16 matmuls).
    preds = end_points["batch_grasp_preds"]
    grasp_pose_in = jnp.concatenate([preds[:, :, 13:16], preds[:, :, 4:13]], axis=-1)
    resid = _build_residual(end_points)
    ref_scores, ref_pose = _ref_mirrored(grasp_pose_in, resid, prepare_params(params))
    assert bool(jnp.allclose(pose_feat, ref_pose, atol=5e-3, rtol=5e-3))
    # approx reciprocal + bf16 descriptor quantization -> ~1e-2 headroom on [-1,1] scores
    assert bool(jnp.allclose(scores, ref_scores, atol=1e-2, rtol=1e-2))

    # Loose semantic check vs. the exact f32 module math (bf16 weight quantization drift).
    ref32 = _ref_module_f32(end_points, params)
    assert float(jnp.max(jnp.abs(scores - ref32))) < 0.15


if __name__ == "__main__":
    Ns, D, Lsa4, Npts = 64, 32, 16, 128
    key = jax.random.PRNGKey(0)
    k_in4, k_in8, k_par = jax.random.split(key, 3)
    params = init_params(k_par, D)

    # B=4 -> Bh=2 -> 1 pair per grid step, grid=(2,)
    _check(_build_end_points(k_in4, 4, Ns, D, Lsa4, Npts), params)
    # B=8 -> Bh=4 -> 2 pairs per grid step, grid=(2,)  (exercises the batched-pair path)
    _check(_build_end_points(k_in8, 8, Ns, D, Lsa4, Npts), params)

    print("KERNEL_OK")
</pallas_src>

<mosaic_0001>
module attributes {stable_mosaic.version = 11 : i64} {
  func.func @_corresnet_kernel(%arg0: i32, %arg1: memref<1x128x12xf32, #tpu.memory_space<vmem>>, %arg2: memref<1x128x128xf32, #tpu.memory_space<vmem>>, %arg3: memref<12x128xbf16, #tpu.memory_space<vmem>>, %arg4: memref<1x128xf32, #tpu.memory_space<vmem>>, %arg5: memref<128x256xbf16, #tpu.memory_space<vmem>>, %arg6: memref<1x256xf32, #tpu.memory_space<vmem>>, %arg7: memref<256x512xbf16, #tpu.memory_space<vmem>>, %arg8: memref<1x512xf32, #tpu.memory_space<vmem>>, %arg9: memref<512x128xbf16, #tpu.memory_space<vmem>>, %arg10: memref<1x128xf32, #tpu.memory_space<vmem>>, %arg11: memref<128x96xbf16, #tpu.memory_space<vmem>>, %arg12: memref<1x96xf32, #tpu.memory_space<vmem>>, %arg13: memref<96x64xbf16, #tpu.memory_space<vmem>>, %arg14: memref<1x64xf32, #tpu.memory_space<vmem>>, %arg15: memref<64x32xbf16, #tpu.memory_space<vmem>>, %arg16: memref<1x32xf32, #tpu.memory_space<vmem>>, %arg17: memref<1x1x64x64xf32, #tpu.memory_space<vmem>>, %arg18: memref<1x128x128xf32, #tpu.memory_space<vmem>>) attributes {dimension_semantics = [#tpu.dimension_semantics<parallel>], iteration_bounds = array<i64: 2>, scalar_prefetch = 0 : i64, scratch_operands = 0 : i64, tpu.core_type = #tpu.core_type<tc>, window_params = [{transform_indices = @transform_0, window_bounds = array<i64: 1, 128, 12>}, {transform_indices = @transform_1, window_bounds = array<i64: 1, 128, 128>}, {pipeline_mode = #tpu.pipeline_mode<synchronous>, transform_indices = @transform_2, window_bounds = array<i64: 12, 128>}, {pipeline_mode = #tpu.pipeline_mode<synchronous>, transform_indices = @transform_3, window_bounds = array<i64: 1, 128>}, {pipeline_mode = #tpu.pipeline_mode<synchronous>, transform_indices = @transform_4, window_bounds = array<i64: 128, 256>}, {pipeline_mode = #tpu.pipeline_mode<synchronous>, transform_indices = @transform_5, window_bounds = array<i64: 1, 256>}, {pipeline_mode = #tpu.pipeline_mode<synchronous>, transform_indices = @transform_6, window_bounds = array<i64: 256, 512>}, {pipeline_mode = #tpu.pipeline_mode<synchronous>, transform_indices = @transform_7, window_bounds = array<i64: 1, 512>}, {pipeline_mode = #tpu.pipeline_mode<synchronous>, transform_indices = @transform_8, window_bounds = array<i64: 512, 128>}, {pipeline_mode = #tpu.pipeline_mode<synchronous>, transform_indices = @transform_9, window_bounds = array<i64: 1, 128>}, {pipeline_mode = #tpu.pipeline_mode<synchronous>, transform_indices = @transform_10, window_bounds = array<i64: 128, 96>}, {pipeline_mode = #tpu.pipeline_mode<synchronous>, transform_indices = @transform_11, window_bounds = array<i64: 1, 96>}, {pipeline_mode = #tpu.pipeline_mode<synchronous>, transform_indices = @transform_12, window_bounds = array<i64: 96, 64>}, {pipeline_mode = #tpu.pipeline_mode<synchronous>, transform_indices = @transform_13, window_bounds = array<i64: 1, 64>}, {pipeline_mode = #tpu.pipeline_mode<synchronous>, transform_indices = @transform_14, window_bounds = array<i64: 64, 32>}, {pipeline_mode = #tpu.pipeline_mode<synchronous>, transform_indices = @transform_15, window_bounds = array<i64: 1, 32>}, {transform_indices = @transform_16, window_bounds = array<i64: 1, 1, 64, 64>}, {transform_indices = @transform_17, window_bounds = array<i64: 1, 128, 128>}]} {
    %c0 = arith.constant 0 : index
    %c0_0 = arith.constant 0 : index
    %c0_1 = arith.constant 0 : index
    %0 = vector.load %arg1[%c0, %c0_0, %c0_1] : memref<1x128x12xf32, #tpu.memory_space<vmem>>, vector<1x128x12xf32>
    %1 = vector.shape_cast %0 : vector<1x128x12xf32> to vector<128x12xf32>
    %2 = arith.truncf %1 : vector<128x12xf32> to vector<128x12xbf16>
    %c0_2 = arith.constant 0 : index
    %c0_3 = arith.constant 0 : index
    %3 = vector.load %arg3[%c0_2, %c0_3] : memref<12x128xbf16, #tpu.memory_space<vmem>>, vector<12x128xbf16>
    %cst = arith.constant dense<0.000000e+00> : vector<128x128xf32>
    %4 = tpu.matmul %2, %3, %cst {dimension_numbers = #tpu.dot_dimension_numbers<[1], [0], [0], [1], [0, 0, 1, 1], [], []>} : vector<128x12xbf16>, vector<12x128xbf16>, vector<128x128xf32> -> vector<128x128xf32>
    %c0_4 = arith.constant 0 : index
    %c0_5 = arith.constant 0 : index
    %5 = vector.load %arg4[%c0_4, %c0_5] : memref<1x128xf32, #tpu.memory_space<vmem>>, vector<1x128xf32>
    %6 = vector.broadcast %5 : vector<1x128xf32> to vector<128x128xf32>
    %7 = arith.addf %4, %6 : vector<128x128xf32>
    %cst_6 = arith.constant 0.000000e+00 : f32
    %8 = vector.broadcast %cst_6 : f32 to vector<128x128xf32>
    %9 = arith.maximumf %7, %8 : vector<128x128xf32>
    %10 = arith.truncf %9 : vector<128x128xf32> to vector<128x128xbf16>
    %c0_7 = arith.constant 0 : index
    %c0_8 = arith.constant 0 : index
    %11 = vector.load %arg5[%c0_7, %c0_8] : memref<128x256xbf16, #tpu.memory_space<vmem>>, vector<128x256xbf16>
    %cst_9 = arith.constant dense<0.000000e+00> : vector<128x256xf32>
    %12 = tpu.matmul %10, %11, %cst_9 {dimension_numbers = #tpu.dot_dimension_numbers<[1], [0], [0], [1], [0, 0, 1, 1], [], []>} : vector<128x128xbf16>, vector<128x256xbf16>, vector<128x256xf32> -> vector<128x256xf32>
    %c0_10 = arith.constant 0 : index
    %c0_11 = arith.constant 0 : index
    %13 = vector.load %arg6[%c0_10, %c0_11] : memref<1x256xf32, #tpu.memory_space<vmem>>, vector<1x256xf32>
    %14 = vector.broadcast %13 : vector<1x256xf32> to vector<128x256xf32>
    %15 = arith.addf %12, %14 : vector<128x256xf32>
    %cst_12 = arith.constant 0.000000e+00 : f32
    %16 = vector.broadcast %cst_12 : f32 to vector<128x256xf32>
    %17 = arith.maximumf %15, %16 : vector<128x256xf32>
    %18 = arith.truncf %17 : vector<128x256xf32> to vector<128x256xbf16>
    %c0_13 = arith.constant 0 : index
    %c0_14 = arith.constant 0 : index
    %19 = vector.load %arg7[%c0_13, %c0_14] : memref<256x512xbf16, #tpu.memory_space<vmem>>, vector<256x512xbf16>
    %cst_15 = arith.constant dense<0.000000e+00> : vector<128x512xf32>
    %20 = tpu.matmul %18, %19, %cst_15 {dimension_numbers = #tpu.dot_dimension_numbers<[1], [0], [0], [1], [0, 0, 1, 1], [], []>} : vector<128x256xbf16>, vector<256x512xbf16>, vector<128x512xf32> -> vector<128x512xf32>
    %c0_16 = arith.constant 0 : index
    %c0_17 = arith.constant 0 : index
    %21 = vector.load %arg8[%c0_16, %c0_17] : memref<1x512xf32, #tpu.memory_space<vmem>>, vector<1x512xf32>
    %22 = vector.broadcast %21 : vector<1x512xf32> to vector<128x512xf32>
    %23 = arith.addf %20, %22 : vector<128x512xf32>
    %cst_18 = arith.constant 0.000000e+00 : f32
    %24 = vector.broadcast %cst_18 : f32 to vector<128x512xf32>
    %25 = arith.maximumf %23, %24 : vector<128x512xf32>
    %26 = arith.truncf %25 : vector<128x512xf32> to vector<128x512xbf16>
    %c0_19 = arith.constant 0 : index
    %c0_20 = arith.constant 0 : index
    %27 = vector.load %arg9[%c0_19, %c0_20] : memref<512x128xbf16, #tpu.memory_space<vmem>>, vector<512x128xbf16>
    %cst_21 = arith.constant dense<0.000000e+00> : vector<128x128xf32>
    %28 = tpu.matmul %26, %27, %cst_21 {dimension_numbers = #tpu.dot_dimension_numbers<[1], [0], [0], [1], [0, 0, 1, 1], [], []>} : vector<128x512xbf16>, vector<512x128xbf16>, vector<128x128xf32> -> vector<128x128xf32>
    %c0_22 = arith.constant 0 : index
    %c0_23 = arith.constant 0 : index
    %29 = vector.load %arg10[%c0_22, %c0_23] : memref<1x128xf32, #tpu.memory_space<vmem>>, vector<1x128xf32>
    %30 = vector.broadcast %29 : vector<1x128xf32> to vector<128x128xf32>
    %31 = arith.addf %28, %30 : vector<128x128xf32>
    %c0_24 = arith.constant 0 : index
    %c0_25 = arith.constant 0 : index
    %c0_26 = arith.constant 0 : index
    %32 = vector.load %arg18[%c0_24, %c0_25, %c0_26] : memref<1x128x128xf32, #tpu.memory_space<vmem>>, vector<1x128x128xf32>
    %33 = vector.shape_cast %32 : vector<1x128x128xf32> to vector<128x128xf32>
    %34 = vector.shape_cast %31 : vector<128x128xf32> to vector<1x128x128xf32>
    tpu.vector_store %arg18[%c0_24, %c0_25, %c0_26], %34 {strides = array<i32>} : memref<1x128x128xf32, #tpu.memory_space<vmem>>, vector<1x128x128xf32>,
    %c0_27 = arith.constant 0 : index
    %c0_28 = arith.constant 0 : index
    %c0_29 = arith.constant 0 : index
    %35 = vector.load %arg2[%c0_27, %c0_28, %c0_29] : memref<1x128x128xf32, #tpu.memory_space<vmem>>, vector<1x128x128xf32>
    %36 = vector.shape_cast %35 : vector<1x128x128xf32> to vector<128x128xf32>
    %37 = arith.addf %31, %36 : vector<128x128xf32>
    %38 = arith.truncf %37 : vector<128x128xf32> to vector<128x128xbf16>
    %c0_30 = arith.constant 0 : index
    %c0_31 = arith.constant 0 : index
    %39 = vector.load %arg11[%c0_30, %c0_31] : memref<128x96xbf16, #tpu.memory_space<vmem>>, vector<128x96xbf16>
    %cst_32 = arith.constant dense<0.000000e+00> : vector<128x96xf32>
    %40 = tpu.matmul %38, %39, %cst_32 {dimension_numbers = #tpu.dot_dimension_numbers<[1], [0], [0], [1], [0, 0, 1, 1], [], []>} : vector<128x128xbf16>, vector<128x96xbf16>, vector<128x96xf32> -> vector<128x96xf32>
    %c0_33 = arith.constant 0 : index
    %c0_34 = arith.constant 0 : index
    %41 = vector.load %arg12[%c0_33, %c0_34] : memref<1x96xf32, #tpu.memory_space<vmem>>, vector<1x96xf32>
    %42 = vector.broadcast %41 : vector<1x96xf32> to vector<128x96xf32>
    %43 = arith.addf %40, %42 : vector<128x96xf32>
    %cst_35 = arith.constant 0.000000e+00 : f32
    %44 = vector.broadcast %cst_35 : f32 to vector<128x96xf32>
    %45 = arith.maximumf %43, %44 : vector<128x96xf32>
    %46 = arith.truncf %45 : vector<128x96xf32> to vector<128x96xbf16>
    %c0_36 = arith.constant 0 : index
    %c0_37 = arith.constant 0 : index
    %47 = vector.load %arg13[%c0_36, %c0_37] : memref<96x64xbf16, #tpu.memory_space<vmem>>, vector<96x64xbf16>
    %cst_38 = arith.constant dense<0.000000e+00> : vector<128x64xf32>
    %48 = tpu.matmul %46, %47, %cst_38 {dimension_numbers = #tpu.dot_dimension_numbers<[1], [0], [0], [1], [0, 0, 1, 1], [], []>} : vector<128x96xbf16>, vector<96x64xbf16>, vector<128x64xf32> -> vector<128x64xf32>
    %c0_39 = arith.constant 0 : index
    %c0_40 = arith.constant 0 : index
    %49 = vector.load %arg14[%c0_39, %c0_40] : memref<1x64xf32, #tpu.memory_space<vmem>>, vector<1x64xf32>
    %50 = vector.broadcast %49 : vector<1x64xf32> to vector<128x64xf32>
    %51 = arith.addf %48, %50 : vector<128x64xf32>
    %cst_41 = arith.constant 0.000000e+00 : f32
    %52 = vector.broadcast %cst_41 : f32 to vector<128x64xf32>
    %53 = arith.maximumf %51, %52 : vector<128x64xf32>
    %54 = arith.truncf %53 : vector<128x64xf32> to vector<128x64xbf16>
    %c0_42 = arith.constant 0 : index
    %c0_43 = arith.constant 0 : index
    %55 = vector.load %arg15[%c0_42, %c0_43] : memref<64x32xbf16, #tpu.memory_space<vmem>>, vector<64x32xbf16>
    %cst_44 = arith.constant dense<0.000000e+00> : vector<128x32xf32>
    %56 = tpu.matmul %54, %55, %cst_44 {dimension_numbers = #tpu.dot_dimension_numbers<[1], [0], [0], [1], [0, 0, 1, 1], [], []>} : vector<128x64xbf16>, vector<64x32xbf16>, vector<128x32xf32> -> vector<128x32xf32>
    %c0_45 = arith.constant 0 : index
    %c0_46 = arith.constant 0 : index
    %57 = vector.load %arg16[%c0_45, %c0_46] : memref<1x32xf32, #tpu.memory_space<vmem>>, vector<1x32xf32>
    %58 = vector.broadcast %57 : vector<1x32xf32> to vector<128x32xf32>
    %59 = arith.addf %56, %58 : vector<128x32xf32>
    %60 = arith.mulf %59, %59 : vector<128x32xf32>
    %cst_47 = arith.constant dense<0.000000e+00> : vector<128xf32>
    %61 = vector.multi_reduction <add>, %60, %cst_47 [1] : vector<128x32xf32> to vector<128xf32>
    %62 = vector.shape_cast %61 : vector<128xf32> to vector<128x1xf32>
    %63 = math.sqrt %62 : vector<128x1xf32>
    %cst_48 = arith.constant 9.99999997E-7 : f32
    %64 = vector.broadcast %cst_48 : f32 to vector<128x1xf32>
    %65 = arith.addf %63, %64 : vector<128x1xf32>
    %66 = tpu.reciprocal %65 {approx = true} : vector<128x1xf32> -> vector<128x1xf32>
    %67 = vector.broadcast %66 : vector<128x1xf32> to vector<128x32xf32>
    %68 = arith.mulf %59, %67 : vector<128x32xf32>
    %69 = arith.truncf %68 : vector<128x32xf32> to vector<128x32xbf16>
    %70 = vector.extract_strided_slice %69 {offsets = [0, 0], sizes = [64, 32], strides = [1, 1]} : vector<128x32xbf16> to vector<64x32xbf16>
    %71 = vector.extract_strided_slice %69 {offsets = [64, 0], sizes = [64, 32], strides = [1, 1]} : vector<128x32xbf16> to vector<64x32xbf16>
    %cst_49 = arith.constant dense<0.000000e+00> : vector<64x64xf32>
    %72 = tpu.matmul %70, %71, %cst_49 {dimension_numbers = #tpu.dot_dimension_numbers<[1], [1], [0], [0], [0, 0, 1, 0], [], []>} : vector<64x32xbf16>, vector<64x32xbf16>, vector<64x64xf32> -> vector<64x64xf32>
    %c0_50 = arith.constant 0 : index
    %c0_51 = arith.constant 0 : index
    %c0_52 = arith.constant 0 : index
    %c0_53 = arith.constant 0 : index
    %73 = vector.load %arg17[%c0_50, %c0_51, %c0_52, %c0_53] : memref<1x1x64x64xf32, #tpu.memory_space<vmem>>, vector<1x1x64x64xf32>
    %74 = vector.shape_cast %73 : vector<1x1x64x64xf32> to vector<64x64xf32>
    %75 = vector.shape_cast %72 : vector<64x64xf32> to vector<1x1x64x64xf32>
    tpu.vector_store %arg17[%c0_50, %c0_51, %c0_52, %c0_53], %75 {strides = array<i32>} : memref<1x1x64x64xf32, #tpu.memory_space<vmem>>, vector<1x1x64x64xf32>,
    return
  }
  func.func @transform_0(%arg0: i32) -> (i32, i32, i32) {
    %c0_i32 = arith.constant 0 : i32
    %c0_i32_0 = arith.constant 0 : i32
    %c0_i32_1 = arith.constant 0 : i32
    return %arg0, %c0_i32, %c0_i32_0 : i32, i32, i32
  }
  func.func @transform_1(%arg0: i32) -> (i32, i32, i32) {
    %c0_i32 = arith.constant 0 : i32
    %c0_i32_0 = arith.constant 0 : i32
    %c0_i32_1 = arith.constant 0 : i32
    return %arg0, %c0_i32, %c0_i32_0 : i32, i32, i32
  }
  func.func @transform_2(%arg0: i32) -> (i32, i32) {
    %c0_i32 = arith.constant 0 : i32
    %c0_i32_0 = arith.constant 0 : i32
    %c0_i32_1 = arith.constant 0 : i32
    return %c0_i32, %c0_i32_0 : i32, i32
  }
  func.func @transform_3(%arg0: i32) -> (i32, i32) {
    %c0_i32 = arith.constant 0 : i32
    %c0_i32_0 = arith.constant 0 : i32
    %c0_i32_1 = arith.constant 0 : i32
    return %c0_i32, %c0_i32_0 : i32, i32
  }
  func.func @transform_4(%arg0: i32) -> (i32, i32) {
    %c0_i32 = arith.constant 0 : i32
    %c0_i32_0 = arith.constant 0 : i32
    %c0_i32_1 = arith.constant 0 : i32
    return %c0_i32, %c0_i32_0 : i32, i32
  }
  func.func @transform_5(%arg0: i32) -> (i32, i32) {
    %c0_i32 = arith.constant 0 : i32
    %c0_i32_0 = arith.constant 0 : i32
    %c0_i32_1 = arith.constant 0 : i32
    return %c0_i32, %c0_i32_0 : i32, i32
  }
  func.func @transform_6(%arg0: i32) -> (i32, i32) {
    %c0_i32 = arith.constant 0 : i32
    %c0_i32_0 = arith.constant 0 : i32
    %c0_i32_1 = arith.constant 0 : i32
    return %c0_i32, %c0_i32_0 : i32, i32
  }
  func.func @transform_7(%arg0: i32) -> (i32, i32) {
    %c0_i32 = arith.constant 0 : i32
    %c0_i32_0 = arith.constant 0 : i32
    %c0_i32_1 = arith.constant 0 : i32
    return %c0_i32, %c0_i32_0 : i32, i32
  }
  func.func @transform_8(%arg0: i32) -> (i32, i32) {
    %c0_i32 = arith.constant 0 : i32
    %c0_i32_0 = arith.constant 0 : i32
    %c0_i32_1 = arith.constant 0 : i32
    return %c0_i32, %c0_i32_0 : i32, i32
  }
  func.func @transform_9(%arg0: i32) -> (i32, i32) {
    %c0_i32 = arith.constant 0 : i32
    %c0_i32_0 = arith.constant 0 : i32
    %c0_i32_1 = arith.constant 0 : i32
    return %c0_i32, %c0_i32_0 : i32, i32
  }
  func.func @transform_10(%arg0: i32) -> (i32, i32) {
    %c0_i32 = arith.constant 0 : i32
    %c0_i32_0 = arith.constant 0 : i32
    %c0_i32_1 = arith.constant 0 : i32
    return %c0_i32, %c0_i32_0 : i32, i32
  }
  func.func @transform_11(%arg0: i32) -> (i32, i32) {
    %c0_i32 = arith.constant 0 : i32
    %c0_i32_0 = arith.constant 0 : i32
    %c0_i32_1 = arith.constant 0 : i32
    return %c0_i32, %c0_i32_0 : i32, i32
  }
  func.func @transform_12(%arg0: i32) -> (i32, i32) {
    %c0_i32 = arith.constant 0 : i32
    %c0_i32_0 = arith.constant 0 : i32
    %c0_i32_1 = arith.constant 0 : i32
    return %c0_i32, %c0_i32_0 : i32, i32
  }
  func.func @transform_13(%arg0: i32) -> (i32, i32) {
    %c0_i32 = arith.constant 0 : i32
    %c0_i32_0 = arith.constant 0 : i32
    %c0_i32_1 = arith.constant 0 : i32
    return %c0_i32, %c0_i32_0 : i32, i32
  }
  func.func @transform_14(%arg0: i32) -> (i32, i32) {
    %c0_i32 = arith.constant 0 : i32
    %c0_i32_0 = arith.constant 0 : i32
    %c0_i32_1 = arith.constant 0 : i32
    return %c0_i32, %c0_i32_0 : i32, i32
  }
  func.func @transform_15(%arg0: i32) -> (i32, i32) {
    %c0_i32 = arith.constant 0 : i32
    %c0_i32_0 = arith.constant 0 : i32
    %c0_i32_1 = arith.constant 0 : i32
    return %c0_i32, %c0_i32_0 : i32, i32
  }
  func.func @transform_16(%arg0: i32) -> (i32, i32, i32, i32) {
    %c0_i32 = arith.constant 0 : i32
    %c0_i32_0 = arith.constant 0 : i32
    %c0_i32_1 = arith.constant 0 : i32
    %c0_i32_2 = arith.constant 0 : i32
    return %arg0, %c0_i32, %c0_i32_0, %c0_i32_1 : i32, i32, i32, i32
  }
  func.func @transform_17(%arg0: i32) -> (i32, i32, i32) {
    %c0_i32 = arith.constant 0 : i32
    %c0_i32_0 = arith.constant 0 : i32
    %c0_i32_1 = arith.constant 0 : i32
    return %arg0, %c0_i32, %c0_i32_0 : i32, i32, i32
  }
}

</mosaic_0001>

<bundles_post_ra>
// kernel: tpu_custom_call.1
= control target key start
LH: loop header
LB: loop body
LE: loop exit
PB: predicated region body
PF: predicated region fallthrough
CT: control target
= control target key end

     0   :  { %s5953_s0 = inlined_call_operand.vmem [shape: f32[2,128,12], index: 0, kind: input, shape index: {}]   ;;  %s5954_s1 = inlined_call_operand.hbm [shape: f32[2,128,128], index: 1, kind: input, shape index: {}]   ;;  %s5955_s2 = inlined_call_operand.hbm [shape: bf16[12,128], index: 2, kind: input, shape index: {}]   ;;  %s5956_s3 = inlined_call_operand.vmem [shape: f32[1,128], index: 3, kind: input, shape index: {}]   ;;  %s5957_s4 = inlined_call_operand.hbm [shape: bf16[128,256], index: 4, kind: input, shape index: {}]   ;;  %s5958_s5 = inlined_call_operand.hbm [shape: f32[1,256], index: 5, kind: input, shape index: {}]   ;;  %s5959_s6 = inlined_call_operand.vmem [shape: bf16[256,512], index: 6, kind: input, shape index: {}]   ;;  %s5960_s7 = inlined_call_operand.hbm [shape: f32[1,512], index: 7, kind: input, shape index: {}]   ;;  %s5961_s8 = inlined_call_operand.hbm [shape: bf16[512,128], index: 8, kind: input, shape index: {}]   ;;  %s5962_s9 = inlined_call_operand.hbm [shape: f32[1,128], index: 9, kind: input, shape index: {}]   ;;  %s5963_s10 = inlined_call_operand.vmem [shape: bf16[128,96], index: 10, kind: input, shape index: {}]   ;;  %s5964_s11 = inlined_call_operand.hbm [shape: f32[1,96], index: 11, kind: input, shape index: {}]   ;;  %s5965_s12 = inlined_call_operand.vmem [shape: bf16[96,64], index: 12, kind: input, shape index: {}]   ;;  %s5966_s13 = inlined_call_operand.vmem [shape: f32[1,64], index: 13, kind: input, shape index: {}]   ;;  %s5967_s14 = inlined_call_operand.vmem [shape: bf16[64,32], index: 14, kind: input, shape index: {}]   ;;  %s5968_s15 = inlined_call_operand.vmem [shape: f32[1,32], index: 15, kind: input, shape index: {}]   ;;  %s5969_s16 = inlined_call_operand.hbm [shape: f32[2,1,64,64], index: 16, kind: output, shape index: {0}]   ;;  %s5970_s17 = inlined_call_operand.hbm [shape: f32[2,128,128], index: 17, kind: output, shape index: {1}]  }
   0x1   :  { %5984 = sst [smem:[#allocation26_spill]] %s5953_s0 }
   0x2   :  { %5985 = sst [smem:[#allocation27_spill]] %s5954_s1 }
   0x3   :  { %5986 = sst [smem:[#allocation28_spill]] %s5955_s2 }
   0x4   :  { %5987 = sst [smem:[#allocation29_spill]] %s5956_s3 }
   0x5   :  { %5988 = sst [smem:[#allocation30_spill]] %s5957_s4 }
   0x6   :  { %5989 = sst [smem:[#allocation31_spill]] %s5958_s5 }
   0x7   :  { %5990 = sst [smem:[#allocation32_spill]] %s5963_s10 }
   0x8   :  { %5991 = sst [smem:[#allocation33_spill]] %s5965_s12 }
   0x9   :  { %5992 = sst [smem:[#allocation34_spill]] %s5966_s13 }
   0xa   :  { %5993 = sst [smem:[#allocation35_spill]] %s5967_s14 }
   0xb   :  { %5994 = sst [smem:[#allocation36_spill]] %s5968_s15 }
   0xc   :  { %5995 = sst [smem:[#allocation37_spill]] %s5969_s16 }
   0xd   :  { %5996 = sst [smem:[#allocation38_spill]] %s5970_s17 }
   0xe   :  { %23 = vsyncpa [#allocation3], 0 }
   0xf   :  { %25 = vsyncpa [#allocation3 + $0x1], 0 }
  0x10   :  { %26 = vsyncpa [#allocation6], 0 }
  0x11   :  { %27 = vsyncpa [#allocation9], 0 }
  0x12   :  { %28 = vsyncpa [#allocation12], 0 }
  0x13   :  { %29 = vsyncpa [#allocation15], 0 }
  0x14   :  { %30 = vsyncpa [#allocation4], 0 }
  0x15   :  { %32 = vsyncpa [#allocation4 + $0x1], 0 }
  0x16   :  { %33 = vsyncpa [#allocation18], 0 }
  0x17   :  { %35 = vsyncpa [#allocation18 + $0x1], 0  ;;  %s4831_s24 = smov 0   ;;  %s4833_s25 = smov 0  }
  0x18   :  { %s4835_s26 = smov 0   ;;  %s4837_s27 = smov 0  }
  0x19 LB: > { %s4724_s28 = smov [#allocation5]   ;;  %s4852_s0 = sadd.s32 4294967295, %s4722_s27   ;;  %s4722_s27 = sphi %s4837_s27, %s6039_s27   ;;  %s4718_s26 = sphi %s4835_s26, %s6038_s26   ;;  %s4714_s25 = sphi %s4833_s25, %s6037_s25   ;;  %s4710_s24 = sphi %s4831_s24, %s6036_s24  }
  0x1a   : > { %s456_s29 = sshll.u32 %s4724_s28, 4  ;;  %p3495_p0 = scmp.ge.s32.totalorder %s4722_s27, 1  ;;  %s4857_s29 = int_to_ptr.vmem [resolvable:$true] %s456_s29 }
  0x1b   : > { %p5977_p1 = scmp.eq.s32.totalorder %s4852_s0, 0  ;;  %p444_p2 = scmp.lt.s32.totalorder %s4722_s27, 3 }
  0x1c   : > { %s4725_s18 = smov [#allocation8]   ;;  %s4726_s20 = smov [#allocation11]  }
  0x1d   : > { %p4859_p3 = pnand %p3495_p0, %p444_p2  ;;  %s486_s19 = sshll.u32 %s4725_s18, 4  ;;  %s4872_s19 = int_to_ptr.vmem [resolvable:$true] %s486_s19 }
  0x1e   : > { %s510_s21 = sshll.u32 %s4726_s20, 4  ;;  %s5999_s2 = sld [smem:[#allocation28_spill]]  ;;  %s4874_s21 = int_to_ptr.vmem [resolvable:$true] %s510_s21 }
  0x1f   : > { %s5997_s30 = scalar_select %p4859_p3, 1, 0 }
  0x20   : > { %p4052_p5 = pneg %p4859_p3 }
  0x22   : > { %p4868_p6 = pnand %p4052_p5, %p5977_p1 }
  0x24   : > { %s4382_s28 = scalar_lea.hbm %s5999_s2, 128  ;;  %p4884_p8 = pneg %p4868_p6 }
  0x25   : > { %p4383_p7 = scmp.ne.s32.totalorder %s5999_s2, %s4382_s28  ;;  %p4389_p11 = scmp.lt.u32.totalorder %s4382_s28, %s5999_s2 }
  0x27   : > { %p4385_p9 = pnand %p4884_p8, %p4383_p7 }
  0x29   : > { %p4386_p10 = pneg %p4385_p9 }
  0x2b   : > { %p4391_p12 = pnand %p4389_p11, %p4386_p10 }
  0x2d   : > { %4394 = shalt.err (!%p4391_p12)
}
  0x2e   : > { %s4395_s16 = scalar_lea.vmem %s4857_s29, 128  ;;  %p4403_p5 = scmp.lt.s32.totalorder %s4857_s29, %s4857_s29 }
  0x2f   : > { %p4396_p13 = scmp.ne.s32.totalorder %s4857_s29, %s4395_s16  ;;  %p4404_p4 = scmp.lt.s32.totalorder %s4395_s16, %s4395_s16 }
  0x31   : > { %p4398_p0 = pnand %p4396_p13, %p4884_p8  ;;  %p4405_p7 = por %p4404_p4, %p4403_p5 }
  0x33   : > { %p4399_p2 = pneg %p4398_p0 }
  0x35   : > { %p4406_p9 = pnand %p4405_p7, %p4399_p2 }
  0x37   : > { %4409 = shalt.err (!%p4406_p9)
}
  0x38   : > { %s4727_s17 = smov 64   ;;  %s4728_s15 = smov 4  }
  0x39   : > { %4055 = dma.hbm_to_vmem [thread:$0]  (!%p4868_p6), %s5999_s2, 128, %s4857_s29, [#allocation6], %s4727_s17, %s4727_s17, %s4728_s15  }
  0x3a   : > { %s6001_s5 = sld [smem:[#allocation31_spill]] }
  0x40   : > { %s4410_s16 = scalar_lea.hbm %s6001_s5, 32 }
  0x41   : > { %p4411_p4 = scmp.ne.s32.totalorder %s6001_s5, %s4410_s16  ;;  %p4417_p12 = scmp.lt.u32.totalorder %s4410_s16, %s6001_s5 }
  0x43   : > { %p4413_p10 = pnand %p4411_p4, %p4884_p8 }
  0x45   : > { %p4414_p11 = pneg %p4413_p10 }
  0x47   : > { %p4419_p13 = pnand %p4417_p12, %p4414_p11 }
  0x49   : > { %4422 = shalt.err (!%p4419_p13)
}
  0x4a   : > { %s4423_s29 = scalar_lea.vmem %s4872_s19, 32  ;;  %p4431_p7 = scmp.lt.s32.totalorder %s4872_s19, %s4872_s19 }
  0x4b   : > { %p4424_p0 = scmp.ne.s32.totalorder %s4872_s19, %s4423_s29  ;;  %p4432_p9 = scmp.lt.s32.totalorder %s4423_s29, %s4423_s29 }
  0x4d   : > { %p4426_p2 = pnand %p4424_p0, %p4884_p8  ;;  %p4433_p4 = por %p4432_p9, %p4431_p7 }
  0x4f   : > { %p4427_p5 = pneg %p4426_p2 }
  0x51   : > { %p4434_p10 = pnand %p4433_p4, %p4427_p5 }
  0x53   : > { %4437 = shalt.err (!%p4434_p10)
}
  0x54   : > { %4061 = dma.hbm_to_vmem [thread:$0]  (!%p4868_p6), %s6001_s5, 32, %s4872_s19, [#allocation9]  }
  0x55   : > { %s4438_s22 = scalar_lea.hbm %s5961_s8, 4096 }
  0x56   : > { %p4439_p11 = scmp.ne.s32.totalorder %s5961_s8, %s4438_s22  ;;  %p4445_p0 = scmp.lt.u32.totalorder %s4438_s22, %s5961_s8 }
  0x58   : > { %p4441_p12 = pnand %p4439_p11, %p4884_p8 }
  0x5a   : > { %p4442_p13 = pneg %p4441_p12 }
  0x5c   : > { %p4447_p2 = pnand %p4445_p0, %p4442_p13 }
  0x5e   : > { %4450 = shalt.err (!%p4447_p2)
}
  0x5f   : > { %s4451_s19 = scalar_lea.vmem %s4874_s21, 4096  ;;  %p4459_p4 = scmp.lt.s32.totalorder %s4874_s21, %s4874_s21 }
  0x60   : > { %p4452_p5 = scmp.ne.s32.totalorder %s4874_s21, %s4451_s19  ;;  %p4460_p10 = scmp.lt.s32.totalorder %s4451_s19, %s4451_s19 }
  0x62   : > { %p4454_p7 = pnand %p4452_p5, %p4884_p8  ;;  %p4461_p11 = por %p4460_p10, %p4459_p4 }
  0x64   : > { %p4455_p9 = pneg %p4454_p7 }
  0x66   : > { %p4462_p12 = pnand %p4461_p11, %p4455_p9 }
  0x68   : > { %4465 = shalt.err (!%p4462_p12)
}
  0x69   : > { %4067 = dma.hbm_to_vmem [thread:$0]  (!%p4868_p6), %s5961_s8, 4096, %s4874_s21, [#allocation12], %s4727_s17, %s4727_s17, %s4728_s15  }
  0x6a   : > { %s4729_s12 = smov [#allocation7]   ;;  %s6002_s4 = sld [smem:[#allocation30_spill]] }
  0x6b   : > { %s472_s13 = sshll.u32 %s4729_s12, 4  ;;  %s473_s13 = int_to_ptr.vmem [resolvable:$true] %s472_s13 }
  0x70   : > { %s4466_s23 = scalar_lea.hbm %s6002_s4, 2048 }
  0x71   : > { %p4467_p13 = scmp.ne.s32.totalorder %s6002_s4, %s4466_s23  ;;  %p4473_p5 = scmp.lt.u32.totalorder %s4466_s23, %s6002_s4 }
  0x73   : > { %p4469_p0 = pnand %p4467_p13, %p4884_p8 }
  0x75   : > { %p4470_p2 = pneg %p4469_p0 }
  0x77   : > { %p4475_p7 = pnand %p4473_p5, %p4470_p2 }
  0x79   : > { %4478 = shalt.err (!%p4475_p7)
}
  0x7a   : > { %s4479_s21 = scalar_lea.vmem %s473_s13, 2048  ;;  %p4487_p11 = scmp.lt.s32.totalorder %s473_s13, %s473_s13 }
  0x7b   : > { %p4480_p9 = scmp.ne.s32.totalorder %s473_s13, %s4479_s21  ;;  %p4488_p12 = scmp.lt.s32.totalorder %s4479_s21, %s4479_s21 }
  0x7d   : > { %p4482_p4 = pnand %p4480_p9, %p4884_p8  ;;  %p4489_p1 = por %p4488_p12, %p4487_p11 }
  0x7f   : > { %p4483_p10 = pneg %p4482_p4 }
  0x81   : > { %p4490_p3 = pnand %p4489_p1, %p4483_p10 }
  0x83   : > { %4493 = shalt.err (!%p4490_p3)
}
  0x84   : > { %s5979_s17 = smov 128   ;;  %s5980_s15 = smov 8  }
  0x85   : > { %4058 = dma.hbm_to_vmem [thread:$0]  (!%p4868_p6), %s6002_s4, 2048, %s473_s13, [#allocation6], %s5979_s17, %s5979_s17, %s5980_s15  }
  0x86   : > { %s4732_s12 = smov [#allocation10]   ;;  %s4733_s22 = smov [#allocation13]  }
  0x87   : > { %s500_s14 = sshll.u32 %s4732_s12, 4  ;;  %s524_s23 = sshll.u32 %s4733_s22, 4  ;;  %s501_s14 = int_to_ptr.vmem [resolvable:$true] %s500_s14  ;;  %s4978_s23 = int_to_ptr.vmem [resolvable:$true] %s524_s23 }
  0x88   : > { %s4494_s16 = scalar_lea.hbm %s5960_s7, 64 }
  0x89   : > { %p4495_p1 = scmp.ne.s32.totalorder %s5960_s7, %s4494_s16  ;;  %p4501_p0 = scmp.lt.u32.totalorder %s4494_s16, %s5960_s7 }
  0x8b   : > { %p4497_p3 = pnand %p4495_p1, %p4884_p8 }
  0x8d   : > { %p4498_p13 = pneg %p4497_p3 }
  0x8f   : > { %p4503_p2 = pnand %p4501_p0, %p4498_p13 }
  0x91   : > { %4506 = shalt.err (!%p4503_p2)
}
  0x92   : > { %s4507_s10 = scalar_lea.vmem %s501_s14, 64  ;;  %p4515_p4 = scmp.lt.s32.totalorder %s501_s14, %s501_s14 }
  0x93   : > { %p4508_p5 = scmp.ne.s32.totalorder %s501_s14, %s4507_s10  ;;  %p4516_p10 = scmp.lt.s32.totalorder %s4507_s10, %s4507_s10 }
  0x95   : > { %p4510_p7 = pnand %p4508_p5, %p4884_p8  ;;  %p4517_p11 = por %p4516_p10, %p4515_p4 }
  0x97   : > { %p4511_p9 = pneg %p4510_p7 }
  0x99   : > { %p4518_p12 = pnand %p4517_p11, %p4511_p9 }
  0x9b   : > { %4521 = shalt.err (!%p4518_p12)
}
  0x9c   : > { %4064 = dma.hbm_to_vmem [thread:$0]  (!%p4868_p6), %s5960_s7, 64, %s501_s14, [#allocation9]  }
  0x9d   : > { %s4522_s16 = scalar_lea.hbm %s5962_s9, 16 }
  0x9e   : > { %p4523_p1 = scmp.ne.s32.totalorder %s5962_s9, %s4522_s16  ;;  %p4529_p0 = scmp.lt.u32.totalorder %s4522_s16, %s5962_s9 }
  0xa0   : > { %p4525_p3 = pnand %p4523_p1, %p4884_p8 }
  0xa2   : > { %p4526_p13 = pneg %p4525_p3 }
  0xa4   : > { %p4531_p2 = pnand %p4529_p0, %p4526_p13 }
  0xa6   : > { %4534 = shalt.err (!%p4531_p2)
}
  0xa7   : > { %s4535_s14 = scalar_lea.vmem %s4978_s23, 16  ;;  %s4542_s10 = scalar_lea.vmem %s4978_s23, 32 }
  0xa8   : > { %p4536_p5 = scmp.ne.s32.totalorder %s4978_s23, %s4535_s14  ;;  %p4543_p4 = scmp.lt.s32.totalorder %s4978_s23, %s4978_s23 }
  0xa9   : > { %p4544_p10 = scmp.lt.s32.totalorder %s4542_s10, %s4535_s14 }
  0xaa   : > { %p4538_p7 = pnand %p4536_p5, %p4884_p8 }
  0xab   : > { %p4545_p11 = por %p4544_p10, %p4543_p4 }
  0xac   : > { %p4539_p9 = pneg %p4538_p7 }
  0xae   : > { %p4546_p12 = pnand %p4545_p11, %p4539_p9 }
  0xb0   : > { %4549 = shalt.err (!%p4546_p12)
}
  0xb1   : > { %4070 = dma.hbm_to_vmem [thread:$0]  (!%p4868_p6), %s5962_s9, 16, %s4978_s23, [#allocation12]  }
  0xb2   : > { %s4734_s28 = smov [#allocation14]   ;;  %s4550_s21 = scalar_lea.hbm %s5964_s11, 16 }
  0xb3   : > { %s538_s20 = sshll.u32 %s4734_s28, 4  ;;  %p4551_p1 = scmp.ne.s32.totalorder %s5964_s11, %s4550_s21  ;;  %s539_s20 = int_to_ptr.vmem [resolvable:$true] %s538_s20 }
  0xb4   : > { %p4557_p0 = scmp.lt.u32.totalorder %s4550_s21, %s5964_s11 }
  0xb5   : > { %p4553_p3 = pnand %p4551_p1, %p4884_p8 }
  0xb7   : > { %p4554_p13 = pneg %p4553_p3 }
  0xb9   : > { %p4559_p2 = pnand %p4557_p0, %p4554_p13 }
  0xbb   : > { %4562 = shalt.err (!%p4559_p2)
}
  0xbc   : > { %s4563_s23 = scalar_lea.vmem %s539_s20, 16  ;;  %s4570_s12 = scalar_lea.vmem %s539_s20, 32 }
  0xbd   : > { %p4564_p5 = scmp.ne.s32.totalorder %s539_s20, %s4563_s23  ;;  %p4571_p4 = scmp.lt.s32.totalorder %s539_s20, %s539_s20 }
  0xbe   : > { %p4572_p10 = scmp.lt.s32.totalorder %s4570_s12, %s4563_s23 }
  0xbf   : > { %p4566_p7 = pnand %p4564_p5, %p4884_p8 }
  0xc0   : > { %p4573_p11 = por %p4572_p10, %p4571_p4 }
  0xc1   : > { %p4567_p9 = pneg %p4566_p7 }
  0xc3   : > { %p4574_p12 = pnand %p4573_p11, %p4567_p9 }
  0xc5   : > { %4577 = shalt.err (!%p4574_p12)
}
  0xc6   : > { %4073 = dma.hbm_to_vmem [thread:$0]  (!%p4868_p6), %s5964_s11, 16, %s539_s20, [#allocation15]  }
  0xc7   : > { %s3494_s18 = sadd.s32 4294967294, %s4722_s27   ;;  %s5042_s1 = sadd.s32 1, %s4722_s27  }
  0xc8   : > { %s74_s16 = sadd.s32 1, %s4718_s26  ;;  %s71_s19 = ssub.s32 %s4722_s27, %s5042_s1 }
  0xc9   : > { %p81_p8 = scmp.ne.s32.totalorder %s4718_s26, %s4714_s25  ;;  %p72_p1 = scmp.eq.s32.totalorder %s71_s19, 0 }
  0xca   : > { %p82_p3 = scmp.eq.s32.totalorder %s4722_s27, 0  ;;  %p87_p13 = scmp.ne.s32.totalorder %s4714_s25, %s4710_s24 }
  0xcb   : > { %p405_p0 = scmp.eq.s32.totalorder %s4852_s0, 1  ;;  %p6003_p5 = scmp.eq.s32.totalorder %s4852_s0, 0 }
  0xcc   : > { %s5054_s21 = scalar_select %p72_p1, %s4718_s26, %s74_s16  }
  0xcd   : > { %p83_p2 = por %p82_p3, %p81_p8  ;;  %p5058_p7 = por %p6003_p5, %p87_p13 }
  0xce   : > { %p5062_p6 = por %p405_p0, %p81_p8  ;;  %p411_p9 = scmp.eq.s32.totalorder %s3494_s18, 1 }
  0xcf   : > { %p4092_p4 = scmp.lt.s32.totalorder %s4722_s27, 2  ;;  %s569_s13 = sand.u32 1, %s4718_s26  }
  0xd0   : > { %s6005_s20 = scalar_select %p5062_p6, 1, 0 }
  0xd1   : > { %p5068_p10 = por %p411_p9, %p87_p13  ;;  %s3504_s10 = sshll.u32 %s569_s13, 7 }
  0xd2   : > { %s3692_s23 = sshll.u32 %s4722_s27, 11  ;;  %s6007_s28 = sld [smem:[#allocation27_spill]] }
  0xd3   : > { %s6006_s14 = scalar_select %p5068_p10, 1, 0 }
  0xd4   : > { %s573_s19 = scalar_lea.vmem [#allocation2], %s3504_s10  ;;  %p5078_p11 = pnand %p4092_p4, %p83_p2 }
  0xd5   : > { %s580_s17 = sshll.u32 %s573_s19, 4  ;;  %s5084_s15 = scalar_lea.sflag [#allocation3], %s569_s13  ;;  %s5082_s17 = int_to_ptr.vmem [resolvable:$true] %s580_s17 }
  0xd6   : > { %p4580_p8 = pneg %p5078_p11 }
  0xd8   : > { %s5076_s16 = scalar_lea.hbm %s6007_s28, %s3692_s23  ;;  %s4583_s12 = scalar_lea.hbm %s6007_s28, 4096 }
  0xd9   : > { %s4578_s2 = scalar_lea.hbm %s5076_s16, 2048  ;;  %p4584_p13 = scmp.lt.u32.totalorder %s5076_s16, %s6007_s28 }
  0xda   : > { %p4579_p12 = scmp.ne.s32.totalorder %s5076_s16, %s4578_s2  ;;  %p4585_p0 = scmp.lt.u32.totalorder %s4583_s12, %s4578_s2 }
  0xdb   : > { %p4587_p5 = scmp.lt.u32.totalorder %s4578_s2, %s5076_s16 }
  0xdc   : > { %p4581_p1 = pnand %p4580_p8, %p4579_p12  ;;  %p4586_p2 = por %p4585_p0, %p4584_p13 }
  0xde   : > { %p4582_p3 = pneg %p4581_p1  ;;  %p4588_p9 = por %p4587_p5, %p4586_p2 }
  0xe0   : > { %p4589_p4 = pnand %p4588_p9, %p4582_p3 }
  0xe2   : > { %4592 = shalt.err (!%p4589_p4)
}
  0xe3   : > { %s4593_s13 = scalar_lea.vmem %s5082_s17, 2048  ;;  %s4735_s10 = smov [#allocation2]  }
  0xe4   : > { %p4594_p12 = scmp.ne.s32.totalorder %s5082_s17, %s4593_s13  ;;  %s4598_s23 = sshll.u32 %s4735_s10, 4  ;;  %s4599_s23 = int_to_ptr.vmem [resolvable:$false] %s4598_s23 }
  0xe5   : > { %s4600_s22 = scalar_lea.vmem %s4599_s23, 4096  ;;  %p4601_p6 = scmp.lt.s32.totalorder %s5082_s17, %s4599_s23 }
  0xe6   : > { %p4596_p1 = pnand %p4594_p12, %p4580_p8  ;;  %p4602_p13 = scmp.lt.s32.totalorder %s4600_s22, %s4593_s13 }
  0xe8   : > { %p4597_p10 = pneg %p4596_p1  ;;  %p4603_p0 = por %p4602_p13, %p4601_p6 }
  0xea   : > { %p4604_p2 = pnand %p4603_p0, %p4597_p10 }
  0xec   : > { %4607 = shalt.err (!%p4604_p2)
}
  0xed   : > { %s6009_s2 = smov 8   ;;  %s6010_s12 = smov 128  }
  0xee   : > { %4077 = dma.hbm_to_vmem [thread:$0]  (!%p5078_p11), %s5076_s16, 2048, %s5082_s17, %s5084_s15, %s6010_s12, %s6010_s12, %s6009_s2  }
  0xef   : > { %p6011_p8 = scmp.ne.s32.totalorder %s5997_s30, 0 }
  0xf0   : > { %s5118_s19 = sand.u32 (!%p6011_p8), 1, %s4714_s25  }
  0xf1   : > { %592 = sbr.rel (%p6011_p8) target bundleno = 2311 (0x907), region = 84  ;;  %s3508_s13 = sshll.u32 (!%p6011_p8), %s5118_s19, 7 }
  0xf2   : > { %s595_s10 = scalar_lea.sflag (!%p6011_p8), [#allocation3], %s5118_s19  ;;  %s5124_s18 = scalar_lea.vmem (!%p6011_p8), [#allocation2], %s3508_s13 }
  0xf8   : > { %4681 = dma.done.wait (%p5058_p7), %s595_s10, 2048  }
  0xf9   : > { %4683 = vsyncadd (%p5058_p7), %s595_s10, 4294965248  ;;  %p6012_p6 = scmp.eq.s32.totalorder %s4852_s0, 0 }
  0xfb   : > { %4685 = dma.done.wait (%p6012_p6), [#allocation6], 2176   ;;  %p6013_p10 = pmov %p6012_p6 }
  0xfc   : > { %p6014_p11 = pmov %p6012_p6 }
  0xfd   : > { %4687 = vsyncadd (%p6013_p10), [#allocation6], 4294965120 }
  0xfe   : > { %4689 = dma.done.wait (%p6014_p11), [#allocation9], 96   ;;  %p6015_p3 = pmov %p6012_p6 }
 0x100   : > { %4691 = vsyncadd (%p6015_p3), [#allocation9], 4294967200  ;;  %p6016_p5 = pmov %p6015_p3 }
 0x101   : > { %p6017_p9 = pmov %p6015_p3 }
 0x102   : > { %4693 = dma.done.wait (%p6016_p5), [#allocation12], 4112  }
 0x103   : > { %4695 = vsyncadd (%p6017_p9), [#allocation12], 4294963184  ;;  %p6018_p7 = pmov %p6015_p3 }
 0x104   : > { %p6019_p4 = pmov %p6015_p3 }
 0x105   : > { %4697 = dma.done.wait (%p6018_p7), [#allocation15], 16  }
 0x106   : > { %4699 = vsyncadd (%p6019_p4), [#allocation15], 4294967280  ;;  %p687_p12 = scmp.lt.s32.totalorder %s4852_s0, 1  ;;  %s6020_s16 = sld [smem:[#allocation26_spill]]  ;;  %vm756_vm0 = vcmask 1045504   ;;  %vm731_vm1 = vcmask 97280  }
 0x107   : > { %v4147_v0 = vld [vmem:[#allocation5] sm:$0x3f]   ;;  %v4148_v14 = vld [vmem:[#allocation7 + $0x4] ss:$8 sps:$4 sm:$0xff]   ;;  %v4150_v15 = vld [vmem:[#allocation7] ss:$8 sps:$4 sm:$0xff]  }
 0x108   : > { %s688_s30 = scalar_select %p687_p12, %s4852_s0, 1  ;;  %4009 = vmatprep.subr.msk.bf16.mxu0 %vm756_vm0, %v4147_v0  ;;  %v758_v4 = vsel %vm756_vm0, %v4147_v0, 0  ;;  %v4151_v17 = vld [vmem:[#allocation7 + $0x14] ss:$8 sps:$4 sm:$0xff]   ;;  %989 = vmatprep.subr.bf16.mxu1 %v4148_v14  ;;  %v4153_v19 = vld [vmem:[#allocation7 + $0x10] ss:$8 sps:$4 sm:$0xff]  }
 0x109   : > { %3884 = vmatpush3.bf16.msra.mxu0 %v758_v4  ;;  %990 = vmatpush1.bf16.msra.mxu1 %v4150_v15  ;;  %v4154_v21 = vld [vmem:[#allocation7 + $0x24] ss:$8 sps:$4 sm:$0xff]   ;;  %v4156_v24 = vld [vmem:[#allocation7 + $0x20] ss:$8 sps:$4 sm:$0xff]   ;;  %v4157_v27 = vld [vmem:[#allocation7 + $0x34] ss:$8 sps:$4 sm:$0xff]  }
 0x10a   : > { %s3693_s17 = sshll.u32 %s688_s30, 7  ;;  %991 = vmatprep.subr.bf16.mxu1 %v4151_v17  ;;  %v4159_v28 = vld [vmem:[#allocation7 + $0x30] ss:$8 sps:$4 sm:$0xff]   ;;  %v4160_v29 = vld [vmem:[#allocation7 + $0x44] ss:$8 sps:$4 sm:$0xff]   ;;  %v4736_v42 = vmov 0  }
 0x10b   : > { %v4162_v32 = vld [vmem:[#allocation7 + $0x40] ss:$8 sps:$4 sm:$0xff]   ;;  %v4163_v35 = vld [vmem:[#allocation7 + $0x54] ss:$8 sps:$4 sm:$0xff]   ;;  %v4165_v36 = vld [vmem:[#allocation7 + $0x50] ss:$8 sps:$4 sm:$0xff]   ;;  %1021 = vmatprep.mubr.bf16.mxu1 %v4736_v42 }
 0x10c   : > { %s5151_s23 = scalar_lea.vmem %s6020_s16, %s3693_s17  ;;  %v4166_v38 = vld [vmem:[#allocation7 + $0x64] ss:$8 sps:$4 sm:$0xff]   ;;  %v4168_v39 = vld [vmem:[#allocation7 + $0x60] ss:$8 sps:$4 sm:$0xff]   ;;  %v4169_v40 = vld [vmem:[#allocation7 + $0x74] ss:$8 sps:$4 sm:$0xff]  }
 0x10d   : > { %v693_v1 = vld [vmem:[%s5151_s23] sm:$0xff]  ;;  %v694_v2 = vld [vmem:[%s5151_s23 + $0x8] sm:$0xff]  ;;  %v695_v3 = vld [vmem:[%s5151_s23 + $0x10] sm:$0xff]  ;;  %992 = vmatpush1.bf16.msra.mxu1 %v4153_v19  ;;  %s6021_s3 = sld [smem:[#allocation29_spill]]  ;;  %s6022_s12 = sld [smem:[#allocation32_spill]]  ;;  %vm2638_vm2 = vcmask 785408  }
 0x10e   : > { %v709_v5 = vpack.c.bf16 %v694_v2, %v693_v1  ;;  %v696_v6 = vld [vmem:[%s5151_s23 + $0x18] sm:$0xff]  ;;  %v697_v7 = vld [vmem:[%s5151_s23 + $0x20] sm:$0xff]  ;;  %v698_v8 = vld [vmem:[%s5151_s23 + $0x28] sm:$0xff]  ;;  %993 = vmatprep.subr.bf16.mxu1 %v4154_v21  ;;  %s6023_s22 = sld [smem:[#allocation33_spill]]  ;;  %s5564_s16 = scalar_lea.vmem [#allocation17], %s3508_s13  ;;  %vm2823_vm3 = vcmask 523264  }
 0x10f   : > { %v710_v9 = vpack.c.bf16 %v696_v6, %v695_v3  ;;  %v711_v10 = vpack.c.bf16 %v698_v8, %v697_v7  ;;  %v699_v11 = vld [vmem:[%s5151_s23 + $0x30] sm:$0xff]  ;;  %v700_v12 = vld [vmem:[%s5151_s23 + $0x38] sm:$0xff]  ;;  %v701_v13 = vld [vmem:[%s5151_s23 + $0x40] sm:$0xff]  ;;  %s6024_s17 = sld [smem:[#allocation35_spill]]  ;;  %s6025_s15 = sld [smem:[#allocation34_spill]]  ;;  %vm2961_vm4 = vcmask 261120  }
 0x110   : > { %3885 = vmatprep.mubr.msk.bf16.mxu0 %vm731_vm1, %v709_v5  ;;  %v702_v16 = vld [vmem:[%s5151_s23 + $0x48] sm:$0xff]  ;;  %v712_v18 = vpack.c.bf16 %v700_v12, %v699_v11  ;;  %v703_v22 = vld [vmem:[%s5151_s23 + $0x50] sm:$0xff]  ;;  %v704_v23 = vld [vmem:[%s5151_s23 + $0x58] sm:$0xff]  ;;  %s3695_s2 = sshll.u32 %s4852_s0, 11  ;;  %s3310_s10 = sshll.u32 %s5564_s16, 4  ;;  %s5862_s10 = int_to_ptr.vmem [resolvable:$true] %s3310_s10 }
 0x111   : > { %3886 = vmatmul.mubr.msk.bf16.vlgmr.msra.gmra.mrb[0].mxu0 %vm731_vm1, %v710_v9  ;;  %v713_v20 = vpack.c.bf16 %v702_v16, %v701_v13  ;;  %v705_v25 = vld [vmem:[%s5151_s23 + $0x60] sm:$0xff]  ;;  %v706_v26 = vld [vmem:[%s5151_s23 + $0x68] sm:$0xff]  ;;  %v714_v30 = vpack.c.bf16 %v704_v23, %v703_v22  ;;  %994 = vmatpush1.bf16.msra.mxu1 %v4156_v24  ;;  %v707_v33 = vld [vmem:[%s5151_s23 + $0x70] sm:$0xff]  ;;  %p6028_p13 = scmp.ne.s32.totalorder %s6005_s20, 0 }
 0x112   : > { %3889 = vmatprep.mubr.msk.bf16.mxu0 %vm731_vm1, %v711_v10  ;;  %v715_v31 = vpack.c.bf16 %v706_v26, %v705_v25  ;;  %995 = vmatprep.subr.bf16.mxu1 %v4157_v27  ;;  %v708_v34 = vld [vmem:[%s5151_s23 + $0x78] sm:$0xff]  ;;  %v4172_v43 = vld [vmem:[%s5959_s6] ss:$16 sps:$4 sm:$0xff]   ;;  %v4174_v44 = vld [vmem:[%s5959_s6 + $0x4] ss:$16 sps:$4 sm:$0xff]   ;;  %s6026_s23 = sld [smem:[#allocation36_spill]] }
 0x113   : > { %v716_v37 = vpack.c.bf16 %v708_v34, %v707_v33  ;;  %v4171_v41 = vld [vmem:[#allocation7 + $0x70] ss:$8 sps:$4 sm:$0xff]   ;;  %v4177_v45 = vld [vmem:[%s5959_s6 + $0xc] ss:$16 sps:$4 sm:$0xff]   ;;  %v4180_v46 = vld [vmem:[%s5959_s6 + $0x24] ss:$16 sps:$4 sm:$0xff]   ;;  %1556 = vmatprep.subr.bf16.mxu0 %v4174_v44 }
 0x114   : > { %1557 = vmatpush1.bf16.msra.mxu0 %v4172_v43  ;;  %v4178_v47 = vld [vmem:[%s5959_s6 + $0x20] ss:$16 sps:$4 sm:$0xff]   ;;  %v4186_v48 = vld [vmem:[%s5959_s6 + $0x44] ss:$16 sps:$4 sm:$0xff]   ;;  %v4175_v22 = vld [vmem:[%s5959_s6 + $0x8] ss:$16 sps:$4 sm:$0xff]  }
 0x115   : > { %996 = vmatpush1.bf16.msra.mxu1 %v4159_v28  ;;  %1558 = vmatprep.subr.bf16.mxu0 %v4180_v46  ;;  %v4184_v49 = vld [vmem:[%s5959_s6 + $0x40] ss:$16 sps:$4 sm:$0xff]   ;;  %v4192_v50 = vld [vmem:[%s5959_s6 + $0x64] ss:$16 sps:$4 sm:$0xff]   ;;  %v4183_v25 = vld [vmem:[%s5959_s6 + $0x2c] ss:$16 sps:$4 sm:$0xff]  }
 0x116   : > { %997 = vmatprep.subr.bf16.mxu1 %v4160_v29  ;;  %v4190_v51 = vld [vmem:[%s5959_s6 + $0x60] ss:$16 sps:$4 sm:$0xff]   ;;  %v4198_v52 = vld [vmem:[%s5959_s6 + $0x84] ss:$16 sps:$4 sm:$0xff]   ;;  %v4181_v33 = vld [vmem:[%s5959_s6 + $0x28] ss:$16 sps:$4 sm:$0xff]  }
 0x117   : > { %v4196_v53 = vld [vmem:[%s5959_s6 + $0x80] ss:$16 sps:$4 sm:$0xff]   ;;  %v4204_v54 = vld [vmem:[%s5959_s6 + $0xa4] ss:$16 sps:$4 sm:$0xff]   ;;  %v4195_v44 = vld [vmem:[%s5959_s6 + $0x6c] ss:$16 sps:$4 sm:$0xff]  }
 0x118   : > { %1559 = vmatpush1.bf16.msra.mxu0 %v4178_v47  ;;  %v4202_v55 = vld [vmem:[%s5959_s6 + $0xa0] ss:$16 sps:$4 sm:$0xff]   ;;  %v4210_v56 = vld [vmem:[%s5959_s6 + $0xc4] ss:$16 sps:$4 sm:$0xff]  }
 0x119   : > { %3890 = vmatmul.mubr.msk.bf16.gmra.mrb[4].mxu0 %vm731_vm1, %v712_v18  ;;  %998 = vmatpush1.bf16.msra.mxu1 %v4162_v32  ;;  %v4208_v57 = vld [vmem:[%s5959_s6 + $0xc0] ss:$16 sps:$4 sm:$0xff]   ;;  %v4216_v58 = vld [vmem:[%s5959_s6 + $0xe4] ss:$16 sps:$4 sm:$0xff]  }
 0x11a   : > { %3893 = vmatprep.mubr.msk.bf16.mxu0 %vm731_vm1, %v713_v20  ;;  %999 = vmatprep.subr.bf16.mxu1 %v4163_v35  ;;  %v4214_v59 = vld [vmem:[%s5959_s6 + $0xe0] ss:$16 sps:$4 sm:$0xff]   ;;  %v4222_v60 = vld [vmem:[%s5959_s6 + $0x104] ss:$16 sps:$4 sm:$0xff]  }
 0x11b   : > { %1560 = vmatprep.subr.bf16.mxu0 %v4186_v48  ;;  %v4220_v61 = vld [vmem:[%s5959_s6 + $0x100] ss:$16 sps:$4 sm:$0xff]   ;;  %v4228_v62 = vld [vmem:[%s5959_s6 + $0x124] ss:$16 sps:$4 sm:$0xff]  }
 0x11c   : > { %1561 = vmatpush1.bf16.msra.mxu0 %v4184_v49  ;;  %v4226_v63 = vld [vmem:[%s5959_s6 + $0x120] ss:$16 sps:$4 sm:$0xff]   ;;  %v4234_v0 = vld [vmem:[%s5959_s6 + $0x144] ss:$16 sps:$4 sm:$0xff]  }
 0x11d   : > { %1000 = vmatpush1.bf16.msra.mxu1 %v4165_v36  ;;  %1562 = vmatprep.subr.bf16.mxu0 %v4192_v50  ;;  %v4232_v1 = vld [vmem:[%s5959_s6 + $0x140] ss:$16 sps:$4 sm:$0xff]   ;;  %v4240_v2 = vld [vmem:[%s5959_s6 + $0x164] ss:$16 sps:$4 sm:$0xff]   ;;  %v4189_v36 = vld [vmem:[%s5959_s6 + $0x4c] ss:$16 sps:$4 sm:$0xff]  }
 0x11e   : > { %1001 = vmatprep.subr.bf16.mxu1 %v4166_v38  ;;  %v4238_v3 = vld [vmem:[%s5959_s6 + $0x160] ss:$16 sps:$4 sm:$0xff]   ;;  %v4246_v4 = vld [vmem:[%s5959_s6 + $0x184] ss:$16 sps:$4 sm:$0xff]  }
 0x11f   : > { %v4244_v5 = vld [vmem:[%s5959_s6 + $0x180] ss:$16 sps:$4 sm:$0xff]   ;;  %v4252_v6 = vld [vmem:[%s5959_s6 + $0x1a4] ss:$16 sps:$4 sm:$0xff]  }
 0x120   : > { %1563 = vmatpush1.bf16.msra.mxu0 %v4190_v51  ;;  %v4250_v7 = vld [vmem:[%s5959_s6 + $0x1a0] ss:$16 sps:$4 sm:$0xff]  }
 0x121   : > { %3894 = vmatmul.mubr.msk.bf16.gmra.mrb[8].mxu0 %vm731_vm1, %v714_v30  ;;  %1002 = vmatpush1.bf16.msra.mxu1 %v4168_v39  ;;  %v5268_v8 = vld [vmem:[%s6021_s3] ss:$0 sm:$0xff]  ;;  %s4737_s3 = smov [#allocation17]  }
 0x122   : > { %3897 = vmatprep.mubr.msk.bf16.mxu0 %vm731_vm1, %v715_v31  ;;  %1003 = vmatprep.subr.bf16.mxu1 %v4169_v40  ;;  %v4187_v40 = vld [vmem:[%s5959_s6 + $0x48] ss:$16 sps:$4 sm:$0xff]   ;;  %s4612_s4 = sshll.u32 %s4737_s3, 4  ;;  %s4613_s4 = int_to_ptr.vmem [resolvable:$false] %s4612_s4 }
 0x123   : > { %1564 = vmatprep.subr.bf16.mxu0 %v4198_v52  ;;  %v4193_v52 = vld [vmem:[%s5959_s6 + $0x68] ss:$16 sps:$4 sm:$0xff]   ;;  %p4615_p8 = scmp.lt.s32.totalorder %s5862_s10, %s4613_s4 }
 0x124   : > { %1565 = vmatpush1.bf16.msra.mxu0 %v4196_v53 }
 0x125   : > { %1004 = vmatpush1.bf16.msra.mxu1 %v4171_v41  ;;  %1566 = vmatprep.subr.bf16.mxu0 %v4204_v54 }
 0x126   : > { %1669 = vmatprep.subr.bf16.mxu1 %v4177_v45 }
 0x128   : > { %1567 = vmatpush1.bf16.msra.mxu0 %v4202_v55  ;;  %v4201_v55 = vld [vmem:[%s5959_s6 + $0x8c] ss:$16 sps:$4 sm:$0xff]  }
 0x129   : > { %3898 = vmatmul.mubr.msk.bf16.gmra.mrb[12].mxu0 %vm731_vm1, %v716_v37  ;;  %1568 = vmatprep.subr.bf16.mxu0 %v4210_v56 }
 0x12c   : > { %1569 = vmatpush1.bf16.msra.mxu0 %v4208_v57 }
 0x12d   : > { %1570 = vmatprep.subr.bf16.mxu0 %v4216_v58 }
 0x130   : > { %1571 = vmatpush1.bf16.msra.mxu0 %v4214_v59  ;;  %v4199_v59 = vld [vmem:[%s5959_s6 + $0x88] ss:$16 sps:$4 sm:$0xff]  }
 0x131   : > { %1572 = vmatprep.subr.bf16.mxu0 %v4222_v60 }
 0x134   : > { %1573 = vmatpush1.bf16.msra.mxu0 %v4220_v61 }
 0x135   : > { %1574 = vmatprep.subr.bf16.mxu0 %v4228_v62  ;;  %v4207_v62 = vld [vmem:[%s5959_s6 + $0xac] ss:$16 sps:$4 sm:$0xff]  }
 0x138   : > { %1575 = vmatpush1.bf16.msra.mxu0 %v4226_v63 }
 0x139   : > { %1576 = vmatprep.subr.bf16.mxu0 %v4234_v0 }
 0x13c   : > { %1577 = vmatpush1.bf16.msra.mxu0 %v4232_v1 }
 0x13d   : > { %1578 = vmatprep.subr.bf16.mxu0 %v4240_v2 }
 0x140   : > { %1579 = vmatpush1.bf16.msra.mxu0 %v4238_v3 }
 0x141   : > { %1580 = vmatprep.subr.bf16.mxu0 %v4246_v4 }
 0x144   : > { %1581 = vmatpush1.bf16.msra.mxu0 %v4244_v5 }
 0x145   : > { %1582 = vmatprep.subr.bf16.mxu0 %v4252_v6  ;;  %v4205_v6 = vld [vmem:[%s5959_s6 + $0xa8] ss:$16 sps:$4 sm:$0xff]  }
 0x148   : > { %1583 = vmatpush1.bf16.msra.mxu0 %v4250_v7 }
 0x1e4   : > { %v3887_v9 = vpop.f32.mrb[0].mxu0 }
 0x1e5   : > { %v803_v10 = vadd.f32 %v3887_v9, %v5268_v8  ;;  %v794_v11 = vpop.f32.mrb[1].mxu0 }
 0x1e6   : > { %v795_v12 = vadd.f32 %v5268_v8, %v794_v11  ;;  %v3888_v13 = vpop.f32.mrb[2].mxu0 }
 0x1e7   : > { %v806_v14 = vadd.f32 %v3888_v13, %v5268_v8  ;;  %v797_v15 = vpop.f32.mrb[3].mxu0  ;;  %v859_v17 = vmax.f32 %v803_v10, 0.0  ;;  %v4213_v10 = vld [vmem:[%s5959_s6 + $0xcc] ss:$16 sps:$4 sm:$0xff]  }
 0x1e8   : > { %v798_v16 = vadd.f32 %v5268_v8, %v797_v15  ;;  %v857_v19 = vmax.f32 %v795_v12, 0.0 }
 0x1e9   : > { %v860_v18 = vmax.f32 %v806_v14, 0.0  ;;  %v4211_v14 = vld [vmem:[%s5959_s6 + $0xc8] ss:$16 sps:$4 sm:$0xff]  }
 0x1ea   : > { %v858_v20 = vmax.f32 %v798_v16, 0.0  ;;  %v4219_v16 = vld [vmem:[%s5959_s6 + $0xec] ss:$16 sps:$4 sm:$0xff]  }
 0x1eb   : > { %v874_v21 = vpack.c.bf16 %v860_v18, %v859_v17  ;;  %v4225_v17 = vld [vmem:[%s5959_s6 + $0x10c] ss:$16 sps:$4 sm:$0xff]   ;;  %v4223_v18 = vld [vmem:[%s5959_s6 + $0x108] ss:$16 sps:$4 sm:$0xff]  }
 0x1ec   : > { %v873_v23 = vpack.c.bf16 %v858_v20, %v857_v19  ;;  %v3891_v24 = vpop.f32.mrb[4].mxu0  ;;  %v4231_v19 = vld [vmem:[%s5959_s6 + $0x12c] ss:$16 sps:$4 sm:$0xff]   ;;  %v4229_v20 = vld [vmem:[%s5959_s6 + $0x128] ss:$16 sps:$4 sm:$0xff]  }
 0x1ed   : > { %v819_v26 = vadd.f32 %v3891_v24, %v5268_v8  ;;  %v810_v27 = vpop.f32.mrb[5].mxu0  ;;  %v4241_v24 = vld [vmem:[%s5959_s6 + $0x168] ss:$16 sps:$4 sm:$0xff]  }
 0x1ee   : > { %1022 = vmatmul.mubr.bf16.vlgmr.msra.gmra.mrb[0].mxu1 %v873_v23  ;;  %v811_v28 = vadd.f32 %v5268_v8, %v810_v27  ;;  %v3892_v29 = vpop.f32.mrb[6].mxu0  ;;  %v4243_v23 = vld [vmem:[%s5959_s6 + $0x16c] ss:$16 sps:$4 sm:$0xff]  }
 0x1ef   : > { %v863_v30 = vmax.f32 %v819_v26, 0.0  ;;  %v822_v31 = vadd.f32 %v3892_v29, %v5268_v8  ;;  %v813_v32 = vpop.f32.mrb[7].mxu0  ;;  %1031 = vmatprep.mubr.bf16.mxu1 %v4736_v42  ;;  %1670 = vmatpush1.bf16.msra.mxu1 %v4175_v22  ;;  %v4235_v22 = vld [vmem:[%s5959_s6 + $0x148] ss:$16 sps:$4 sm:$0xff]   ;;  %v4255_v27 = vld [vmem:[%s5959_s6 + $0x1ac] ss:$16 sps:$4 sm:$0xff]  }
 0x1f0   : > { %v861_v34 = vmax.f32 %v811_v28, 0.0  ;;  %v814_v35 = vadd.f32 %v5268_v8, %v813_v32  ;;  %1671 = vmatprep.subr.bf16.mxu1 %v4183_v25  ;;  %v4249_v25 = vld [vmem:[%s5959_s6 + $0x18c] ss:$16 sps:$4 sm:$0xff]   ;;  %v4247_v26 = vld [vmem:[%s5959_s6 + $0x188] ss:$16 sps:$4 sm:$0xff]  }
 0x1f1   : > { %v864_v37 = vmax.f32 %v822_v31, 0.0  ;;  %v4253_v28 = vld [vmem:[%s5959_s6 + $0x1a8] ss:$16 sps:$4 sm:$0xff]   ;;  %v4258_v29 = vld [vmem:[%s5959_s6 + $0x1c4] ss:$16 sps:$4 sm:$0xff]  }
 0x1f2   : > { %v862_v38 = vmax.f32 %v814_v35, 0.0  ;;  %v4259_v31 = vld [vmem:[%s5959_s6 + $0x1c8] ss:$16 sps:$4 sm:$0xff]   ;;  %1584 = vmatprep.subr.bf16.mxu0 %v4258_v29  ;;  %v4264_v32 = vld [vmem:[%s5959_s6 + $0x1e4] ss:$16 sps:$4 sm:$0xff]  }
 0x1f3   : > { %v876_v39 = vpack.c.bf16 %v864_v37, %v863_v30  ;;  %1672 = vmatpush1.bf16.msra.mxu1 %v4181_v33  ;;  %v4261_v30 = vld [vmem:[%s5959_s6 + $0x1cc] ss:$16 sps:$4 sm:$0xff]   ;;  %v4265_v35 = vld [vmem:[%s5959_s6 + $0x1e8] ss:$16 sps:$4 sm:$0xff]  }
 0x1f4   : > { %v875_v41 = vpack.c.bf16 %v862_v38, %v861_v34  ;;  %v3895_v43 = vpop.f32.mrb[8].mxu0  ;;  %1673 = vmatprep.subr.bf16.mxu1 %v4189_v36  ;;  %v4267_v33 = vld [vmem:[%s5959_s6 + $0x1ec] ss:$16 sps:$4 sm:$0xff]   ;;  %v4262_v34 = vld [vmem:[%s5959_s6 + $0x1e0] ss:$16 sps:$4 sm:$0xff]   ;;  %v899_v38 = vlaneseq }
 0x1f5   : > { %v835_v45 = vadd.f32 %v3895_v43, %v5268_v8  ;;  %v826_v46 = vpop.f32.mrb[9].mxu0  ;;  %v4268_v36 = vld [vmem:[#allocation11 + $0x40] sm:$0xff]  }
 0x1f6   : > { %1032 = vmatmul.mubr.bf16.gmra.mrb[4].mxu1 %v874_v21  ;;  %v827_v47 = vadd.f32 %v5268_v8, %v826_v46  ;;  %v3896_v48 = vpop.f32.mrb[10].mxu0  ;;  %v4237_v21 = vld [vmem:[%s5959_s6 + $0x14c] ss:$16 sps:$4 sm:$0xff]  }
 0x1f7   : > { %1041 = vmatprep.mubr.bf16.mxu1 %v4736_v42  ;;  %v867_v49 = vmax.f32 %v835_v45, 0.0  ;;  %v838_v50 = vadd.f32 %v3896_v48, %v5268_v8  ;;  %v829_v51 = vpop.f32.mrb[11].mxu0  ;;  %1674 = vmatpush1.bf16.msra.mxu1 %v4187_v40  ;;  %v4270_v37 = vld [vmem:[#allocation11 + $0xc0] sm:$0xff]  }
 0x1f8   : > { %v865_v53 = vmax.f32 %v827_v47, 0.0  ;;  %v830_v54 = vadd.f32 %v5268_v8, %v829_v51  ;;  %1675 = vmatprep.subr.bf16.mxu1 %v4195_v44 }
 0x1f9   : > { %v868_v56 = vmax.f32 %v838_v50, 0.0 }
 0x1fa   : > { %v866_v57 = vmax.f32 %v830_v54, 0.0 }
 0x1fb   : > { %v878_v58 = vpack.c.bf16 %v868_v56, %v867_v49  ;;  %1676 = vmatpush1.bf16.msra.mxu1 %v4193_v52 }
 0x1fc   : > { %v877_v60 = vpack.c.bf16 %v866_v57, %v865_v53  ;;  %v3899_v61 = vpop.f32.mrb[12].mxu0  ;;  %1677 = vmatprep.subr.bf16.mxu1 %v4201_v55 }
 0x1fd   : > { %v851_v63 = vadd.f32 %v3899_v61, %v5268_v8  ;;  %v842_v0 = vpop.f32.mrb[13].mxu0  ;;  %v4269_v61 = vld [vmem:[#allocation11] sm:$0xff]  }
 0x1fe   : > { %1042 = vmatmul.mubr.bf16.gmra.mrb[8].mxu1 %v875_v41  ;;  %v843_v1 = vadd.f32 %v5268_v8, %v842_v0  ;;  %v3900_v2 = vpop.f32.mrb[14].mxu0  ;;  %v897_v41 = vld [vmem:[#allocation8] sm:$0x3] }
 0x1ff   : > { %1051 = vmatprep.mubr.bf16.mxu1 %v4736_v42  ;;  %v871_v3 = vmax.f32 %v851_v63, 0.0  ;;  %v854_v4 = vadd.f32 %v3900_v2, %v5268_v8  ;;  %v845_v5 = vpop.f32.mrb[15].mxu0  ;;  %1678 = vmatpush1.bf16.msra.mxu1 %v4199_v59  ;;  %v4274_v2 = vld [vmem:[#allocation11 + $0xc8] sm:$0xff]  }
 0x200   : > { %v869_v7 = vmax.f32 %v843_v1, 0.0  ;;  %v846_v9 = vadd.f32 %v5268_v8, %v845_v5  ;;  %1679 = vmatprep.subr.bf16.mxu1 %v4207_v62  ;;  %v4217_v8 = vld [vmem:[%s5959_s6 + $0xe8] ss:$16 sps:$4 sm:$0xff]   ;;  %v4271_v62 = vld [vmem:[#allocation11 + $0x80] sm:$0xff]  }
 0x201   : > { %v872_v11 = vmax.f32 %v854_v4, 0.0  ;;  %v4272_v1 = vld [vmem:[#allocation11 + $0x48] sm:$0xff]  }
 0x202   : > { %v870_v12 = vmax.f32 %v846_v9, 0.0  ;;  %v4273_v9 = vld [vmem:[#allocation11 + $0x8] sm:$0xff]  }
 0x203   : > { %v880_v13 = vpack.c.bf16 %v872_v11, %v871_v3  ;;  %1680 = vmatpush1.bf16.msra.mxu1 %v4205_v6 }
 0x204   : > { %v879_v15 = vpack.c.bf16 %v870_v12, %v869_v7  ;;  %1681 = vmatprep.subr.bf16.mxu1 %v4213_v10  ;;  %v4275_v10 = vld [vmem:[#allocation11 + $0x88] sm:$0xff]  }
 0x206   : > { %1052 = vmatmul.mubr.bf16.gmra.mrb[12].mxu1 %v876_v39  ;;  %v5398_v39 = vshrl.u32 %v899_v38, 7 }
 0x207   : > { %1061 = vmatprep.mubr.bf16.mxu1 %v4736_v42  ;;  %1682 = vmatpush1.bf16.msra.mxu1 %v4211_v14  ;;  %v4278_v14 = vld [vmem:[#allocation11 + $0xd0] sm:$0xff]  }
 0x208   : > { %1683 = vmatprep.subr.bf16.mxu1 %v4219_v16  ;;  %v901_v40 = vsub.s32 0, %v5398_v39  ;;  %v905_v43 = vsub.s32 1, %v5398_v39 }
 0x20a   : > { %v5404_v44 = vrot.slane %v897_v41, %v901_v40  ;;  %v5408_v45 = vrot.slane %v897_v41, %v905_v43 }
 0x20b   : > { %1684 = vmatpush1.bf16.msra.mxu1 %v4217_v8 }
 0x20c   : > { %1685 = vmatprep.subr.bf16.mxu1 %v4225_v17 }
 0x20e   : > { %1062 = vmatmul.mubr.bf16.gmra.mrb[16].mxu1 %v877_v60 }
 0x20f   : > { %1071 = vmatprep.mubr.bf16.mxu1 %v4736_v42  ;;  %1686 = vmatpush1.bf16.msra.mxu1 %v4223_v18 }
 0x210   : > { %1687 = vmatprep.subr.bf16.mxu1 %v4231_v19  ;;  %v4277_v19 = vld [vmem:[#allocation11 + $0x10] sm:$0xff]  }
 0x213   : > { %1688 = vmatpush1.bf16.msra.mxu1 %v4229_v20  ;;  %v4279_v20 = vld [vmem:[#allocation11 + $0x90] sm:$0xff]  }
 0x214   : > { %1689 = vmatprep.subr.bf16.mxu1 %v4237_v21 }
 0x216   : > { %1072 = vmatmul.mubr.bf16.gmra.mrb[20].mxu1 %v878_v58 }
 0x217   : > { %1081 = vmatprep.mubr.bf16.mxu1 %v4736_v42  ;;  %1690 = vmatpush1.bf16.msra.mxu1 %v4235_v22 }
 0x218   : > { %1691 = vmatprep.subr.bf16.mxu1 %v4243_v23  ;;  %v4280_v23 = vld [vmem:[#allocation11 + $0x58] sm:$0xff]  }
 0x21b   : > { %1692 = vmatpush1.bf16.msra.mxu1 %v4241_v24  ;;  %v4282_v24 = vld [vmem:[#allocation11 + $0xd8] sm:$0xff]  }
 0x21c   : > { %1693 = vmatprep.subr.bf16.mxu1 %v4249_v25 }
 0x21e   : > { %1082 = vmatmul.mubr.bf16.gmra.mrb[24].mxu1 %v879_v15 }
 0x21f   : > { %1091 = vmatprep.mubr.bf16.mxu1 %v4736_v42  ;;  %1694 = vmatpush1.bf16.msra.mxu1 %v4247_v26  ;;  %v4256_v42 = vld [vmem:[%s5959_s6 + $0x1c0] ss:$16 sps:$4 sm:$0xff]  }
 0x220   : > { %1695 = vmatprep.subr.bf16.mxu1 %v4255_v27  ;;  %1585 = vmatpush1.bf16.msra.mxu0 %v4256_v42  ;;  %v4283_v42 = vld [vmem:[#allocation11 + $0x98] sm:$0xff]  }
 0x221   : > { %1586 = vmatprep.subr.bf16.mxu0 %v4264_v32 }
 0x223   : > { %1696 = vmatpush1.bf16.msra.mxu1 %v4253_v28 }
 0x224   : > { %1697 = vmatprep.subr.bf16.mxu1 %v4261_v30  ;;  %1587 = vmatpush1.bf16.msra.mxu0 %v4262_v34  ;;  %v4281_v30 = vld [vmem:[#allocation11 + $0x18] sm:$0xff]   ;;  %v4286_v34 = vld [vmem:[#allocation11 + $0xe0] sm:$0xff]  }
 0x225   : > { %3705 = vmatprep.subr.bf16.mxu0 %v4268_v36 }
 0x226   : > { %1092 = vmatmul.mubr.bf16.gmra.mrb[28].mxu1 %v880_v13  ;;  %v4276_v13 = vld [vmem:[#allocation11 + $0x50] sm:$0xff]  }
 0x227   : > { %1698 = vmatpush1.bf16.msra.mxu1 %v4259_v31 }
 0x228   : > { %1699 = vmatprep.subr.bf16.mxu1 %v4267_v33  ;;  %v4284_v33 = vld [vmem:[#allocation11 + $0x60] sm:$0xff]  }
 0x22b   : > { %1700 = vmatpush1.bf16.msra.mxu1 %v4265_v35 }
 0x22c   : > { %3769 = vmatprep.subr.bf16.mxu1 %v4270_v37 }
 0x2c1   : > { %v1023_v46 = vpop.f32.mrb[0].mxu1 }
 0x2c2   : > { %v1024_v47 = vadd.f32 %v1023_v46, %v5404_v44  ;;  %v1025_v48 = vpop.f32.mrb[1].mxu1  ;;  %v4285_v46 = vld [vmem:[#allocation11 + $0x20] sm:$0xff]  }
 0x2c3   : > { %v1026_v49 = vadd.f32 %v1025_v48, %v5408_v45  ;;  %v1027_v50 = vpop.f32.mrb[2].mxu1 }
 0x2c4   : > { %v1028_v51 = vadd.f32 %v1027_v50, %v5404_v44  ;;  %v1029_v52 = vpop.f32.mrb[3].mxu1  ;;  %v1102_v54 = vmax.f32 %v1024_v47, 0.0  ;;  %v4287_v47 = vld [vmem:[#allocation11 + $0xa0] sm:$0xff]   ;;  %v4288_v50 = vld [vmem:[#allocation11 + $0x68] sm:$0xff]  }
 0x2c5   : > { %v1030_v53 = vadd.f32 %v1029_v52, %v5408_v45  ;;  %v1103_v56 = vmax.f32 %v1026_v49, 0.0 }
 0x2c6   : > { %v1104_v55 = vmax.f32 %v1028_v51, 0.0  ;;  %v4290_v51 = vld [vmem:[#allocation11 + $0xe8] sm:$0xff]  }
 0x2c7   : > { %v1105_v57 = vmax.f32 %v1030_v53, 0.0 }
 0x2c8   : > { %v1134_v58 = vpack.c.bf16 %v1104_v55, %v1102_v54 }
 0x2c9   : > { %v1135_v59 = vpack.c.bf16 %v1105_v57, %v1103_v56  ;;  %v1033_v60 = vpop.f32.mrb[4].mxu1  ;;  %v4289_v57 = vld [vmem:[#allocation11 + $0x28] sm:$0xff]  }
 0x2ca   : > { %v1034_v63 = vadd.f32 %v1033_v60, %v5404_v44  ;;  %v1035_v0 = vpop.f32.mrb[5].mxu1 }
 0x2cb   : > { %v1036_v3 = vadd.f32 %v1035_v0, %v5408_v45  ;;  %v1037_v4 = vpop.f32.mrb[6].mxu1  ;;  %1588 = vmatprep.mubr.bf16.mxu0 %v1135_v59  ;;  %1701 = vmatprep.mubr.bf16.mxu1 %v1135_v59 }
 0x2cc   : > { %v1038_v5 = vadd.f32 %v1037_v4, %v5404_v44  ;;  %v1039_v6 = vpop.f32.mrb[7].mxu1  ;;  %1589 = vmatmul.mubr.bf16.vlgmr.msra.gmra.mrb[16].mxu0 %v1134_v58  ;;  %1702 = vmatmul.mubr.bf16.vlgmr.msra.gmra.mrb[32].mxu1 %v1134_v58  ;;  %v1106_v11 = vmax.f32 %v1034_v63, 0.0  ;;  %v4291_v58 = vld [vmem:[#allocation11 + $0xa8] sm:$0xff]   ;;  %v4293_v4 = vld [vmem:[#allocation11 + $0x30] sm:$0xff]  }
 0x2cd   : > { %v1040_v7 = vadd.f32 %v1039_v6, %v5408_v45  ;;  %3706 = vmatpush3.bf16.msra.mxu0 %v4269_v61  ;;  %3770 = vmatpush3.bf16.msra.mxu1 %v4271_v62  ;;  %v1107_v15 = vmax.f32 %v1036_v3, 0.0  ;;  %v4292_v61 = vld [vmem:[#allocation11 + $0x70] sm:$0xff]  }
 0x2ce   : > { %v1108_v12 = vmax.f32 %v1038_v5, 0.0  ;;  %3707 = vmatprep.subr.bf16.mxu0 %v4272_v1  ;;  %3771 = vmatprep.subr.bf16.mxu1 %v4274_v2  ;;  %v4294_v62 = vld [vmem:[#allocation11 + $0xf0] sm:$0xff]  }
 0x2cf   : > { %v1109_v16 = vmax.f32 %v1040_v7, 0.0  ;;  %v4295_v5 = vld [vmem:[#allocation11 + $0xb0] sm:$0xff]  }
 0x2d0   : > { %v1136_v8 = vpack.c.bf16 %v1108_v12, %v1106_v11 }
 0x2d1   : > { %v1137_v17 = vpack.c.bf16 %v1109_v16, %v1107_v15  ;;  %v1043_v18 = vpop.f32.mrb[8].mxu1  ;;  %3708 = vmatpush3.bf16.msra.mxu0 %v4273_v9  ;;  %3772 = vmatpush3.bf16.msra.mxu1 %v4275_v10 }
 0x2d2   : > { %v1044_v21 = vadd.f32 %v1043_v18, %v5404_v44  ;;  %v1045_v22 = vpop.f32.mrb[9].mxu1  ;;  %3709 = vmatprep.subr.bf16.mxu0 %v4276_v13  ;;  %3773 = vmatprep.subr.bf16.mxu1 %v4278_v14 }
 0x2d3   : > { %v1046_v25 = vadd.f32 %v1045_v22, %v5408_v45  ;;  %v1047_v26 = vpop.f32.mrb[10].mxu1  ;;  %1598 = vmatprep.mubr.bf16.mxu0 %v1137_v17  ;;  %1711 = vmatprep.mubr.bf16.mxu1 %v1137_v17 }
 0x2d4   : > { %v1048_v27 = vadd.f32 %v1047_v26, %v5404_v44  ;;  %v1049_v28 = vpop.f32.mrb[11].mxu1  ;;  %1599 = vmatmul.mubr.bf16.gmra.mrb[20].mxu0 %v1136_v8  ;;  %1712 = vmatmul.mubr.bf16.gmra.mrb[36].mxu1 %v1136_v8  ;;  %v1110_v31 = vmax.f32 %v1044_v21, 0.0 }
 0x2d5   : > { %v1050_v29 = vadd.f32 %v1049_v28, %v5408_v45  ;;  %3710 = vmatpush3.bf16.msra.mxu0 %v4277_v19  ;;  %3774 = vmatpush3.bf16.msra.mxu1 %v4279_v20  ;;  %v1111_v35 = vmax.f32 %v1046_v25, 0.0 }
 0x2d6   : > { %v1112_v32 = vmax.f32 %v1048_v27, 0.0  ;;  %3711 = vmatprep.subr.bf16.mxu0 %v4280_v23  ;;  %3775 = vmatprep.subr.bf16.mxu1 %v4282_v24 }
 0x2d7   : > { %v1113_v36 = vmax.f32 %v1050_v29, 0.0 }
 0x2d8   : > { %v1138_v37 = vpack.c.bf16 %v1112_v32, %v1110_v31 }
 0x2d9   : > { %v1139_v38 = vpack.c.bf16 %v1113_v36, %v1111_v35  ;;  %v1053_v41 = vpop.f32.mrb[12].mxu1  ;;  %3712 = vmatpush3.bf16.msra.mxu0 %v4281_v30  ;;  %3776 = vmatpush3.bf16.msra.mxu1 %v4283_v42 }
 0x2da   : > { %v1054_v48 = vadd.f32 %v1053_v41, %v5404_v44  ;;  %v1055_v49 = vpop.f32.mrb[13].mxu1  ;;  %3713 = vmatprep.subr.bf16.mxu0 %v4284_v33  ;;  %3777 = vmatprep.subr.bf16.mxu1 %v4286_v34 }
 0x2db   : > { %v1056_v52 = vadd.f32 %v1055_v49, %v5408_v45  ;;  %v1057_v53 = vpop.f32.mrb[14].mxu1  ;;  %1608 = vmatprep.mubr.bf16.mxu0 %v1139_v38  ;;  %1721 = vmatprep.mubr.bf16.mxu1 %v1139_v38 }
 0x2dc   : > { %v1058_v54 = vadd.f32 %v1057_v53, %v5404_v44  ;;  %v1059_v55 = vpop.f32.mrb[15].mxu1  ;;  %1609 = vmatmul.mubr.bf16.gmra.mrb[24].mxu0 %v1138_v37  ;;  %1722 = vmatmul.mubr.bf16.gmra.mrb[40].mxu1 %v1138_v37  ;;  %v1114_v59 = vmax.f32 %v1054_v48, 0.0 }
 0x2dd   : > { %v1060_v56 = vadd.f32 %v1059_v55, %v5408_v45  ;;  %3714 = vmatpush3.bf16.msra.mxu0 %v4285_v46  ;;  %3778 = vmatpush3.bf16.msra.mxu1 %v4287_v47  ;;  %v1115_v63 = vmax.f32 %v1056_v52, 0.0 }
 0x2de   : > { %v1116_v60 = vmax.f32 %v1058_v54, 0.0  ;;  %3715 = vmatprep.subr.bf16.mxu0 %v4288_v50  ;;  %3779 = vmatprep.subr.bf16.mxu1 %v4290_v51 }
 0x2df   : > { %v1117_v0 = vmax.f32 %v1060_v56, 0.0 }
 0x2e0   : > { %v1140_v1 = vpack.c.bf16 %v1116_v60, %v1114_v59 }
 0x2e1   : > { %v1141_v2 = vpack.c.bf16 %v1117_v0, %v1115_v63  ;;  %v1063_v3 = vpop.f32.mrb[16].mxu1  ;;  %3716 = vmatpush3.bf16.msra.mxu0 %v4289_v57  ;;  %3780 = vmatpush3.bf16.msra.mxu1 %v4291_v58 }
 0x2e2   : > { %v1064_v6 = vadd.f32 %v1063_v3, %v5404_v44  ;;  %v1065_v7 = vpop.f32.mrb[17].mxu1  ;;  %3717 = vmatprep.subr.bf16.mxu0 %v4292_v61  ;;  %3781 = vmatprep.subr.bf16.mxu1 %v4294_v62  ;;  %v4298_v3 = vld [vmem:[#allocation11 + $0xf8] sm:$0xff]  }
 0x2e3   : > { %v1066_v9 = vadd.f32 %v1065_v7, %v5408_v45  ;;  %v1067_v10 = vpop.f32.mrb[18].mxu1  ;;  %1618 = vmatprep.mubr.bf16.mxu0 %v1141_v2  ;;  %1731 = vmatprep.mubr.bf16.mxu1 %v1141_v2  ;;  %v4296_v2 = vld [vmem:[#allocation11 + $0x78] sm:$0xff]   ;;  %v1230_v7 = vsub.s32 3, %v5398_v39 }
 0x2e4   : > { %v1068_v11 = vadd.f32 %v1067_v10, %v5404_v44  ;;  %v1069_v12 = vpop.f32.mrb[19].mxu1  ;;  %1619 = vmatmul.mubr.bf16.gmra.mrb[28].mxu0 %v1140_v1  ;;  %1732 = vmatmul.mubr.bf16.gmra.mrb[44].mxu1 %v1140_v1  ;;  %v1118_v14 = vmax.f32 %v1064_v6, 0.0  ;;  %v1214_v6 = vld [vmem:[#allocation10] sm:$0xf] }
 0x2e5   : > { %v1070_v13 = vadd.f32 %v1069_v12, %v5408_v45  ;;  %3718 = vmatpush3.bf16.msra.mxu0 %v4293_v4  ;;  %3782 = vmatpush3.bf16.msra.mxu1 %v4295_v5  ;;  %v1119_v16 = vmax.f32 %v1066_v9, 0.0  ;;  %v4297_v4 = vld [vmem:[#allocation11 + $0x38] sm:$0xff]   ;;  %v5449_v9 = vrot.slane %v1214_v6, %v901_v40  ;;  %v5457_v12 = vrot.slane %v1214_v6, %v1230_v7 }
 0x2e6   : > { %v1120_v15 = vmax.f32 %v1068_v11, 0.0  ;;  %v4299_v5 = vld [vmem:[#allocation11 + $0xb8] sm:$0xff]   ;;  %3719 = vmatprep.subr.bf16.mxu0 %v4296_v2  ;;  %3783 = vmatprep.subr.bf16.mxu1 %v4298_v3  ;;  %v5455_v11 = vrot.slane %v1214_v6, %v905_v43 }
 0x2e7   : > { %v1121_v8 = vmax.f32 %v1070_v13, 0.0 }
 0x2e8   : > { %v1142_v17 = vpack.c.bf16 %v1120_v15, %v1118_v14 }
 0x2e9   : > { %v1143_v18 = vpack.c.bf16 %v1121_v8, %v1119_v16  ;;  %v1073_v19 = vpop.f32.mrb[20].mxu1  ;;  %3720 = vmatpush3.bf16.msra.mxu0 %v4297_v4  ;;  %3784 = vmatpush3.bf16.msra.mxu1 %v4299_v5 }
 0x2ea   : > { %v1074_v20 = vadd.f32 %v1073_v19, %v5404_v44  ;;  %v1075_v21 = vpop.f32.mrb[21].mxu1 }
 0x2eb   : > { %v1076_v22 = vadd.f32 %v1075_v21, %v5408_v45  ;;  %v1077_v23 = vpop.f32.mrb[22].mxu1  ;;  %1628 = vmatprep.mubr.bf16.mxu0 %v1143_v18  ;;  %1741 = vmatprep.mubr.bf16.mxu1 %v1143_v18 }
 0x2ec   : > { %v1078_v24 = vadd.f32 %v1077_v23, %v5404_v44  ;;  %v1079_v25 = vpop.f32.mrb[23].mxu1  ;;  %1629 = vmatmul.mubr.bf16.gmra.mrb[32].mxu0 %v1142_v17  ;;  %1742 = vmatmul.mubr.bf16.gmra.mrb[48].mxu1 %v1142_v17  ;;  %v1122_v27 = vmax.f32 %v1074_v20, 0.0 }
 0x2ed   : > { %v1080_v26 = vadd.f32 %v1079_v25, %v5408_v45  ;;  %v1123_v29 = vmax.f32 %v1076_v22, 0.0 }
 0x2ee   : > { %v1124_v28 = vmax.f32 %v1078_v24, 0.0 }
 0x2ef   : > { %v1125_v30 = vmax.f32 %v1080_v26, 0.0 }
 0x2f0   : > { %v1144_v42 = vpack.c.bf16 %v1124_v28, %v1122_v27 }
 0x2f1   : > { %v1145_v31 = vpack.c.bf16 %v1125_v30, %v1123_v29  ;;  %v1083_v32 = vpop.f32.mrb[24].mxu1 }
 0x2f2   : > { %v1084_v33 = vadd.f32 %v1083_v32, %v5404_v44  ;;  %v1085_v34 = vpop.f32.mrb[25].mxu1 }
 0x2f3   : > { %v1086_v35 = vadd.f32 %v1085_v34, %v5408_v45  ;;  %v1087_v36 = vpop.f32.mrb[26].mxu1  ;;  %1638 = vmatprep.mubr.bf16.mxu0 %v1145_v31  ;;  %1751 = vmatprep.mubr.bf16.mxu1 %v1145_v31 }
 0x2f4   : > { %v1088_v37 = vadd.f32 %v1087_v36, %v5404_v44  ;;  %v1089_v38 = vpop.f32.mrb[27].mxu1  ;;  %1639 = vmatmul.mubr.bf16.gmra.mrb[36].mxu0 %v1144_v42  ;;  %1752 = vmatmul.mubr.bf16.gmra.mrb[52].mxu1 %v1144_v42  ;;  %v1126_v46 = vmax.f32 %v1084_v33, 0.0 }
 0x2f5   : > { %v1090_v41 = vadd.f32 %v1089_v38, %v5408_v45  ;;  %v1127_v48 = vmax.f32 %v1086_v35, 0.0 }
 0x2f6   : > { %v1128_v47 = vmax.f32 %v1088_v37, 0.0 }
 0x2f7   : > { %v1129_v49 = vmax.f32 %v1090_v41, 0.0 }
 0x2f8   : > { %v1146_v50 = vpack.c.bf16 %v1128_v47, %v1126_v46 }
 0x2f9   : > { %v1147_v51 = vpack.c.bf16 %v1129_v49, %v1127_v48  ;;  %v1093_v52 = vpop.f32.mrb[28].mxu1  ;;  %v4301_v48 = vld [vmem:[%s6022_s12 + $0x8] sm:$0xff]  }
 0x2fa   : > { %v1094_v53 = vadd.f32 %v1093_v52, %v5404_v44  ;;  %v1095_v54 = vpop.f32.mrb[29].mxu1 }
 0x2fb   : > { %v1096_v55 = vadd.f32 %v1095_v54, %v5408_v45  ;;  %v1097_v56 = vpop.f32.mrb[30].mxu1  ;;  %1648 = vmatprep.mubr.bf16.mxu0 %v1147_v51  ;;  %1761 = vmatprep.mubr.bf16.mxu1 %v1147_v51 }
 0x2fc   : > { %v1098_v57 = vadd.f32 %v1097_v56, %v5404_v44  ;;  %v1099_v58 = vpop.f32.mrb[31].mxu1  ;;  %1649 = vmatmul.mubr.bf16.gmra.mrb[40].mxu0 %v1146_v50  ;;  %1762 = vmatmul.mubr.bf16.gmra.mrb[56].mxu1 %v1146_v50  ;;  %v1130_v60 = vmax.f32 %v1094_v53, 0.0  ;;  %v4300_v44 = vld [vmem:[%s6022_s12] sm:$0xff]  }
 0x2fd   : > { %v1100_v59 = vadd.f32 %v1099_v58, %v5408_v45  ;;  %v1131_v62 = vmax.f32 %v1096_v55, 0.0  ;;  %3901 = vmatprep.subr.bf16.mxu0 %v4300_v44  ;;  %v1226_v45 = vsub.s32 2, %v5398_v39 }
 0x2fe   : > { %v1132_v61 = vmax.f32 %v1098_v57, 0.0 }
 0x2ff   : > { %v1133_v63 = vmax.f32 %v1100_v59, 0.0  ;;  %v5451_v10 = vrot.slane %v1214_v6, %v1226_v45 }
 0x300   : > { %v1148_v0 = vpack.c.bf16 %v1132_v61, %v1130_v60 }
 0x301   : > { %v1149_v1 = vpack.c.bf16 %v1133_v63, %v1131_v62  ;;  %v4302_v63 = vld [vmem:[%s6022_s12 + $0x10] sm:$0xff]  }
 0x303   : > { %1658 = vmatprep.mubr.bf16.mxu0 %v1149_v1  ;;  %1771 = vmatprep.mubr.bf16.mxu1 %v1149_v1 }
 0x304   : > { %1659 = vmatmul.mubr.bf16.gmra.mrb[44].mxu0 %v1148_v0  ;;  %1772 = vmatmul.mubr.bf16.gmra.mrb[60].mxu1 %v1148_v0 }
 0x39f   : > { %v1590_v13 = vpop.f32.mrb[16].mxu0  ;;  %v1703_v14 = vpop.f32.mrb[32].mxu1 }
 0x3a0   : > { %v1591_v15 = vadd.f32 %v1590_v13, %v5449_v9  ;;  %v1704_v16 = vadd.f32 %v1703_v14, %v5451_v10  ;;  %v1592_v8 = vpop.f32.mrb[17].mxu0  ;;  %v1705_v17 = vpop.f32.mrb[33].mxu1 }
 0x3a1   : > { %v1593_v18 = vadd.f32 %v1592_v8, %v5455_v11  ;;  %v1706_v40 = vadd.f32 %v1705_v17, %v5457_v12  ;;  %v1594_v19 = vpop.f32.mrb[18].mxu0  ;;  %v1707_v20 = vpop.f32.mrb[34].mxu1  ;;  %v4303_v8 = vld [vmem:[%s6022_s12 + $0x18] sm:$0xff]  }
 0x3a2   : > { %v1595_v39 = vadd.f32 %v1594_v19, %v5449_v9  ;;  %v1708_v43 = vadd.f32 %v1707_v20, %v5451_v10  ;;  %v1596_v21 = vpop.f32.mrb[19].mxu0  ;;  %v1709_v22 = vpop.f32.mrb[35].mxu1  ;;  %v1782_v25 = vmax.f32 %v1591_v15, 0.0  ;;  %v1784_v26 = vmax.f32 %v1704_v16, 0.0 }
 0x3a3   : > { %v1597_v23 = vadd.f32 %v1596_v21, %v5455_v11  ;;  %v1710_v24 = vadd.f32 %v1709_v22, %v5457_v12  ;;  %v1783_v29 = vmax.f32 %v1593_v18, 0.0  ;;  %v1785_v30 = vmax.f32 %v1706_v40, 0.0 }
 0x3a4   : > { %v1786_v27 = vmax.f32 %v1595_v39, 0.0  ;;  %v1788_v28 = vmax.f32 %v1708_v43, 0.0 }
 0x3a5   : > { %v1787_v42 = vmax.f32 %v1597_v23, 0.0  ;;  %v1789_v31 = vmax.f32 %v1710_v24, 0.0 }
 0x3a6   : > { %v1846_v32 = vpack.c.bf16 %v1786_v27, %v1782_v25  ;;  %v1848_v33 = vpack.c.bf16 %v1788_v28, %v1784_v26 }
 0x3a7   : > { %v1847_v34 = vpack.c.bf16 %v1787_v42, %v1783_v29  ;;  %v1849_v35 = vpack.c.bf16 %v1789_v31, %v1785_v30  ;;  %v1600_v36 = vpop.f32.mrb[20].mxu0  ;;  %v1713_v37 = vpop.f32.mrb[36].mxu1 }
 0x3a8   : > { %v1601_v38 = vadd.f32 %v1600_v36, %v5449_v9  ;;  %v1714_v41 = vadd.f32 %v1713_v37, %v5451_v10  ;;  %v1602_v46 = vpop.f32.mrb[21].mxu0  ;;  %v1715_v47 = vpop.f32.mrb[37].mxu1 }
 0x3a9   : > { %v1603_v49 = vadd.f32 %v1602_v46, %v5455_v11  ;;  %v1716_v50 = vadd.f32 %v1715_v47, %v5457_v12  ;;  %v1604_v51 = vpop.f32.mrb[22].mxu0  ;;  %v1717_v52 = vpop.f32.mrb[38].mxu1  ;;  %2173 = vmatprep.mubr.bf16.mxu0 %v1847_v34  ;;  %2270 = vmatprep.mubr.bf16.mxu1 %v1849_v35 }
 0x3aa   : > { %v1605_v53 = vadd.f32 %v1604_v51, %v5449_v9  ;;  %v1718_v54 = vadd.f32 %v1717_v52, %v5451_v10  ;;  %v1606_v55 = vpop.f32.mrb[23].mxu0  ;;  %v1719_v56 = vpop.f32.mrb[39].mxu1  ;;  %2174 = vmatmul.mubr.bf16.vlgmr.msra.gmra.mrb[48].mxu0 %v1846_v32  ;;  %2271 = vmatmul.mubr.bf16.vlgmr.msra.gmra.mrb[64].mxu1 %v1848_v33  ;;  %v1790_v59 = vmax.f32 %v1601_v38, 0.0  ;;  %v1792_v60 = vmax.f32 %v1714_v41, 0.0 }
 0x3ab   : > { %v1607_v57 = vadd.f32 %v1606_v55, %v5455_v11  ;;  %v1720_v58 = vadd.f32 %v1719_v56, %v5457_v12  ;;  %3902 = vmatpush3.bf16.msra.mxu0 %v4300_v44  ;;  %v1791_v0 = vmax.f32 %v1603_v49, 0.0  ;;  %v1793_v1 = vmax.f32 %v1716_v50, 0.0 }
 0x3ac   : > { %v1794_v61 = vmax.f32 %v1605_v53, 0.0  ;;  %v1796_v62 = vmax.f32 %v1718_v54, 0.0  ;;  %3903 = vmatprep.subr.bf16.mxu0 %v4301_v48 }
 0x3ad   : > { %v1795_v2 = vmax.f32 %v1607_v57, 0.0  ;;  %v1797_v3 = vmax.f32 %v1720_v58, 0.0 }
 0x3ae   : > { %v1850_v4 = vpack.c.bf16 %v1794_v61, %v1790_v59  ;;  %v1852_v5 = vpack.c.bf16 %v1796_v62, %v1792_v60 }
 0x3af   : > { %v1851_v45 = vpack.c.bf16 %v1795_v2, %v1791_v0  ;;  %v1853_v6 = vpack.c.bf16 %v1797_v3, %v1793_v1  ;;  %v1610_v7 = vpop.f32.mrb[24].mxu0  ;;  %v1723_v13 = vpop.f32.mrb[40].mxu1  ;;  %3904 = vmatpush3.bf16.msra.mxu0 %v4301_v48 }
 0x3b0   : > { %v1611_v44 = vadd.f32 %v1610_v7, %v5449_v9  ;;  %v1724_v14 = vadd.f32 %v1723_v13, %v5451_v10  ;;  %v1612_v15 = vpop.f32.mrb[25].mxu0  ;;  %v1725_v16 = vpop.f32.mrb[41].mxu1  ;;  %3905 = vmatprep.subr.bf16.mxu0 %v4302_v63 }
 0x3b1   : > { %v1613_v17 = vadd.f32 %v1612_v15, %v5455_v11  ;;  %v1726_v18 = vadd.f32 %v1725_v16, %v5457_v12  ;;  %v1614_v40 = vpop.f32.mrb[26].mxu0  ;;  %v1727_v19 = vpop.f32.mrb[42].mxu1  ;;  %2181 = vmatprep.mubr.bf16.mxu0 %v1851_v45  ;;  %2278 = vmatprep.mubr.bf16.mxu1 %v1853_v6 }
 0x3b2   : > { %v1615_v20 = vadd.f32 %v1614_v40, %v5449_v9  ;;  %v1728_v39 = vadd.f32 %v1727_v19, %v5451_v10  ;;  %v1616_v43 = vpop.f32.mrb[27].mxu0  ;;  %v1729_v21 = vpop.f32.mrb[43].mxu1  ;;  %2182 = vmatmul.mubr.bf16.gmra.mrb[52].mxu0 %v1850_v4  ;;  %2279 = vmatmul.mubr.bf16.gmra.mrb[68].mxu1 %v1852_v5  ;;  %v1798_v24 = vmax.f32 %v1611_v44, 0.0  ;;  %v1800_v25 = vmax.f32 %v1724_v14, 0.0 }
 0x3b3   : > { %v1617_v22 = vadd.f32 %v1616_v43, %v5455_v11  ;;  %v1730_v23 = vadd.f32 %v1729_v21, %v5457_v12  ;;  %3906 = vmatpush3.bf16.msra.mxu0 %v4302_v63  ;;  %v1799_v28 = vmax.f32 %v1613_v17, 0.0  ;;  %v1801_v29 = vmax.f32 %v1726_v18, 0.0 }
 0x3b4   : > { %v1802_v26 = vmax.f32 %v1615_v20, 0.0  ;;  %v1804_v27 = vmax.f32 %v1728_v39, 0.0  ;;  %3907 = vmatprep.subr.bf16.mxu0 %v4303_v8 }
 0x3b5   : > { %v1803_v30 = vmax.f32 %v1617_v22, 0.0  ;;  %v1805_v42 = vmax.f32 %v1730_v23, 0.0 }
 0x3b6   : > { %v1854_v31 = vpack.c.bf16 %v1802_v26, %v1798_v24  ;;  %v1856_v32 = vpack.c.bf16 %v1804_v27, %v1800_v25 }
 0x3b7   : > { %v1855_v33 = vpack.c.bf16 %v1803_v30, %v1799_v28  ;;  %v1857_v34 = vpack.c.bf16 %v1805_v42, %v1801_v29  ;;  %v1620_v35 = vpop.f32.mrb[28].mxu0  ;;  %v1733_v36 = vpop.f32.mrb[44].mxu1  ;;  %3908 = vmatpush3.bf16.msra.mxu0 %v4303_v8 }
 0x3b8   : > { %v1621_v37 = vadd.f32 %v1620_v35, %v5449_v9  ;;  %v1734_v38 = vadd.f32 %v1733_v36, %v5451_v10  ;;  %v1622_v41 = vpop.f32.mrb[29].mxu0  ;;  %v1735_v46 = vpop.f32.mrb[45].mxu1 }
 0x3b9   : > { %v1623_v47 = vadd.f32 %v1622_v41, %v5455_v11  ;;  %v1736_v48 = vadd.f32 %v1735_v46, %v5457_v12  ;;  %v1624_v49 = vpop.f32.mrb[30].mxu0  ;;  %v1737_v50 = vpop.f32.mrb[46].mxu1  ;;  %2189 = vmatprep.mubr.bf16.mxu0 %v1855_v33  ;;  %2286 = vmatprep.mubr.bf16.mxu1 %v1857_v34 }
 0x3ba   : > { %v1625_v51 = vadd.f32 %v1624_v49, %v5449_v9  ;;  %v1738_v52 = vadd.f32 %v1737_v50, %v5451_v10  ;;  %v1626_v53 = vpop.f32.mrb[31].mxu0  ;;  %v1739_v54 = vpop.f32.mrb[47].mxu1  ;;  %2190 = vmatmul.mubr.bf16.gmra.mrb[56].mxu0 %v1854_v31  ;;  %2287 = vmatmul.mubr.bf16.gmra.mrb[72].mxu1 %v1856_v32  ;;  %v1806_v57 = vmax.f32 %v1621_v37, 0.0  ;;  %v1808_v58 = vmax.f32 %v1734_v38, 0.0 }
 0x3bb   : > { %v1627_v55 = vadd.f32 %v1626_v53, %v5455_v11  ;;  %v1740_v56 = vadd.f32 %v1739_v54, %v5457_v12  ;;  %v1807_v61 = vmax.f32 %v1623_v47, 0.0  ;;  %v1809_v62 = vmax.f32 %v1736_v48, 0.0 }
 0x3bc   : > { %v1810_v59 = vmax.f32 %v1625_v51, 0.0  ;;  %v1812_v60 = vmax.f32 %v1738_v52, 0.0 }
 0x3bd   : > { %v1811_v63 = vmax.f32 %v1627_v55, 0.0  ;;  %v1813_v0 = vmax.f32 %v1740_v56, 0.0 }
 0x3be   : > { %v1858_v1 = vpack.c.bf16 %v1810_v59, %v1806_v57  ;;  %v1860_v2 = vpack.c.bf16 %v1812_v60, %v1808_v58 }
 0x3bf   : > { %v1859_v3 = vpack.c.bf16 %v1811_v63, %v1807_v61  ;;  %v1861_v4 = vpack.c.bf16 %v1813_v0, %v1809_v62  ;;  %v1630_v5 = vpop.f32.mrb[32].mxu0  ;;  %v1743_v45 = vpop.f32.mrb[48].mxu1 }
 0x3c0   : > { %v1631_v6 = vadd.f32 %v1630_v5, %v5449_v9  ;;  %v1744_v7 = vadd.f32 %v1743_v45, %v5451_v10  ;;  %v1632_v13 = vpop.f32.mrb[33].mxu0  ;;  %v1745_v44 = vpop.f32.mrb[49].mxu1 }
 0x3c1   : > { %v1633_v14 = vadd.f32 %v1632_v13, %v5455_v11  ;;  %v1746_v15 = vadd.f32 %v1745_v44, %v5457_v12  ;;  %v1634_v16 = vpop.f32.mrb[34].mxu0  ;;  %v1747_v8 = vpop.f32.mrb[50].mxu1  ;;  %2197 = vmatprep.mubr.bf16.mxu0 %v1859_v3  ;;  %2294 = vmatprep.mubr.bf16.mxu1 %v1861_v4 }
 0x3c2   : > { %v1635_v17 = vadd.f32 %v1634_v16, %v5449_v9  ;;  %v1748_v18 = vadd.f32 %v1747_v8, %v5451_v10  ;;  %v1636_v40 = vpop.f32.mrb[35].mxu0  ;;  %v1749_v19 = vpop.f32.mrb[51].mxu1  ;;  %2198 = vmatmul.mubr.bf16.gmra.mrb[60].mxu0 %v1858_v1  ;;  %2295 = vmatmul.mubr.bf16.gmra.mrb[76].mxu1 %v1860_v2  ;;  %v1814_v43 = vmax.f32 %v1631_v6, 0.0  ;;  %v1816_v21 = vmax.f32 %v1744_v7, 0.0 }
 0x3c3   : > { %v1637_v20 = vadd.f32 %v1636_v40, %v5455_v11  ;;  %v1750_v39 = vadd.f32 %v1749_v19, %v5457_v12  ;;  %v1815_v24 = vmax.f32 %v1633_v14, 0.0  ;;  %v1817_v25 = vmax.f32 %v1746_v15, 0.0 }
 0x3c4   : > { %v1818_v22 = vmax.f32 %v1635_v17, 0.0  ;;  %v1820_v23 = vmax.f32 %v1748_v18, 0.0 }
 0x3c5   : > { %v1819_v26 = vmax.f32 %v1637_v20, 0.0  ;;  %v1821_v27 = vmax.f32 %v1750_v39, 0.0 }
 0x3c6   : > { %v1862_v28 = vpack.c.bf16 %v1818_v22, %v1814_v43  ;;  %v1864_v29 = vpack.c.bf16 %v1820_v23, %v1816_v21 }
 0x3c7   : > { %v1863_v30 = vpack.c.bf16 %v1819_v26, %v1815_v24  ;;  %v1865_v42 = vpack.c.bf16 %v1821_v27, %v1817_v25  ;;  %v1640_v31 = vpop.f32.mrb[36].mxu0  ;;  %v1753_v32 = vpop.f32.mrb[52].mxu1 }
 0x3c8   : > { %v1641_v33 = vadd.f32 %v1640_v31, %v5449_v9  ;;  %v1754_v34 = vadd.f32 %v1753_v32, %v5451_v10  ;;  %v1642_v35 = vpop.f32.mrb[37].mxu0  ;;  %v1755_v36 = vpop.f32.mrb[53].mxu1 }
 0x3c9   : > { %v1643_v37 = vadd.f32 %v1642_v35, %v5455_v11  ;;  %v1756_v38 = vadd.f32 %v1755_v36, %v5457_v12  ;;  %v1644_v41 = vpop.f32.mrb[38].mxu0  ;;  %v1757_v46 = vpop.f32.mrb[54].mxu1  ;;  %2205 = vmatprep.mubr.bf16.mxu0 %v1863_v30  ;;  %2302 = vmatprep.mubr.bf16.mxu1 %v1865_v42 }
 0x3ca   : > { %v1645_v47 = vadd.f32 %v1644_v41, %v5449_v9  ;;  %v1758_v48 = vadd.f32 %v1757_v46, %v5451_v10  ;;  %v1646_v49 = vpop.f32.mrb[39].mxu0  ;;  %v1759_v50 = vpop.f32.mrb[55].mxu1  ;;  %2206 = vmatmul.mubr.bf16.gmra.mrb[64].mxu0 %v1862_v28  ;;  %2303 = vmatmul.mubr.bf16.gmra.mrb[80].mxu1 %v1864_v29  ;;  %v1822_v53 = vmax.f32 %v1641_v33, 0.0  ;;  %v1824_v54 = vmax.f32 %v1754_v34, 0.0 }
 0x3cb   : > { %v1647_v51 = vadd.f32 %v1646_v49, %v5455_v11  ;;  %v1760_v52 = vadd.f32 %v1759_v50, %v5457_v12  ;;  %v1823_v57 = vmax.f32 %v1643_v37, 0.0  ;;  %v1825_v58 = vmax.f32 %v1756_v38, 0.0 }
 0x3cc   : > { %v1826_v55 = vmax.f32 %v1645_v47, 0.0  ;;  %v1828_v56 = vmax.f32 %v1758_v48, 0.0 }
 0x3cd   : > { %v1827_v59 = vmax.f32 %v1647_v51, 0.0  ;;  %v1829_v60 = vmax.f32 %v1760_v52, 0.0 }
 0x3ce   : > { %v1866_v61 = vpack.c.bf16 %v1826_v55, %v1822_v53  ;;  %v1868_v62 = vpack.c.bf16 %v1828_v56, %v1824_v54 }
 0x3cf   : > { %v1867_v63 = vpack.c.bf16 %v1827_v59, %v1823_v57  ;;  %v1869_v0 = vpack.c.bf16 %v1829_v60, %v1825_v58  ;;  %v1650_v1 = vpop.f32.mrb[40].mxu0  ;;  %v1763_v2 = vpop.f32.mrb[56].mxu1  ;;  %v4306_v59 = vld [vmem:[%s6022_s12 + $0x30] sm:$0xff]   ;;  %v4307_v60 = vld [vmem:[%s6022_s12 + $0x38] sm:$0xff]  }
 0x3d0   : > { %v1651_v3 = vadd.f32 %v1650_v1, %v5449_v9  ;;  %v1764_v4 = vadd.f32 %v1763_v2, %v5451_v10  ;;  %v1652_v5 = vpop.f32.mrb[41].mxu0  ;;  %v1765_v45 = vpop.f32.mrb[57].mxu1 }
 0x3d1   : > { %v1653_v6 = vadd.f32 %v1652_v5, %v5455_v11  ;;  %v1766_v7 = vadd.f32 %v1765_v45, %v5457_v12  ;;  %v1654_v13 = vpop.f32.mrb[42].mxu0  ;;  %v1767_v44 = vpop.f32.mrb[58].mxu1  ;;  %2213 = vmatprep.mubr.bf16.mxu0 %v1867_v63  ;;  %2310 = vmatprep.mubr.bf16.mxu1 %v1869_v0  ;;  %v4310_v63 = vld [vmem:[%s6023_s22 + $0x10] sm:$0xff]   ;;  %v4311_v0 = vld [vmem:[%s6023_s22 + $0x18] sm:$0xff]  }
 0x3d2   : > { %v1655_v14 = vadd.f32 %v1654_v13, %v5449_v9  ;;  %v1768_v15 = vadd.f32 %v1767_v44, %v5451_v10  ;;  %v1656_v16 = vpop.f32.mrb[43].mxu0  ;;  %v1769_v8 = vpop.f32.mrb[59].mxu1  ;;  %2214 = vmatmul.mubr.bf16.gmra.mrb[68].mxu0 %v1866_v61  ;;  %2311 = vmatmul.mubr.bf16.gmra.mrb[84].mxu1 %v1868_v62  ;;  %v1830_v40 = vmax.f32 %v1651_v3, 0.0  ;;  %v1832_v19 = vmax.f32 %v1764_v4, 0.0  ;;  %v4308_v61 = vld [vmem:[%s6023_s22] sm:$0xff]   ;;  %v4309_v62 = vld [vmem:[%s6023_s22 + $0x8] sm:$0xff]  }
 0x3d3   : > { %v1657_v17 = vadd.f32 %v1656_v16, %v5455_v11  ;;  %v1770_v18 = vadd.f32 %v1769_v8, %v5457_v12  ;;  %v1831_v43 = vmax.f32 %v1653_v6, 0.0  ;;  %v1833_v21 = vmax.f32 %v1766_v7, 0.0  ;;  %3933 = vmatprep.subr.bf16.mxu1 %v4308_v61  ;;  %v5556_v3 = vld [vmem:[#allocation13] ss:$0 sm:$0xff] }
 0x3d4   : > { %v1834_v20 = vmax.f32 %v1655_v14, 0.0  ;;  %v1836_v39 = vmax.f32 %v1768_v15, 0.0  ;;  %3934 = vmatpush3.bf16.msra.mxu1 %v4308_v61 }
 0x3d5   : > { %v1835_v22 = vmax.f32 %v1657_v17, 0.0  ;;  %v1837_v23 = vmax.f32 %v1770_v18, 0.0  ;;  %3935 = vmatprep.subr.bf16.mxu1 %v4309_v62 }
 0x3d6   : > { %v1870_v24 = vpack.c.bf16 %v1834_v20, %v1830_v40  ;;  %v1872_v25 = vpack.c.bf16 %v1836_v39, %v1832_v19  ;;  %v2351_v40 = vld [vmem:[%s5124_s18] sm:$0xff]  ;;  %v2352_v19 = vld [vmem:[%s5124_s18 + $0x8] sm:$0xff] }
 0x3d7   : > { %v1871_v26 = vpack.c.bf16 %v1835_v22, %v1831_v43  ;;  %v1873_v27 = vpack.c.bf16 %v1837_v23, %v1833_v21  ;;  %v1660_v28 = vpop.f32.mrb[44].mxu0  ;;  %v1773_v29 = vpop.f32.mrb[60].mxu1 }
 0x3d8   : > { %v1661_v30 = vadd.f32 %v1660_v28, %v5449_v9  ;;  %v1774_v42 = vadd.f32 %v1773_v29, %v5451_v10  ;;  %v1662_v31 = vpop.f32.mrb[45].mxu0  ;;  %v1775_v32 = vpop.f32.mrb[61].mxu1  ;;  %3936 = vmatpush3.bf16.msra.mxu1 %v4309_v62 }
 0x3d9   : > { %v1663_v33 = vadd.f32 %v1662_v31, %v5455_v11  ;;  %v1776_v34 = vadd.f32 %v1775_v32, %v5457_v12  ;;  %v1664_v35 = vpop.f32.mrb[46].mxu0  ;;  %v1777_v36 = vpop.f32.mrb[62].mxu1  ;;  %2221 = vmatprep.mubr.bf16.mxu0 %v1871_v26  ;;  %2318 = vmatprep.mubr.bf16.mxu1 %v1873_v27 }
 0x3da   : > { %v1665_v37 = vadd.f32 %v1664_v35, %v5449_v9  ;;  %v1778_v38 = vadd.f32 %v1777_v36, %v5451_v10  ;;  %v1666_v41 = vpop.f32.mrb[47].mxu0  ;;  %v1779_v46 = vpop.f32.mrb[63].mxu1  ;;  %2222 = vmatmul.mubr.bf16.gmra.mrb[72].mxu0 %v1870_v24  ;;  %2319 = vmatmul.mubr.bf16.gmra.mrb[88].mxu1 %v1872_v25  ;;  %v1838_v49 = vmax.f32 %v1661_v30, 0.0  ;;  %v1840_v50 = vmax.f32 %v1774_v42, 0.0  ;;  %v2353_v36 = vld [vmem:[%s5124_s18 + $0x10] sm:$0xff] }
 0x3db   : > { %v1667_v47 = vadd.f32 %v1666_v41, %v5455_v11  ;;  %v1780_v48 = vadd.f32 %v1779_v46, %v5457_v12  ;;  %v1839_v53 = vmax.f32 %v1663_v33, 0.0  ;;  %v1841_v54 = vmax.f32 %v1776_v34, 0.0  ;;  %v4304_v11 = vld [vmem:[%s6022_s12 + $0x20] sm:$0xff]   ;;  %v4305_v12 = vld [vmem:[%s6022_s12 + $0x28] sm:$0xff]   ;;  %3937 = vmatprep.subr.bf16.mxu1 %v4310_v63 }
 0x3dc   : > { %v1842_v51 = vmax.f32 %v1665_v37, 0.0  ;;  %v1844_v52 = vmax.f32 %v1778_v38, 0.0  ;;  %3909 = vmatprep.subr.bf16.mxu0 %v4304_v11  ;;  %3938 = vmatpush3.bf16.msra.mxu1 %v4310_v63  ;;  %v2354_v37 = vld [vmem:[%s5124_s18 + $0x18] sm:$0xff] }
 0x3dd   : > { %v1843_v55 = vmax.f32 %v1667_v47, 0.0  ;;  %v1845_v56 = vmax.f32 %v1780_v48, 0.0  ;;  %3910 = vmatpush3.bf16.msra.mxu0 %v4304_v11  ;;  %3939 = vmatprep.subr.bf16.mxu1 %v4311_v0 }
 0x3de   : > { %v1874_v57 = vpack.c.bf16 %v1842_v51, %v1838_v49  ;;  %v1876_v9 = vpack.c.bf16 %v1844_v52, %v1840_v50  ;;  %3911 = vmatprep.subr.bf16.mxu0 %v4305_v12 }
 0x3df   : > { %v1875_v58 = vpack.c.bf16 %v1843_v55, %v1839_v53  ;;  %v1877_v10 = vpack.c.bf16 %v1845_v56, %v1841_v54 }
 0x3e0   : > { %3940 = vmatpush3.bf16.msra.mxu1 %v4311_v0 }
 0x3e1   : > { %2229 = vmatprep.mubr.bf16.mxu0 %v1875_v58  ;;  %2326 = vmatprep.mubr.bf16.mxu1 %v1877_v10 }
 0x3e2   : > { %2230 = vmatmul.mubr.bf16.gmra.mrb[76].mxu0 %v1874_v57  ;;  %2327 = vmatmul.mubr.bf16.gmra.mrb[92].mxu1 %v1876_v9 }
 0x3e3   : > { %3912 = vmatpush3.bf16.msra.mxu0 %v4305_v12 }
 0x3e4   : > { %3913 = vmatprep.subr.bf16.mxu0 %v4306_v59 }
 0x3e7   : > { %3914 = vmatpush3.bf16.msra.mxu0 %v4306_v59  ;;  %v2355_v59 = vld [vmem:[%s5124_s18 + $0x20] sm:$0xff] }
 0x3e8   : > { %3915 = vmatprep.subr.bf16.mxu0 %v4307_v60 }
 0x3eb   : > { %3916 = vmatpush3.bf16.msra.mxu0 %v4307_v60  ;;  %v2356_v60 = vld [vmem:[%s5124_s18 + $0x28] sm:$0xff] }
 0x47d   : > { %v3721_v1 = vpop.f32.mrb[48].mxu0  ;;  %v3785_v2 = vpop.f32.mrb[64].mxu1 }
 0x47e   : > { %v3722_v4 = vpop.f32.mrb[49].mxu0  ;;  %v3786_v5 = vpop.f32.mrb[65].mxu1 }
 0x47f   : > { %v3723_v45 = vadd.f32 %v3722_v4, %v3721_v1  ;;  %v3787_v6 = vadd.f32 %v3786_v5, %v3785_v2  ;;  %v3724_v7 = vpop.f32.mrb[50].mxu0  ;;  %v3788_v13 = vpop.f32.mrb[66].mxu1 }
 0x480   : > { %v3725_v44 = vpop.f32.mrb[51].mxu0  ;;  %v3789_v14 = vpop.f32.mrb[67].mxu1 }
 0x481   : > { %v2176_v15 = vadd.f32 %v3723_v45, %v5556_v3  ;;  %v3726_v16 = vadd.f32 %v3725_v44, %v3724_v7  ;;  %v3790_v8 = vadd.f32 %v3789_v14, %v3788_v13 }
 0x483   : > { %v2273_v17 = vadd.f32 %v3787_v6, %v2176_v15  ;;  %v2179_v18 = vadd.f32 %v3726_v16, %v5556_v3 }
 0x485   : > { %2335 = vst [vmem:[%s5564_s16] sm:$0xff] %v2273_v17  ;;  %v2276_v20 = vadd.f32 %v3790_v8, %v2179_v18  ;;  %v3727_v39 = vpop.f32.mrb[52].mxu0  ;;  %v3791_v43 = vpop.f32.mrb[68].mxu1  ;;  %v2367_v23 = vadd.f32 %v2351_v40, %v2273_v17  ;;  %v2357_v40 = vld [vmem:[%s5124_s18 + $0x30] sm:$0xff] }
 0x486   : > { %v3728_v21 = vpop.f32.mrb[53].mxu0  ;;  %v3792_v22 = vpop.f32.mrb[69].mxu1 }
 0x487   : > { %2336 = vst [vmem:[%s5564_s16 + $0x8] sm:$0xff] %v2276_v20  ;;  %v2368_v24 = vadd.f32 %v2352_v19, %v2276_v20  ;;  %v3729_v25 = vadd.f32 %v3728_v21, %v3727_v39  ;;  %v3793_v26 = vadd.f32 %v3792_v22, %v3791_v43  ;;  %v3730_v27 = vpop.f32.mrb[54].mxu0  ;;  %v3794_v28 = vpop.f32.mrb[70].mxu1  ;;  %v2358_v19 = vld [vmem:[%s5124_s18 + $0x38] sm:$0xff] }
 0x488   : > { %v3731_v29 = vpop.f32.mrb[55].mxu0  ;;  %v3795_v30 = vpop.f32.mrb[71].mxu1 }
 0x489   : > { %v2184_v42 = vadd.f32 %v3729_v25, %v5556_v3  ;;  %v3732_v31 = vadd.f32 %v3731_v29, %v3730_v27  ;;  %v3796_v32 = vadd.f32 %v3795_v30, %v3794_v28  ;;  %v2383_v33 = vpack.c.bf16 %v2368_v24, %v2367_v23 }
 0x48b   : > { %v2281_v34 = vadd.f32 %v3793_v26, %v2184_v42  ;;  %v2187_v35 = vadd.f32 %v3732_v31, %v5556_v3  ;;  %3917 = vmatprep.mubr.bf16.mxu0 %v2383_v33 }
 0x48d   : > { %2337 = vst [vmem:[%s5564_s16 + $0x10] sm:$0xff] %v2281_v34  ;;  %v2284_v38 = vadd.f32 %v3796_v32, %v2187_v35  ;;  %v3733_v41 = vpop.f32.mrb[56].mxu0  ;;  %v3797_v46 = vpop.f32.mrb[72].mxu1  ;;  %v2369_v49 = vadd.f32 %v2353_v36, %v2281_v34  ;;  %v2359_v36 = vld [vmem:[%s5124_s18 + $0x40] sm:$0xff] }
 0x48e   : > { %v3734_v47 = vpop.f32.mrb[57].mxu0  ;;  %v3798_v48 = vpop.f32.mrb[73].mxu1 }
 0x48f   : > { %2338 = vst [vmem:[%s5564_s16 + $0x18] sm:$0xff] %v2284_v38  ;;  %v2370_v50 = vadd.f32 %v2354_v37, %v2284_v38  ;;  %v3735_v51 = vadd.f32 %v3734_v47, %v3733_v41  ;;  %v3799_v52 = vadd.f32 %v3798_v48, %v3797_v46  ;;  %v3736_v53 = vpop.f32.mrb[58].mxu0  ;;  %v3800_v54 = vpop.f32.mrb[74].mxu1  ;;  %v2360_v37 = vld [vmem:[%s5124_s18 + $0x48] sm:$0xff] }
 0x490   : > { %v3737_v55 = vpop.f32.mrb[59].mxu0  ;;  %v3801_v56 = vpop.f32.mrb[75].mxu1 }
 0x491   : > { %v2384_v57 = vpack.c.bf16 %v2370_v50, %v2369_v49  ;;  %v2192_v9 = vadd.f32 %v3735_v51, %v5556_v3  ;;  %v3738_v58 = vadd.f32 %v3737_v55, %v3736_v53  ;;  %v3802_v10 = vadd.f32 %v3801_v56, %v3800_v54 }
 0x493   : > { %v2289_v11 = vadd.f32 %v3799_v52, %v2192_v9  ;;  %v2195_v12 = vadd.f32 %v3738_v58, %v5556_v3  ;;  %3918 = vmatmul.mubr.bf16.vlgmr.msra.gmra.mrb[80].mxu0 %v2384_v57 }
 0x495   : > { %2339 = vst [vmem:[%s5564_s16 + $0x20] sm:$0xff] %v2289_v11  ;;  %v2292_v61 = vadd.f32 %v3802_v10, %v2195_v12  ;;  %v3739_v62 = vpop.f32.mrb[60].mxu0  ;;  %v3803_v63 = vpop.f32.mrb[76].mxu1  ;;  %v2371_v2 = vadd.f32 %v2355_v59, %v2289_v11  ;;  %v2361_v59 = vld [vmem:[%s5124_s18 + $0x50] sm:$0xff] }
 0x496   : > { %v3740_v0 = vpop.f32.mrb[61].mxu0  ;;  %v3804_v1 = vpop.f32.mrb[77].mxu1 }
 0x497   : > { %2340 = vst [vmem:[%s5564_s16 + $0x28] sm:$0xff] %v2292_v61  ;;  %v2372_v4 = vadd.f32 %v2356_v60, %v2292_v61  ;;  %v3741_v5 = vadd.f32 %v3740_v0, %v3739_v62  ;;  %v3805_v45 = vadd.f32 %v3804_v1, %v3803_v63  ;;  %v3742_v6 = vpop.f32.mrb[62].mxu0  ;;  %v3806_v7 = vpop.f32.mrb[78].mxu1  ;;  %v2362_v60 = vld [vmem:[%s5124_s18 + $0x58] sm:$0xff] }
 0x498   : > { %v3743_v13 = vpop.f32.mrb[63].mxu0  ;;  %v3807_v44 = vpop.f32.mrb[79].mxu1 }
 0x499   : > { %v2200_v14 = vadd.f32 %v3741_v5, %v5556_v3  ;;  %v3744_v15 = vadd.f32 %v3743_v13, %v3742_v6  ;;  %v3808_v16 = vadd.f32 %v3807_v44, %v3806_v7  ;;  %v2385_v8 = vpack.c.bf16 %v2372_v4, %v2371_v2 }
 0x49b   : > { %v2297_v17 = vadd.f32 %v3805_v45, %v2200_v14  ;;  %v2203_v18 = vadd.f32 %v3744_v15, %v5556_v3  ;;  %3921 = vmatprep.mubr.bf16.mxu0 %v2385_v8 }
 0x49d   : > { %2341 = vst [vmem:[%s5564_s16 + $0x30] sm:$0xff] %v2297_v17  ;;  %v2300_v20 = vadd.f32 %v3808_v16, %v2203_v18  ;;  %v3745_v39 = vpop.f32.mrb[64].mxu0  ;;  %v3809_v43 = vpop.f32.mrb[80].mxu1  ;;  %v2373_v23 = vadd.f32 %v2357_v40, %v2297_v17  ;;  %v2363_v40 = vld [vmem:[%s5124_s18 + $0x60] sm:$0xff] }
 0x49e   : > { %v3746_v21 = vpop.f32.mrb[65].mxu0  ;;  %v3810_v22 = vpop.f32.mrb[81].mxu1 }
 0x49f   : > { %2342 = vst [vmem:[%s5564_s16 + $0x38] sm:$0xff] %v2300_v20  ;;  %v2374_v24 = vadd.f32 %v2358_v19, %v2300_v20  ;;  %v3747_v25 = vadd.f32 %v3746_v21, %v3745_v39  ;;  %v3811_v26 = vadd.f32 %v3810_v22, %v3809_v43  ;;  %v3748_v27 = vpop.f32.mrb[66].mxu0  ;;  %v3812_v28 = vpop.f32.mrb[82].mxu1  ;;  %v2364_v19 = vld [vmem:[%s5124_s18 + $0x68] sm:$0xff] }
 0x4a0   : > { %v3749_v29 = vpop.f32.mrb[67].mxu0  ;;  %v3813_v30 = vpop.f32.mrb[83].mxu1 }
 0x4a1   : > { %v2208_v42 = vadd.f32 %v3747_v25, %v5556_v3  ;;  %v3750_v31 = vadd.f32 %v3749_v29, %v3748_v27  ;;  %v3814_v32 = vadd.f32 %v3813_v30, %v3812_v28  ;;  %v2386_v33 = vpack.c.bf16 %v2374_v24, %v2373_v23 }
 0x4a3   : > { %v2305_v34 = vadd.f32 %v3811_v26, %v2208_v42  ;;  %v2211_v35 = vadd.f32 %v3750_v31, %v5556_v3  ;;  %3922 = vmatmul.mubr.bf16.gmra.mrb[84].mxu0 %v2386_v33 }
 0x4a5   : > { %2343 = vst [vmem:[%s5564_s16 + $0x40] sm:$0xff] %v2305_v34  ;;  %v2308_v38 = vadd.f32 %v3814_v32, %v2211_v35  ;;  %v3751_v41 = vpop.f32.mrb[68].mxu0  ;;  %v3815_v46 = vpop.f32.mrb[84].mxu1  ;;  %v2375_v49 = vadd.f32 %v2359_v36, %v2305_v34  ;;  %v2365_v36 = vld [vmem:[%s5124_s18 + $0x70] sm:$0xff] }
 0x4a6   : > { %v3752_v47 = vpop.f32.mrb[69].mxu0  ;;  %v3816_v48 = vpop.f32.mrb[85].mxu1 }
 0x4a7   : > { %2344 = vst [vmem:[%s5564_s16 + $0x48] sm:$0xff] %v2308_v38  ;;  %v2376_v50 = vadd.f32 %v2360_v37, %v2308_v38  ;;  %v3753_v51 = vadd.f32 %v3752_v47, %v3751_v41  ;;  %v3817_v52 = vadd.f32 %v3816_v48, %v3815_v46  ;;  %v3754_v53 = vpop.f32.mrb[70].mxu0  ;;  %v3818_v54 = vpop.f32.mrb[86].mxu1  ;;  %v2366_v37 = vld [vmem:[%s5124_s18 + $0x78] sm:$0xff]  ;;  %v4312_v48 = vld [vmem:[%s6023_s22 + $0x20] sm:$0xff]  }
 0x4a8   : > { %v3755_v55 = vpop.f32.mrb[71].mxu0  ;;  %v3819_v56 = vpop.f32.mrb[87].mxu1  ;;  %3941 = vmatprep.subr.bf16.mxu1 %v4312_v48 }
 0x4a9   : > { %v2216_v57 = vadd.f32 %v3753_v51, %v5556_v3  ;;  %v3756_v9 = vadd.f32 %v3755_v55, %v3754_v53  ;;  %v3820_v58 = vadd.f32 %v3819_v56, %v3818_v54  ;;  %v2387_v10 = vpack.c.bf16 %v2376_v50, %v2375_v49  ;;  %3942 = vmatpush3.bf16.msra.mxu1 %v4312_v48  ;;  %v4314_v49 = vld [vmem:[%s6024_s17] sm:$0xff]   ;;  %v4315_v50 = vld [vmem:[%s6024_s17 + $0x8] sm:$0xff]   ;;  %v3643_v51 = vld [vmem:[#allocation14] ss:$0 sm:$0xff] }
 0x4aa   : > { %3961 = vmatprep.subr.bf16.mxu0 %v4314_v49 }
 0x4ab   : > { %v2313_v11 = vadd.f32 %v3817_v52, %v2216_v57  ;;  %v2219_v12 = vadd.f32 %v3756_v9, %v5556_v3  ;;  %3925 = vmatprep.mubr.bf16.mxu0 %v2387_v10  ;;  %3962 = vmatpush3.bf16.msra.mxu0 %v4314_v49 }
 0x4ac   : > { %3963 = vmatprep.subr.bf16.mxu0 %v4315_v50 }
 0x4ad   : > { %2345 = vst [vmem:[%s5564_s16 + $0x50] sm:$0xff] %v2313_v11  ;;  %v2316_v61 = vadd.f32 %v3820_v58, %v2219_v12  ;;  %v3757_v62 = vpop.f32.mrb[72].mxu0  ;;  %v3821_v63 = vpop.f32.mrb[88].mxu1  ;;  %v2377_v2 = vadd.f32 %v2361_v59, %v2313_v11 }
 0x4ae   : > { %v3758_v0 = vpop.f32.mrb[73].mxu0  ;;  %v3822_v1 = vpop.f32.mrb[89].mxu1 }
 0x4af   : > { %2346 = vst [vmem:[%s5564_s16 + $0x58] sm:$0xff] %v2316_v61  ;;  %v2378_v4 = vadd.f32 %v2362_v60, %v2316_v61  ;;  %v3759_v5 = vadd.f32 %v3758_v0, %v3757_v62  ;;  %v3823_v45 = vadd.f32 %v3822_v1, %v3821_v63  ;;  %v3760_v6 = vpop.f32.mrb[74].mxu0  ;;  %v3824_v7 = vpop.f32.mrb[90].mxu1  ;;  %3964 = vmatpush3.bf16.msra.mxu0 %v4315_v50 }
 0x4b0   : > { %v3761_v13 = vpop.f32.mrb[75].mxu0  ;;  %v3825_v44 = vpop.f32.mrb[91].mxu1 }
 0x4b1   : > { %v2224_v14 = vadd.f32 %v3759_v5, %v5556_v3  ;;  %v3762_v15 = vadd.f32 %v3761_v13, %v3760_v6  ;;  %v3826_v16 = vadd.f32 %v3825_v44, %v3824_v7  ;;  %v2388_v8 = vpack.c.bf16 %v2378_v4, %v2377_v2 }
 0x4b3   : > { %v2321_v17 = vadd.f32 %v3823_v45, %v2224_v14  ;;  %v2227_v18 = vadd.f32 %v3762_v15, %v5556_v3  ;;  %3926 = vmatmul.mubr.bf16.gmra.mrb[88].mxu0 %v2388_v8 }
 0x4b5   : > { %2347 = vst [vmem:[%s5564_s16 + $0x60] sm:$0xff] %v2321_v17  ;;  %v2324_v20 = vadd.f32 %v3826_v16, %v2227_v18  ;;  %v3763_v39 = vpop.f32.mrb[76].mxu0  ;;  %v3827_v43 = vpop.f32.mrb[92].mxu1  ;;  %v2379_v23 = vadd.f32 %v2363_v40, %v2321_v17 }
 0x4b6   : > { %v3764_v21 = vpop.f32.mrb[77].mxu0  ;;  %v3828_v22 = vpop.f32.mrb[93].mxu1 }
 0x4b7   : > { %2348 = vst [vmem:[%s5564_s16 + $0x68] sm:$0xff] %v2324_v20  ;;  %v2380_v24 = vadd.f32 %v2364_v19, %v2324_v20  ;;  %v3765_v25 = vadd.f32 %v3764_v21, %v3763_v39  ;;  %v3829_v26 = vadd.f32 %v3828_v22, %v3827_v43  ;;  %v3766_v27 = vpop.f32.mrb[78].mxu0  ;;  %v3830_v28 = vpop.f32.mrb[94].mxu1 }
 0x4b8   : > { %v3767_v29 = vpop.f32.mrb[79].mxu0  ;;  %v3831_v30 = vpop.f32.mrb[95].mxu1 }
 0x4b9   : > { %v2232_v42 = vadd.f32 %v3765_v25, %v5556_v3  ;;  %v3768_v31 = vadd.f32 %v3767_v29, %v3766_v27  ;;  %v3832_v32 = vadd.f32 %v3831_v30, %v3830_v28  ;;  %v2389_v33 = vpack.c.bf16 %v2380_v24, %v2379_v23 }
 0x4bb   : > { %v2329_v34 = vadd.f32 %v3829_v26, %v2232_v42  ;;  %v2235_v35 = vadd.f32 %v3768_v31, %v5556_v3  ;;  %3929 = vmatprep.mubr.bf16.mxu0 %v2389_v33  ;;  %v4313_v3 = vld [vmem:[%s6023_s22 + $0x28] sm:$0xff]  }
 0x4bc   : > { %3943 = vmatprep.subr.bf16.mxu1 %v4313_v3 }
 0x4bd   : > { %2349 = vst [vmem:[%s5564_s16 + $0x70] sm:$0xff] %v2329_v34  ;;  %v2332_v38 = vadd.f32 %v3832_v32, %v2235_v35  ;;  %v2381_v41 = vadd.f32 %v2365_v36, %v2329_v34  ;;  %3944 = vmatpush3.bf16.msra.mxu1 %v4313_v3 }
 0x4bf   : > { %2350 = vst [vmem:[%s5564_s16 + $0x78] sm:$0xff] %v2332_v38  ;;  %v2382_v46 = vadd.f32 %v2366_v37, %v2332_v38  ;;  %s4614_s16 = scalar_lea.vmem %s4613_s4, 4096 }
 0x4c1   : > { %v2390_v47 = vpack.c.bf16 %v2382_v46, %v2381_v41  ;;  %v4316_v41 = vld [vmem:[%s6024_s17 + $0x10] sm:$0xff]   ;;  %v4317_v46 = vld [vmem:[%s6024_s17 + $0x18] sm:$0xff]  }
 0x4c2   : > { %3965 = vmatprep.subr.bf16.mxu0 %v4316_v41 }
 0x4c3   : > { %3930 = vmatmul.mubr.bf16.gmra.mrb[92].mxu0 %v2390_v47  ;;  %v3652_v47 = vld [vmem:[%s6025_s15] ss:$0 sm:$0xff]  ;;  %s6027_s15 = sld [smem:[#allocation38_spill]] }
 0x4c4   : > { %3966 = vmatpush3.bf16.msra.mxu0 %v4316_v41 }
 0x4c5   : > { %3967 = vmatprep.subr.bf16.mxu0 %v4317_v46 }
 0x4c8   : > { %3968 = vmatpush3.bf16.msra.mxu0 %v4317_v46 }
 0x4c9   : > { %s5860_s29 = scalar_lea.hbm %s6027_s15, %s3695_s2 }
 0x566   : > { %v3919_v52 = vpop.f32.mrb[80].mxu0 }
 0x567   : > { %v2505_v53 = vadd.f32 %v3919_v52, %v3643_v51  ;;  %v2496_v54 = vpop.f32.mrb[81].mxu0 }
 0x568   : > { %v2497_v55 = vadd.f32 %v3643_v51, %v2496_v54  ;;  %v3920_v56 = vpop.f32.mrb[82].mxu0 }
 0x569   : > { %v2508_v57 = vadd.f32 %v3920_v56, %v3643_v51  ;;  %v2499_v9 = vpop.f32.mrb[83].mxu0  ;;  %v2561_v10 = vmax.f32 %v2505_v53, 0.0 }
 0x56a   : > { %v2500_v58 = vadd.f32 %v3643_v51, %v2499_v9  ;;  %v2559_v12 = vmax.f32 %v2497_v55, 0.0 }
 0x56b   : > { %v2562_v11 = vmax.f32 %v2508_v57, 0.0 }
 0x56c   : > { %v2560_v59 = vmax.f32 %v2500_v58, 0.0 }
 0x56d   : > { %v2576_v60 = vpack.c.bf16 %v2562_v11, %v2561_v10 }
 0x56e   : > { %v2575_v61 = vpack.c.bf16 %v2560_v59, %v2559_v12 }
 0x570   : > { %3945 = vmatprep.mubr.msk.bf16.mxu1 %vm2638_vm2, %v2575_v61 }
 0x571   : > { %3946 = vmatmul.mubr.msk.bf16.vlgmr.msra.gmra.mrb[96].mxu1 %vm2638_vm2, %v2576_v60 }
 0x576   : > { %v3923_v62 = vpop.f32.mrb[84].mxu0 }
 0x577   : > { %v2521_v63 = vadd.f32 %v3923_v62, %v3643_v51  ;;  %v2512_v0 = vpop.f32.mrb[85].mxu0 }
 0x578   : > { %v2513_v1 = vadd.f32 %v3643_v51, %v2512_v0  ;;  %v3924_v2 = vpop.f32.mrb[86].mxu0 }
 0x579   : > { %v2524_v4 = vadd.f32 %v3924_v2, %v3643_v51  ;;  %v2515_v5 = vpop.f32.mrb[87].mxu0  ;;  %v2565_v6 = vmax.f32 %v2521_v63, 0.0 }
 0x57a   : > { %v2516_v45 = vadd.f32 %v3643_v51, %v2515_v5  ;;  %v2563_v13 = vmax.f32 %v2513_v1, 0.0 }
 0x57b   : > { %v2566_v7 = vmax.f32 %v2524_v4, 0.0 }
 0x57c   : > { %v2564_v44 = vmax.f32 %v2516_v45, 0.0 }
 0x57d   : > { %v2578_v14 = vpack.c.bf16 %v2566_v7, %v2565_v6 }
 0x57e   : > { %v2577_v15 = vpack.c.bf16 %v2564_v44, %v2563_v13 }
 0x580   : > { %3949 = vmatprep.mubr.msk.bf16.mxu1 %vm2638_vm2, %v2577_v15 }
 0x581   : > { %3950 = vmatmul.mubr.msk.bf16.gmra.mrb[100].mxu1 %vm2638_vm2, %v2578_v14 }
 0x586   : > { %v3927_v16 = vpop.f32.mrb[88].mxu0 }
 0x587   : > { %v2537_v8 = vadd.f32 %v3927_v16, %v3643_v51  ;;  %v2528_v17 = vpop.f32.mrb[89].mxu0 }
 0x588   : > { %v2529_v18 = vadd.f32 %v3643_v51, %v2528_v17  ;;  %v3928_v40 = vpop.f32.mrb[90].mxu0 }
 0x589   : > { %v2540_v19 = vadd.f32 %v3928_v40, %v3643_v51  ;;  %v2531_v20 = vpop.f32.mrb[91].mxu0  ;;  %v2569_v43 = vmax.f32 %v2537_v8, 0.0 }
 0x58a   : > { %v2532_v39 = vadd.f32 %v3643_v51, %v2531_v20  ;;  %v2567_v22 = vmax.f32 %v2529_v18, 0.0 }
 0x58b   : > { %v2570_v21 = vmax.f32 %v2540_v19, 0.0 }
 0x58c   : > { %v2568_v23 = vmax.f32 %v2532_v39, 0.0 }
 0x58d   : > { %v2580_v24 = vpack.c.bf16 %v2570_v21, %v2569_v43 }
 0x58e   : > { %v2579_v25 = vpack.c.bf16 %v2568_v23, %v2567_v22 }
 0x590   : > { %3953 = vmatprep.mubr.msk.bf16.mxu1 %vm2638_vm2, %v2579_v25 }
 0x591   : > { %3954 = vmatmul.mubr.msk.bf16.gmra.mrb[104].mxu1 %vm2638_vm2, %v2580_v24 }
 0x596   : > { %v3931_v26 = vpop.f32.mrb[92].mxu0 }
 0x597   : > { %v2553_v27 = vadd.f32 %v3931_v26, %v3643_v51  ;;  %v2544_v28 = vpop.f32.mrb[93].mxu0 }
 0x598   : > { %v2545_v29 = vadd.f32 %v3643_v51, %v2544_v28  ;;  %v3932_v30 = vpop.f32.mrb[94].mxu0 }
 0x599   : > { %v2556_v42 = vadd.f32 %v3932_v30, %v3643_v51  ;;  %v2547_v31 = vpop.f32.mrb[95].mxu0  ;;  %v2573_v33 = vmax.f32 %v2553_v27, 0.0 }
 0x59a   : > { %v2548_v32 = vadd.f32 %v3643_v51, %v2547_v31  ;;  %v2571_v35 = vmax.f32 %v2545_v29, 0.0 }
 0x59b   : > { %v2574_v34 = vmax.f32 %v2556_v42, 0.0 }
 0x59c   : > { %v2572_v36 = vmax.f32 %v2548_v32, 0.0 }
 0x59d   : > { %v2582_v37 = vpack.c.bf16 %v2574_v34, %v2573_v33 }
 0x59e   : > { %v2581_v38 = vpack.c.bf16 %v2572_v36, %v2571_v35 }
 0x5a0   : > { %3957 = vmatprep.mubr.msk.bf16.mxu1 %vm2638_vm2, %v2581_v38 }
 0x5a1   : > { %3958 = vmatmul.mubr.msk.bf16.gmra.mrb[108].mxu1 %vm2638_vm2, %v2582_v37 }
 0x644   : > { %v3947_v48 = vpop.f32.mrb[96].mxu1 }
 0x645   : > { %v2706_v3 = vadd.f32 %v3947_v48, %v3652_v47  ;;  %v2697_v49 = vpop.f32.mrb[97].mxu1 }
 0x646   : > { %v2698_v50 = vadd.f32 %v3652_v47, %v2697_v49  ;;  %v3948_v51 = vpop.f32.mrb[98].mxu1 }
 0x647   : > { %v2709_v52 = vadd.f32 %v3948_v51, %v3652_v47  ;;  %v2700_v53 = vpop.f32.mrb[99].mxu1  ;;  %v2762_v55 = vmax.f32 %v2706_v3, 0.0 }
 0x648   : > { %v2701_v54 = vadd.f32 %v3652_v47, %v2700_v53  ;;  %v2760_v57 = vmax.f32 %v2698_v50, 0.0 }
 0x649   : > { %v2763_v56 = vmax.f32 %v2709_v52, 0.0 }
 0x64a   : > { %v2761_v9 = vmax.f32 %v2701_v54, 0.0 }
 0x64b   : > { %v2777_v58 = vpack.c.bf16 %v2763_v56, %v2762_v55 }
 0x64c   : > { %v2776_v10 = vpack.c.bf16 %v2761_v9, %v2760_v57 }
 0x64e   : > { %3969 = vmatprep.mubr.msk.bf16.mxu0 %vm2823_vm3, %v2776_v10 }
 0x64f   : > { %3970 = vmatmul.mubr.msk.bf16.vlgmr.msra.gmra.mrb[96].mxu0 %vm2823_vm3, %v2777_v58 }
 0x654   : > { %v3951_v11 = vpop.f32.mrb[100].mxu1 }
 0x655   : > { %v2722_v12 = vadd.f32 %v3951_v11, %v3652_v47  ;;  %v2713_v59 = vpop.f32.mrb[101].mxu1 }
 0x656   : > { %v2714_v60 = vadd.f32 %v3652_v47, %v2713_v59  ;;  %v3952_v61 = vpop.f32.mrb[102].mxu1 }
 0x657   : > { %v2725_v62 = vadd.f32 %v3952_v61, %v3652_v47  ;;  %v2716_v63 = vpop.f32.mrb[103].mxu1  ;;  %v2766_v1 = vmax.f32 %v2722_v12, 0.0 }
 0x658   : > { %v2717_v0 = vadd.f32 %v3652_v47, %v2716_v63  ;;  %v2764_v4 = vmax.f32 %v2714_v60, 0.0 }
 0x659   : > { %v2767_v2 = vmax.f32 %v2725_v62, 0.0 }
 0x65a   : > { %v2765_v5 = vmax.f32 %v2717_v0, 0.0 }
 0x65b   : > { %v2779_v45 = vpack.c.bf16 %v2767_v2, %v2766_v1 }
 0x65c   : > { %v2778_v6 = vpack.c.bf16 %v2765_v5, %v2764_v4 }
 0x65e   : > { %3973 = vmatprep.mubr.msk.bf16.mxu0 %vm2823_vm3, %v2778_v6 }
 0x65f   : > { %3974 = vmatmul.mubr.msk.bf16.gmra.mrb[100].mxu0 %vm2823_vm3, %v2779_v45 }
 0x664   : > { %v3955_v7 = vpop.f32.mrb[104].mxu1 }
 0x665   : > { %v2738_v13 = vadd.f32 %v3955_v7, %v3652_v47  ;;  %v2729_v44 = vpop.f32.mrb[105].mxu1 }
 0x666   : > { %v2730_v14 = vadd.f32 %v3652_v47, %v2729_v44  ;;  %v3956_v15 = vpop.f32.mrb[106].mxu1 }
 0x667   : > { %v2741_v16 = vadd.f32 %v3956_v15, %v3652_v47  ;;  %v2732_v8 = vpop.f32.mrb[107].mxu1  ;;  %v2770_v18 = vmax.f32 %v2738_v13, 0.0 }
 0x668   : > { %v2733_v17 = vadd.f32 %v3652_v47, %v2732_v8  ;;  %v2768_v19 = vmax.f32 %v2730_v14, 0.0 }
 0x669   : > { %v2771_v40 = vmax.f32 %v2741_v16, 0.0 }
 0x66a   : > { %v2769_v20 = vmax.f32 %v2733_v17, 0.0 }
 0x66b   : > { %v2781_v39 = vpack.c.bf16 %v2771_v40, %v2770_v18 }
 0x66c   : > { %v2780_v43 = vpack.c.bf16 %v2769_v20, %v2768_v19 }
 0x66e   : > { %3977 = vmatprep.mubr.msk.bf16.mxu0 %vm2823_vm3, %v2780_v43 }
 0x66f   : > { %3978 = vmatmul.mubr.msk.bf16.gmra.mrb[104].mxu0 %vm2823_vm3, %v2781_v39 }
 0x674   : > { %v3959_v21 = vpop.f32.mrb[108].mxu1 }
 0x675   : > { %v2754_v22 = vadd.f32 %v3959_v21, %v3652_v47  ;;  %v2745_v23 = vpop.f32.mrb[109].mxu1 }
 0x676   : > { %v2746_v24 = vadd.f32 %v3652_v47, %v2745_v23  ;;  %v3960_v25 = vpop.f32.mrb[110].mxu1 }
 0x677   : > { %v2757_v26 = vadd.f32 %v3960_v25, %v3652_v47  ;;  %v2748_v27 = vpop.f32.mrb[111].mxu1  ;;  %v2774_v29 = vmax.f32 %v2754_v22, 0.0 }
 0x678   : > { %v2749_v28 = vadd.f32 %v3652_v47, %v2748_v27  ;;  %v2772_v42 = vmax.f32 %v2746_v24, 0.0  ;;  %v3667_v47 = vld [vmem:[%s6026_s23] ss:$0 sm:$0xff]  ;;  %s4608_s23 = scalar_lea.vmem %s5862_s10, 2048 }
 0x679   : > { %v2775_v30 = vmax.f32 %v2757_v26, 0.0  ;;  %p4609_p1 = scmp.ne.s32.totalorder %s5862_s10, %s4608_s23  ;;  %p4616_p6 = scmp.lt.s32.totalorder %s4614_s16, %s4608_s23 }
 0x67a   : > { %v2773_v31 = vmax.f32 %v2749_v28, 0.0 }
 0x67b   : > { %v2783_v32 = vpack.c.bf16 %v2775_v30, %v2774_v29  ;;  %p4610_p0 = pnand %p4609_p1, %p6028_p13  ;;  %p4617_p10 = por %p4616_p6, %p4615_p8 }
 0x67c   : > { %v2782_v33 = vpack.c.bf16 %v2773_v31, %v2772_v42 }
 0x67d   : > { %p4611_p2 = pneg %p4610_p0 }
 0x67e   : > { %3981 = vmatprep.mubr.msk.bf16.mxu0 %vm2823_vm3, %v2782_v33 }
 0x67f   : > { %3982 = vmatmul.mubr.msk.bf16.gmra.mrb[108].mxu0 %vm2823_vm3, %v2783_v32  ;;  %p4618_p11 = pnand %p4617_p10, %p4611_p2 }
 0x722   : > { %v3971_v34 = vpop.f32.mrb[96].mxu0 }
 0x723   : > { %v2882_v35 = vpop.f32.mrb[97].mxu0  ;;  %v5702_v20 = vadd.f32 %v3971_v34, %v3667_v47 }
 0x724   : > { %v3972_v36 = vpop.f32.mrb[98].mxu0  ;;  %v5680_v45 = vadd.f32 %v3667_v47, %v2882_v35 }
 0x725   : > { %v2885_v37 = vpop.f32.mrb[99].mxu0  ;;  %v5707_v21 = vadd.f32 %v3972_v36, %v3667_v47  ;;  %v2947_v26 = vmul.f32 %v5702_v20, %v5702_v20 }
 0x726   : > { %v5687_v44 = vadd.f32 %v3667_v47, %v2885_v37  ;;  %v2945_v17 = vmul.f32 %v5680_v45, %v5680_v45 }
 0x727   : > { %v2948_v29 = vmul.f32 %v5707_v21, %v5707_v21  ;;  %v2968_v30 = vsel %vm2961_vm4, %v2947_v26, 0.0 }
 0x728   : > { %v2946_v19 = vmul.f32 %v5687_v44, %v5687_v44  ;;  %v2962_v39 = vsel %vm2961_vm4, %v2945_v17, 0.0 }
 0x729   : > { %v2971_v31 = vsel %vm2961_vm4, %v2948_v29, 0.0 }
 0x72a   : > { %v2965_v22 = vsel %vm2961_vm4, %v2946_v19, 0.0 }
 0x732   : > { %v3975_v38 = vpop.f32.mrb[100].mxu0 }
 0x733   : > { %v2898_v41 = vpop.f32.mrb[101].mxu0  ;;  %v5712_v24 = vadd.f32 %v3975_v38, %v3667_v47 }
 0x734   : > { %v3976_v46 = vpop.f32.mrb[102].mxu0  ;;  %v5692_v16 = vadd.f32 %v3667_v47, %v2898_v41 }
 0x735   : > { %v2901_v48 = vpop.f32.mrb[103].mxu0  ;;  %v5717_v27 = vadd.f32 %v3976_v46, %v3667_v47  ;;  %v2951_v42 = vmul.f32 %v5712_v24, %v5712_v24 }
 0x736   : > { %v5697_v18 = vadd.f32 %v3667_v47, %v2901_v48  ;;  %v2949_v43 = vmul.f32 %v5692_v16, %v5692_v16 }
 0x737   : > { %v2952_v32 = vmul.f32 %v5717_v27, %v5717_v27  ;;  %v2980_v33 = vsel %vm2961_vm4, %v2951_v42, 0.0 }
 0x738   : > { %v2950_v23 = vmul.f32 %v5697_v18, %v5697_v18  ;;  %v2974_v25 = vsel %vm2961_vm4, %v2949_v43, 0.0 }
 0x739   : > { %v2983_v34 = vsel %vm2961_vm4, %v2952_v32, 0.0 }
 0x73a   : > { %v2977_v28 = vsel %vm2961_vm4, %v2950_v23, 0.0 }
 0x742   : > { %v3979_v3 = vpop.f32.mrb[104].mxu0 }
 0x743   : > { %v5650_v49 = vadd.f32 %v3979_v3, %v3667_v47  ;;  %v2914_v50 = vpop.f32.mrb[105].mxu0 }
 0x744   : > { %v5652_v51 = vadd.f32 %v3667_v47, %v2914_v50  ;;  %v3980_v52 = vpop.f32.mrb[106].mxu0 }
 0x745   : > { %v5654_v53 = vadd.f32 %v3980_v52, %v3667_v47  ;;  %v2917_v54 = vpop.f32.mrb[107].mxu0  ;;  %v2955_v55 = vmul.f32 %v5650_v49, %v5650_v49 }
 0x746   : > { %v5658_v56 = vadd.f32 %v3667_v47, %v2917_v54  ;;  %v2953_v57 = vmul.f32 %v5652_v51, %v5652_v51 }
 0x747   : > { %v2992_v9 = vsel %vm2961_vm4, %v2955_v55, 0.0  ;;  %v2956_v58 = vmul.f32 %v5654_v53, %v5654_v53 }
 0x748   : > { %2993 = vadd.xlane.f32.xlu1 %v2992_v9  ;;  %v2986_v10 = vsel %vm2961_vm4, %v2953_v57, 0.0  ;;  %v2954_v11 = vmul.f32 %v5658_v56, %v5658_v56 }
 0x749   : > { %2987 = vadd.xlane.f32.xlu0 %v2986_v10  ;;  %v2995_v12 = vsel %vm2961_vm4, %v2956_v58, 0.0 }
 0x74a   : > { %v2989_v59 = vsel %vm2961_vm4, %v2954_v11, 0.0 }
 0x74c   : > { %2996 = vadd.xlane.f32.xlu1 %v2995_v12 }
 0x74d   : > { %2990 = vadd.xlane.f32.xlu0 %v2989_v59 }
 0x752   : > { %v3983_v60 = vpop.f32.mrb[108].mxu0 }
 0x753   : > { %v5670_v61 = vadd.f32 %v3983_v60, %v3667_v47  ;;  %v2930_v62 = vpop.f32.mrb[109].mxu0 }
 0x754   : > { %v5672_v63 = vadd.f32 %v3667_v47, %v2930_v62  ;;  %v3984_v0 = vpop.f32.mrb[110].mxu0 }
 0x755   : > { %v5674_v1 = vadd.f32 %v3984_v0, %v3667_v47  ;;  %v2933_v2 = vpop.f32.mrb[111].mxu0  ;;  %v2959_v4 = vmul.f32 %v5670_v61, %v5670_v61 }
 0x756   : > { %v5678_v5 = vadd.f32 %v3667_v47, %v2933_v2  ;;  %v2957_v13 = vmul.f32 %v5672_v63, %v5672_v63 }
 0x757   : > { %v3004_v6 = vsel %vm2961_vm4, %v2959_v4, 0.0  ;;  %v2960_v7 = vmul.f32 %v5674_v1, %v5674_v1 }
 0x758   : > { %3005 = vadd.xlane.f32.xlu0 %v3004_v6  ;;  %v2958_v15 = vmul.f32 %v5678_v5, %v5678_v5  ;;  %v2998_v8 = vsel %vm2961_vm4, %v2957_v13, 0.0 }
 0x759   : > { %v3007_v14 = vsel %vm2961_vm4, %v2960_v7, 0.0 }
 0x75a   : > { %3008 = vadd.xlane.f32.xlu1 %v3007_v14  ;;  %v3001_v40 = vsel %vm2961_vm4, %v2958_v15, 0.0 }
 0x75c   : > { %2999 = vadd.xlane.f32.xlu0 %v2998_v8 }
 0x75e   : > { %3002 = vadd.xlane.f32.xlu1 %v3001_v40 }
 0x760   : > { %2963 = vadd.xlane.f32.xlu0 %v2962_v39 }
 0x762   : > { %2966 = vadd.xlane.f32.xlu1 %v2965_v22 }
 0x764   : > { %2975 = vadd.xlane.f32.xlu0 %v2974_v25 }
 0x766   : > { %2978 = vadd.xlane.f32.xlu1 %v2977_v28 }
 0x768   : > { %2969 = vadd.xlane.f32.xlu0 %v2968_v30 }
 0x76a   : > { %2972 = vadd.xlane.f32.xlu1 %v2971_v31 }
 0x76c   : > { %2981 = vadd.xlane.f32.xlu0 %v2980_v33 }
 0x76e   : > { %2984 = vadd.xlane.f32.xlu1 %v2983_v34 }
 0x7d5   : > { %v2994_v35 = vpop.xlane.xlu1 %2993 }
 0x7d6   : > { %4318 = vrsqrt.f32 %v2994_v35  ;;  %v2988_v36 = vpop.xlane.xlu0 %2987  ;;  %vm3082_vm5 = vcmp.eq.f32.partialorder %v2994_v35, inf  ;;  %v3085_v47 = vand.u32 2147483648, %v2994_v35  ;;  %vm3084_vm6 = vcmp.eq.f32.partialorder %v2994_v35, 0.0 }
 0x7d7   : > { %4320 = vrsqrt.f32 %v2988_v36  ;;  %vm3068_vm7 = vcmp.eq.f32.partialorder %v2988_v36, inf  ;;  %v3071_v52 = vand.u32 2147483648, %v2988_v36  ;;  %vm3070_vm8 = vcmp.eq.f32.partialorder %v2988_v36, 0.0 }
 0x7d9   : > { %v2997_v37 = vpop.xlane.xlu1 %2996 }
 0x7da   : > { %4322 = vrsqrt.f32 %v2997_v37  ;;  %v2991_v38 = vpop.xlane.xlu0 %2990  ;;  %vm3089_vm9 = vcmp.eq.f32.partialorder %v2997_v37, inf  ;;  %v3092_v12 = vand.u32 2147483648, %v2997_v37  ;;  %vm3091_vm10 = vcmp.eq.f32.partialorder %v2997_v37, 0.0 }
 0x7db   : > { %4324 = vrsqrt.f32 %v2991_v38  ;;  %vm3075_vm11 = vcmp.eq.f32.partialorder %v2991_v38, inf  ;;  %v3078_v7 = vand.u32 2147483648, %v2991_v38  ;;  %vm3077_vm12 = vcmp.eq.f32.partialorder %v2991_v38, 0.0 }
 0x7e0   : > { %v4319_v41 = vpop.eup %4318 }
 0x7e1   : > { %v4321_v46 = vpop.eup %4320  ;;  %v3081_v48 = vmul.f32 %v4319_v41, %v2994_v35 }
 0x7e2   : > { %v3067_v3 = vmul.f32 %v4321_v46, %v2988_v36 }
 0x7e3   : > { %v3083_v50 = vsel %vm3082_vm5, %v2994_v35, %v3081_v48 }
 0x7e4   : > { %v4323_v54 = vpop.eup %4322  ;;  %v3086_v55 = vsel %vm3084_vm6, %v3085_v47, %v3083_v50  ;;  %v3069_v57 = vsel %vm3068_vm7, %v2988_v36, %v3067_v3 }
 0x7e5   : > { %v4325_v9 = vpop.eup %4324  ;;  %v3072_v58 = vsel %vm3070_vm8, %v3071_v52, %v3069_v57  ;;  %v3088_v10 = vmul.f32 %v4323_v54, %v2997_v37  ;;  %v3006_v11 = vpop.xlane.xlu0 %3005  ;;  %v3132_v60 = vadd.f32 1e-06, %v3086_v55 }
 0x7e6   : > { %v3074_v59 = vmul.f32 %v4325_v9, %v2991_v38  ;;  %4326 = vrsqrt.f32 %v3006_v11  ;;  %v3130_v2 = vadd.f32 1e-06, %v3072_v58  ;;  %vm3110_vm13 = vcmp.eq.f32.partialorder %v3006_v11, inf }
 0x7e7   : > { %v3090_v62 = vsel %vm3089_vm9, %v2997_v37, %v3088_v10  ;;  %v3009_v0 = vpop.xlane.xlu1 %3008  ;;  %vm3112_vm14 = vcmp.eq.f32.partialorder %v3006_v11, 0.0  ;;  %v3113_v43 = vand.u32 2147483648, %v3006_v11 }
 0x7e8   : > { %v3093_v4 = vsel %vm3091_vm10, %v3092_v12, %v3090_v62  ;;  %v3076_v6 = vsel %vm3075_vm11, %v2991_v38, %v3074_v59  ;;  %4328 = vrsqrt.f32 %v3009_v0  ;;  %vm3117_vm15 = vcmp.eq.f32.partialorder %v3009_v0, inf }
 0x7e9   : > { %v3000_v13 = vpop.xlane.xlu0 %2999  ;;  %v3079_v14 = vsel %vm3077_vm12, %v3078_v7, %v3076_v6  ;;  %v3133_v15 = vadd.f32 1e-06, %v3093_v4  ;;  %vm3119_vm0 = vcmp.eq.f32.partialorder %v3009_v0, 0.0  ;;  %v3120_v25 = vand.u32 2147483648, %v3009_v0 }
 0x7ea   : > { %4330 = vrsqrt.f32 %v3000_v13  ;;  %v3131_v17 = vadd.f32 1e-06, %v3079_v14  ;;  %vm3096_vm1 = vcmp.eq.f32.partialorder %v3000_v13, inf  ;;  %vm3098_vm2 = vcmp.eq.f32.partialorder %v3000_v13, 0.0 }
 0x7eb   : > { %4332 = vrcp.f32 %v3132_v60  ;;  %v5730_v8 = vpop.xlane.xlu1 %3002  ;;  %v3099_v29 = vand.u32 2147483648, %v3000_v13 }
 0x7ec   : > { %4334 = vrcp.f32 %v3130_v2  ;;  %vm3103_vm5 = vcmp.eq.f32.partialorder %v5730_v8, inf  ;;  %vm3105_vm6 = vcmp.eq.f32.partialorder %v5730_v8, 0.0  ;;  %v3106_v33 = vand.u32 2147483648, %v5730_v8 }
 0x7ed   : > { %4336 = vrsqrt.f32 %v5730_v8  ;;  %v5733_v40 = vpop.xlane.xlu0 %2963 }
 0x7ee   : > { %4338 = vrsqrt.f32 %v5733_v40  ;;  %vm3012_vm7 = vcmp.eq.f32.partialorder %v5733_v40, inf  ;;  %vm3014_vm8 = vcmp.eq.f32.partialorder %v5733_v40, 0.0  ;;  %v3015_v36 = vand.u32 2147483648, %v5733_v40 }
 0x7ef   : > { %4340 = vrcp.f32 %v3133_v15  ;;  %v5736_v19 = vpop.xlane.xlu1 %2966 }
 0x7f0   : > { %v4327_v39 = vpop.eup %4326  ;;  %4342 = vrsqrt.f32 %v5736_v19  ;;  %vm3019_vm9 = vcmp.eq.f32.partialorder %v5736_v19, inf  ;;  %vm3021_vm10 = vcmp.eq.f32.partialorder %v5736_v19, 0.0  ;;  %v3022_v50 = vand.u32 2147483648, %v5736_v19 }
 0x7f1   : > { %4344 = vrcp.f32 %v3131_v17  ;;  %v3109_v22 = vmul.f32 %v4327_v39, %v3006_v11  ;;  %v5739_v23 = vpop.xlane.xlu0 %2975 }
 0x7f2   : > { %4346 = vrsqrt.f32 %v5739_v23  ;;  %v4329_v26 = vpop.eup %4328  ;;  %vm3040_vm11 = vcmp.eq.f32.partialorder %v5739_v23, inf  ;;  %vm3042_vm12 = vcmp.eq.f32.partialorder %v5739_v23, 0.0  ;;  %v3043_v62 = vand.u32 2147483648, %v5739_v23 }
 0x7f3   : > { %v3111_v28 = vsel %vm3110_vm13, %v3006_v11, %v3109_v22  ;;  %v5744_v30 = vpop.xlane.xlu1 %2978  ;;  %v3116_v32 = vmul.f32 %v4329_v26, %v3009_v0 }
 0x7f4   : > { %v4331_v42 = vpop.eup %4330  ;;  %v3114_v31 = vsel %vm3112_vm14, %v3113_v43, %v3111_v28  ;;  %4348 = vrsqrt.f32 %v5744_v30  ;;  %vm3047_vm13 = vcmp.eq.f32.partialorder %v5744_v30, inf  ;;  %vm3049_vm14 = vcmp.eq.f32.partialorder %v5744_v30, 0.0 }
 0x7f5   : > { %v4333_v34 = vpop.eup %4332  ;;  %v3095_v35 = vmul.f32 %v4331_v42, %v3000_v13  ;;  %v5752_v37 = vpop.xlane.xlu0 %2969  ;;  %v3136_v41 = vadd.f32 1e-06, %v3114_v31  ;;  %v3118_v46 = vsel %vm3117_vm15, %v3009_v0, %v3116_v32  ;;  %v3050_v31 = vand.u32 2147483648, %v5744_v30 }
 0x7f6   : > { %v4335_v38 = vpop.eup %4334  ;;  %4350 = vrsqrt.f32 %v5752_v37  ;;  %v3121_v47 = vsel %vm3119_vm0, %v3120_v25, %v3118_v46  ;;  %vm3026_vm0 = vcmp.eq.f32.partialorder %v5752_v37, inf }
 0x7f7   : > { %v4337_v48 = vpop.eup %4336  ;;  %v3097_v3 = vsel %vm3096_vm1, %v3000_v13, %v3095_v35  ;;  %v5761_v52 = vpop.xlane.xlu1 %2972  ;;  %v3137_v58 = vadd.f32 1e-06, %v3121_v47  ;;  %v3162_v0 = vmul.f32 %v4335_v38, %v5652_v51  ;;  %v3164_v51 = vmul.f32 %v4333_v34, %v5650_v49 }
 0x7f8   : > { %v4339_v54 = vpop.eup %4338  ;;  %v3100_v55 = vsel %vm3098_vm2, %v3099_v29, %v3097_v3  ;;  %v3102_v57 = vmul.f32 %v4337_v48, %v5730_v8  ;;  %4352 = vrsqrt.f32 %v5761_v52  ;;  %vm3033_vm15 = vcmp.eq.f32.partialorder %v5761_v52, inf }
 0x7f9   : > { %v4341_v9 = vpop.eup %4340  ;;  %v3134_v10 = vadd.f32 1e-06, %v3100_v55  ;;  %v3011_v11 = vmul.f32 %v4339_v54, %v5733_v40  ;;  %v5769_v12 = vpop.xlane.xlu0 %2981  ;;  %4354 = vrcp.f32 %v3136_v41  ;;  %v3036_v3 = vand.u32 2147483648, %v5761_v52 }
 0x7fa   : > { %v4343_v59 = vpop.eup %4342  ;;  %v3104_v60 = vsel %vm3103_vm5, %v5730_v8, %v3102_v57  ;;  %vm3035_vm1 = vcmp.eq.f32.partialorder %v5761_v52, 0.0  ;;  %v3029_v55 = vand.u32 2147483648, %v5752_v37  ;;  %vm3028_vm2 = vcmp.eq.f32.partialorder %v5752_v37, 0.0 }
 0x7fb   : > { %v4345_v2 = vpop.eup %4344  ;;  %4356 = vrcp.f32 %v3134_v10  ;;  %v3107_v4 = vsel %vm3105_vm6, %v3106_v33, %v3104_v60  ;;  %v3013_v6 = vsel %vm3012_vm7, %v5733_v40, %v3011_v11  ;;  %v3018_v7 = vmul.f32 %v4343_v59, %v5736_v19  ;;  %v5790_v43 = vpop.xlane.xlu1 %2984 }
 0x7fc   : > { %v4347_v13 = vpop.eup %4346  ;;  %v3135_v14 = vadd.f32 1e-06, %v3107_v4  ;;  %v3016_v15 = vsel %vm3014_vm8, %v3015_v36, %v3013_v6  ;;  %4358 = vrsqrt.f32 %v5769_v12  ;;  %v3163_v25 = vmul.f32 %v4345_v2, %v5658_v56 }
 0x7fd   : > { %4360 = vrcp.f32 %v3137_v58  ;;  %v3122_v17 = vadd.f32 1e-06, %v3016_v15  ;;  %v3020_v8 = vsel %vm3019_vm9, %v5736_v19, %v3018_v7  ;;  %v3039_v39 = vmul.f32 %v4347_v13, %v5739_v23 }
 0x7fe   : > { %v4349_v22 = vpop.eup %4348  ;;  %4362 = vrcp.f32 %v3135_v14  ;;  %v3023_v40 = vsel %vm3021_vm10, %v3022_v50, %v3020_v8  ;;  %v3174_v19 = vpack.c.bf16 %v3163_v25, %v3162_v0  ;;  %v3165_v36 = vmul.f32 %v4341_v9, %v5654_v53 }
 0x7ff   : > { %4364 = vrcp.f32 %v3122_v17  ;;  %v3123_v49 = vadd.f32 1e-06, %v3023_v40  ;;  %v3041_v26 = vsel %vm3040_vm11, %v5739_v23, %v3039_v39  ;;  %v3046_v28 = vmul.f32 %v4349_v22, %v5744_v30 }
 0x800   : > { %v4351_v29 = vpop.eup %4350  ;;  %v3044_v42 = vsel %vm3042_vm12, %v3043_v62, %v3041_v26  ;;  %4366 = vrsqrt.f32 %v5790_v43  ;;  %4010 = vmatprep.subr.msk.bf16.mxu0 %vm2961_vm4, %v3174_v19  ;;  %4011 = vmatprep.subr.msk.bf16.mxu1 %vm2961_vm4, %v3174_v19  ;;  %v3191_v23 = vsel %vm2961_vm4, %v3174_v19, 0  ;;  %vm3054_vm5 = vcmp.eq.f32.partialorder %v5769_v12, inf }
 0x801   : > { %4368 = vrcp.f32 %v3123_v49  ;;  %v3126_v32 = vadd.f32 1e-06, %v3044_v42  ;;  %v3048_v56 = vsel %vm3047_vm13, %v5744_v30, %v3046_v28  ;;  %v3025_v35 = vmul.f32 %v4351_v29, %v5752_v37  ;;  %3986 = vmatpush3.bf16.xpose.msra.mxu0 %v3191_v23  ;;  %4005 = vmatpush3.bf16.xpose.msra.mxu1 %v3191_v23 }
 0x802   : > { %v4353_v33 = vpop.eup %4352  ;;  %v3051_v34 = vsel %vm3049_vm14, %v3050_v31, %v3048_v56  ;;  %v3175_v30 = vpack.c.bf16 %v3165_v36, %v3164_v51  ;;  %vm3056_vm6 = vcmp.eq.f32.partialorder %v5769_v12, 0.0  ;;  %v3057_v10 = vand.u32 2147483648, %v5769_v12 }
 0x803   : > { %4370 = vrcp.f32 %v3126_v32  ;;  %v3127_v38 = vadd.f32 1e-06, %v3051_v34  ;;  %v3032_v41 = vmul.f32 %v4353_v33, %v5761_v52  ;;  %v4355_v46 = vpop.eup %4354  ;;  %v3027_v53 = vsel %vm3026_vm0, %v5752_v37, %v3025_v35 }
 0x804   : > { %4012 = vmatprep.subr.msk.bf16.mxu0 %vm2961_vm4, %v3175_v30  ;;  %4013 = vmatprep.subr.msk.bf16.mxu1 %vm2961_vm4, %v3175_v30  ;;  %v3030_v11 = vsel %vm3028_vm2, %v3029_v55, %v3027_v53  ;;  %v3194_v6 = vsel %vm2961_vm4, %v3175_v30, 0  ;;  %vm3061_vm7 = vcmp.eq.f32.partialorder %v5790_v43, inf  ;;  %vm3063_vm8 = vcmp.eq.f32.partialorder %v5790_v43, 0.0 }
 0x805   : > { %v4357_v48 = vpop.eup %4356  ;;  %4372 = vrcp.f32 %v3127_v38  ;;  %v3034_v47 = vsel %vm3033_vm15, %v5761_v52, %v3032_v41  ;;  %v3124_v15 = vadd.f32 1e-06, %v3030_v11 }
 0x806   : > { %v4359_v50 = vpop.eup %4358  ;;  %v3037_v57 = vsel %vm3035_vm1, %v3036_v3, %v3034_v47  ;;  %v3166_v60 = vmul.f32 %v4357_v48, %v5672_v63 }
 0x807   : > { %v4361_v54 = vpop.eup %4360  ;;  %v3053_v9 = vmul.f32 %v4359_v50, %v5769_v12  ;;  %v3125_v2 = vadd.f32 1e-06, %v3037_v57 }
 0x808   : > { %v4363_v58 = vpop.eup %4362  ;;  %v3169_v39 = vmul.f32 %v4361_v54, %v5674_v1 }
 0x809   : > { %v4365_v52 = vpop.eup %4364  ;;  %v3055_v59 = vsel %vm3054_vm5, %v5769_v12, %v3053_v9  ;;  %v3167_v62 = vmul.f32 %v4363_v58, %v5678_v5  ;;  %3988 = vmatpush3.bf16.xpose.msra.mxu0 %v3194_v6  ;;  %4006 = vmatpush3.bf16.xpose.msra.mxu1 %v3194_v6  ;;  %v3064_v12 = vand.u32 2147483648, %v5790_v43  ;;  %4374 = vrcp.f32 %v3125_v2 }
 0x80a   : > { %v4367_v0 = vpop.eup %4366  ;;  %v3058_v4 = vsel %vm3056_vm6, %v3057_v10, %v3055_v59  ;;  %v3154_v63 = vmul.f32 %v4365_v52, %v5680_v45  ;;  %v3168_v45 = vmul.f32 %v4355_v46, %v5670_v61 }
 0x80b   : > { %v4369_v37 = vpop.eup %4368  ;;  %v3128_v7 = vadd.f32 1e-06, %v3058_v4  ;;  %v3060_v13 = vmul.f32 %v4367_v0, %v5790_v43  ;;  %v3176_v14 = vpack.c.bf16 %v3167_v62, %v3166_v60 }
 0x80c   : > { %v3155_v5 = vmul.f32 %v4369_v37, %v5687_v44  ;;  %v3177_v26 = vpack.c.bf16 %v3169_v39, %v3168_v45 }
 0x80d   : > { %v4371_v51 = vpop.eup %4370  ;;  %v3062_v17 = vsel %vm3061_vm7, %v5790_v43, %v3060_v13  ;;  %4014 = vmatprep.subr.msk.bf16.mxu0 %vm2961_vm4, %v3176_v14  ;;  %4015 = vmatprep.subr.msk.bf16.mxu1 %vm2961_vm4, %v3176_v14  ;;  %4376 = vrcp.f32 %v3128_v7  ;;  %v3197_v44 = vsel %vm2961_vm4, %v3176_v14, 0 }
 0x80e   : > { %v3065_v8 = vsel %vm3063_vm8, %v3064_v12, %v3062_v17  ;;  %v3170_v22 = vpack.c.bf16 %v3155_v5, %v3154_v63  ;;  %4378 = vrcp.f32 %v3124_v15  ;;  %v3158_v43 = vmul.f32 %v4371_v51, %v5692_v16 }
 0x80f   : > { %v4373_v40 = vpop.eup %4372  ;;  %v3129_v25 = vadd.f32 1e-06, %v3065_v8  ;;  %v3200_v16 = vsel %vm2961_vm4, %v3177_v26, 0 }
 0x810   : > { %3993 = vmatprep.mubr.msk.bf16.mxu0 %vm2961_vm4, %v3170_v22  ;;  %v3159_v49 = vmul.f32 %v4373_v40, %v5697_v18 }
 0x811   : > { %4380 = vrcp.f32 %v3129_v25  ;;  %3990 = vmatpush3.bf16.xpose.msra.mxu0 %v3197_v44  ;;  %4007 = vmatpush3.bf16.xpose.msra.mxu1 %v3197_v44 }
 0x812   : > { %v3172_v28 = vpack.c.bf16 %v3159_v49, %v3158_v43  ;;  %4016 = vmatprep.subr.msk.bf16.mxu0 %vm2961_vm4, %v3177_v26  ;;  %4017 = vmatprep.subr.msk.bf16.mxu1 %vm2961_vm4, %v3177_v26 }
 0x813   : > { %v4375_v61 = vpop.eup %4374 }
 0x814   : > { %3997 = vmatprep.mubr.msk.bf16.mxu1 %vm2961_vm4, %v3172_v28  ;;  %v3157_v42 = vmul.f32 %v4375_v61, %v5707_v21 }
 0x817   : > { %v4377_v1 = vpop.eup %4376 }
 0x818   : > { %v4379_v29 = vpop.eup %4378  ;;  %v3160_v31 = vmul.f32 %v4377_v1, %v5712_v24 }
 0x819   : > { %3992 = vmatpush3.bf16.xpose.msra.mxu0 %v3200_v16  ;;  %4008 = vmatpush3.bf16.xpose.msra.mxu1 %v3200_v16  ;;  %v3156_v32 = vmul.f32 %v4379_v29, %v5702_v20 }
 0x81b   : > { %v4381_v18 = vpop.eup %4380  ;;  %v3171_v33 = vpack.c.bf16 %v3157_v42, %v3156_v32 }
 0x81c   : > { %v3161_v19 = vmul.f32 %v4381_v18, %v5717_v27 }
 0x81e   : > { %v3173_v56 = vpack.c.bf16 %v3161_v19, %v3160_v31 }
 0x820   : > { %3994 = vmatmul.mubr.msk.bf16.vlgmr.msra.gmra.mrb[112].mxu0 %vm2961_vm4, %v3171_v33  ;;  %3998 = vmatmul.mubr.msk.bf16.vlgmr.msra.gmra.mrb[112].mxu1 %vm2961_vm4, %v3173_v56 }
 0x821   : > { %4621 = shalt.err (!%p4618_p11)
}
 0x822   : > { %s4622_s2 = scalar_lea.hbm %s5860_s29, 2048  ;;  %s4626_s3 = scalar_lea.hbm %s6027_s15, 4096 }
 0x823   : > { %p4623_p3 = scmp.ne.s32.totalorder %s5860_s29, %s4622_s2  ;;  %p4627_p7 = scmp.lt.u32.totalorder %s5860_s29, %s6027_s15 }
 0x824   : > { %p4628_p4 = scmp.lt.u32.totalorder %s4626_s3, %s4622_s2  ;;  %p4630_p1 = scmp.lt.u32.totalorder %s4622_s2, %s5860_s29 }
 0x825   : > { %p4624_p5 = pnand %p4623_p3, %p6028_p13 }
 0x826   : > { %p4629_p12 = por %p4628_p4, %p4627_p7 }
 0x827   : > { %p4625_p9 = pneg %p4624_p5 }
 0x828   : > { %p4631_p0 = por %p4630_p1, %p4629_p12 }
 0x82a   : > { %p4632_p2 = pnand %p4631_p0, %p4625_p9 }
 0x82c   : > { %4635 = shalt.err (!%p4632_p2)
}
 0x82d   : > { %s5982_s23 = smov 128   ;;  %s5983_s16 = smov 8  }
 0x82e   : > { %s6029_s13 = scalar_lea.sflag [#allocation18], %s5118_s19  ;;  %s3516_s18 = sshll.u32 %s5118_s19, 6 }
 0x82f   : > { %4049 = dma.vmem_to_hbm [thread:$0]  (%p6028_p13), %s5862_s10, 2048, %s5860_s29, %s6029_s13, %s5982_s23, %s5982_s23, %s5983_s16  }
 0x830   : > { %s679_s30 = scalar_lea.vmem [#allocation16], %s3516_s18  ;;  %s3694_s3 = sshll.u32 %s4852_s0, 10 }
 0x831   : > { %s3294_s2 = sshll.u32 %s679_s30, 4  ;;  %s6030_s29 = sld [smem:[#allocation37_spill]]  ;;  %s5894_s2 = int_to_ptr.vmem [resolvable:$true] %s3294_s2 }
 0x832   : > { %s4636_s18 = scalar_lea.vmem %s5894_s2, 1024  ;;  %s4740_s0 = smov [#allocation16]  }
 0x833   : > { %p4637_p8 = scmp.ne.s32.totalorder %s5894_s2, %s4636_s18 }
 0x835   : > { %p4638_p6 = pnand %p4637_p8, %p6028_p13 }
 0x837   : > { %s5902_s4 = scalar_lea.hbm %s6030_s29, %s3694_s3  ;;  %p4639_p10 = pneg %p4638_p6 }
 0x838   : > { %s4640_s3 = sshll.u32 %s4740_s0, 4  ;;  %s4641_s3 = int_to_ptr.vmem [resolvable:$false] %s4640_s3 }
 0x839   : > { %s4642_s10 = scalar_lea.vmem %s4641_s3, 2048  ;;  %p4643_p11 = scmp.lt.s32.totalorder %s5894_s2, %s4641_s3 }
 0x83a   : > { %p4644_p3 = scmp.lt.s32.totalorder %s4642_s10, %s4636_s18 }
 0x83c   : > { %p4645_p5 = por %p4644_p3, %p4643_p11 }
 0x83e   : > { %p4646_p9 = pnand %p4645_p5, %p4639_p10 }
 0x8f3   : > { %v3995_v20 = vpop.f32.mrb[112].mxu0  ;;  %v3999_v21 = vpop.f32.mrb[112].mxu1 }
 0x8f4   : > { %3269 = vst.msk [vmem:[%s679_s30 + $0x10] sm:$0xff] %vm2823_vm3, %v3995_v20  ;;  %3273 = vst.msk [vmem:[%s679_s30 + $0x30] sm:$0xff] %vm2823_vm3, %v3999_v21  ;;  %v3236_v24 = vpop.f32.mrb[113].mxu0  ;;  %v3252_v27 = vpop.f32.mrb[113].mxu1 }
 0x8f5   : > { %3267 = vst.msk [vmem:[%s679_s30] sm:$0xff] %vm2823_vm3, %v3236_v24  ;;  %3271 = vst.msk [vmem:[%s679_s30 + $0x20] sm:$0xff] %vm2823_vm3, %v3252_v27  ;;  %v3996_v34 = vpop.f32.mrb[114].mxu0  ;;  %v4000_v35 = vpop.f32.mrb[114].mxu1 }
 0x8f6   : > { %3270 = vst.msk [vmem:[%s679_s30 + $0x18] sm:$0xff] %vm2823_vm3, %v3996_v34  ;;  %3274 = vst.msk [vmem:[%s679_s30 + $0x38] sm:$0xff] %vm2823_vm3, %v4000_v35  ;;  %v3239_v23 = vpop.f32.mrb[115].mxu0  ;;  %v3255_v36 = vpop.f32.mrb[115].mxu1 }
 0x8f7   : > { %3268 = vst.msk [vmem:[%s679_s30 + $0x8] sm:$0xff] %vm2823_vm3, %v3239_v23  ;;  %3272 = vst.msk [vmem:[%s679_s30 + $0x28] sm:$0xff] %vm2823_vm3, %v3255_v36 }
 0x8f8   : > { %4649 = shalt.err (!%p4646_p9)
}
 0x8f9   : > { %s4650_s30 = scalar_lea.hbm %s5902_s4, 1024  ;;  %s4654_s0 = scalar_lea.hbm %s6030_s29, 2048 }
 0x8fa   : > { %p4651_p7 = scmp.ne.s32.totalorder %s5902_s4, %s4650_s30  ;;  %p4655_p1 = scmp.lt.u32.totalorder %s5902_s4, %s6030_s29 }
 0x8fb   : > { %p4656_p0 = scmp.lt.u32.totalorder %s4654_s0, %s4650_s30  ;;  %p4658_p8 = scmp.lt.u32.totalorder %s4650_s30, %s5902_s4 }
 0x8fc   : > { %p4652_p4 = pnand %p4651_p7, %p6028_p13 }
 0x8fd   : > { %p4657_p2 = por %p4656_p0, %p4655_p1 }
 0x8fe   : > { %p4653_p12 = pneg %p4652_p4 }
 0x8ff   : > { %p4659_p6 = por %p4658_p8, %p4657_p2 }
 0x901   : > { %p4660_p10 = pnand %p4659_p6, %p4653_p12 }
 0x903   : > { %4663 = shalt.err (!%p4660_p10)
}
 0x904   : > { %s6031_s18 = smov 8   ;;  %s6032_s10 = smov 128  }
 0x905   : > { %s6033_s5 = scalar_lea.sflag [#allocation4], %s5118_s19 }
 0x906   : > { %4048 = dma.vmem_to_hbm [thread:$0]  (%p6028_p13), %s5894_s2, 1024, %s5902_s4, %s6033_s5, %s6032_s10, %s6032_s10, %s6031_s18  }
 0x907 PF: > { %s3325_s23 = sand.u32 1, %s4710_s24   ;;  %p6034_p11 = scmp.ne.s32.totalorder %s6006_s14, 0 }
 0x908   : > { %p6035_p3 = scmp.ge.s32.totalorder %s4722_s27, 2  ;;  %s3326_s16 = scalar_lea.sflag [#allocation4], %s3325_s23 }
 0x90a   : > { %p4079_p5 = pnand %p6035_p3, %p6034_p11 }
 0x90c   : > { %4701 = dma.done.wait (!%p4079_p5), %s3326_s16, 1024  }
 0x90d   : > { %4703 = vsyncadd (!%p4079_p5), %s3326_s16, 4294966272  ;;  %s3335_s20 = scalar_lea.sflag [#allocation18], %s3325_s23 }
 0x90e   : > { %4705 = dma.done.wait (!%p4079_p5), %s3335_s20, 2048  }
 0x90f   : > { %4707 = vsyncadd (!%p4079_p5), %s3335_s20, 4294965248  ;;  %p38_p13 = scmp.ge.s32.totalorder %s5042_s1, 4   ;;  %s6036_s24 = smov %s4714_s25 }
 0x910   : > { %s6037_s25 = smov %s4718_s26  ;;  %s6038_s26 = smov %s5054_s21 }
 0x911   : > { %s6039_s27 = smov %s5042_s1  ;;  %40 = sbr.rel (!%p38_p13) target bundleno = 25 (0x19), region = 177 }
 0x918   :  { %3340 = vsyncpa [#allocation3], 1 }
 0x919   :  { %3342 = vsyncpa [#allocation3 + $0x1], 1 }
 0x91a   :  { %3343 = vsyncpa [#allocation6], 1 }
 0x91b   :  { %3344 = vsyncpa [#allocation9], 1 }
 0x91c   :  { %3345 = vsyncpa [#allocation12], 1 }
 0x91d   :  { %3346 = vsyncpa [#allocation15], 1 }
 0x91e   :  { %3347 = vsyncpa [#allocation4], 1 }
 0x91f   :  { %3349 = vsyncpa [#allocation4 + $0x1], 1 }
 0x920   :  { %3350 = vsyncpa [#allocation18], 1 }
 0x921   :  { %3352 = vsyncpa [#allocation18 + $0x1], 1 }

</bundles_post_ra>
